<compile_context>
chip_gen: v5e
topology: v5e:2x2
jax: 0.10.0
libtpu: 0.0.40
codegen_flags: <defaults>
</compile_context>

<pallas_src>
import functools

import jax
import jax.numpy as jnp
from jax import lax
from jax.experimental import pallas as pl
from jax.experimental.pallas import tpu as pltpu


LANE = 128            # pad hidden width to a lane-dense multiple
                      # TODO(synk): use 256 on v6e/v7x to match the 2x256^2 MXU tile.
MAX_CHUNK = 32        # max timesteps per grid step of the serial recurrence
TILE_M = 256          # row tile for the batched layer-0 input projection
MXU_DTYPE = jnp.bfloat16


def _round_up(x, m):
    return (x + m - 1) // m * m


def _nbytes(a):
    return int(a.size) * a.dtype.itemsize


def _vmem_limit(*byte_counts):
    """Explicit scoped-VMEM limit: generous headroom over the estimated need,
    kept under the v7x 64 MiB physical ceiling."""
    need = int(sum(byte_counts))
    return int(min(max(4 * need + (4 << 20), 8 << 20), 60 << 20))


def _num_batch_blocks(B):
    """v7x has 2 TensorCores: split the batch across them when each block stays
    sublane-aligned (multiple of 8).  Harmless size-1 axis on v5e/v6e."""
    if B % 2 == 0 and (B // 2) % 8 == 0:
        return 2
    return 1


def _pick_unroll(Bb, hidden):
    # Full unroll only while per-step (B,3H) intermediates stay well inside the
    # 64-vreg file; otherwise partial unroll to avoid spill traffic on the
    # serial critical path.
    return True if max(Bb, 8) * 3 * hidden <= 4096 else 4


# ---------------------------------------------------------------------------
# Kernel 1: layer-0 batched input projection   gates = x @ Wi_c + b_in
# Tiled over rows ("parallel" grid); bf16 MXU operands, f32 accumulation.
# ---------------------------------------------------------------------------
def _input_proj_kernel(x_ref, w_ref, b_ref, g_ref):
    g_ref[...] = (
        jnp.dot(x_ref[...].astype(w_ref.dtype), w_ref[...],
                preferred_element_type=jnp.float32)
        + b_ref[...]
    )


def input_proj(x_2d, wi_c, b_in):
    """x_2d: (M, Din) f32; wi_c: (Din, 3Hp) bf16; b_in: (1, 3Hp) f32 -> (M, 3Hp) f32."""
    M, Din = x_2d.shape
    G = wi_c.shape[1]
    if M <= TILE_M:
        tm, Mp = M, M
    else:
        tm = TILE_M
        Mp = _round_up(M, tm)
        if Mp > M:
            x_2d = jnp.pad(x_2d, ((0, Mp - M), (0, 0)))
    out = pl.pallas_call(
        _input_proj_kernel,
        out_shape=jax.ShapeDtypeStruct((Mp, G), jnp.float32),
        grid_spec=pltpu.PrefetchScalarGridSpec(
            num_scalar_prefetch=0,
            grid=(Mp // tm,),
            in_specs=[
                pl.BlockSpec((tm, Din), lambda i: (i, 0)),
                # constant weights/bias: whole array resident in VMEM
                pl.BlockSpec(memory_space=pltpu.MemorySpace.VMEM),
                pl.BlockSpec(memory_space=pltpu.MemorySpace.VMEM),
            ],
            out_specs=pl.BlockSpec((tm, G), lambda i: (i, 0)),
        ),
        compiler_params=pltpu.CompilerParams(
            dimension_semantics=("parallel",),
            vmem_limit_bytes=_vmem_limit(
                2 * _round_up(tm, 8) * max(Din, LANE) * 4,
                2 * _round_up(tm, 8) * G * 4,
                _nbytes(wi_c), _nbytes(b_in)),
        ),
    )(x_2d, wi_c, b_in)
    return out[:M] if Mp > M else out


# ---------------------------------------------------------------------------
# Recurrence (chunked over time, h carried in VMEM scratch across chunks)
# ---------------------------------------------------------------------------
def _gru_steps(g_ref, wh, bhn, h0, *, chunk, hidden, t_valid, chunk_idx, unroll,
               out_ref=None, wi_next=None, b_in_next=None):
    """Run `chunk` GRU steps.  g_ref holds precomputed input gates (chunk,B,3H)
    in f32.  Steps whose global time index >= t_valid (time padding) leave h
    unchanged.  If out_ref/wi_next are given, the NEXT layer's input projection
    is fused in and written per step (no (T,B,H) HBM round trip)."""

    def step(t, h):
        gi = g_ref[t]                                                 # (B, 3H) f32
        gh = jnp.dot(h.astype(wh.dtype), wh,
                     preferred_element_type=jnp.float32)              # bf16 MXU, f32 acc
        # 128-aligned slices (hidden is padded to a multiple of LANE).
        rz = jax.nn.sigmoid(gi[:, : 2 * hidden] + gh[:, : 2 * hidden])
        r = rz[:, :hidden]
        z = rz[:, hidden:]
        # bh_n is added to the n slice only (it is scaled by r).
        n = jnp.tanh(gi[:, 2 * hidden:] + r * (gh[:, 2 * hidden:] + bhn))
        h_new = n + z * (h - n)                                       # == (1-z)*n + z*h
        h_new = jnp.where(chunk_idx * chunk + t < t_valid, h_new, h)  # mask padded steps
        if out_ref is not None:
            # Fused next-layer input projection (MXU is otherwise idle here).
            out_ref[t] = jnp.dot(h_new.astype(wi_next.dtype), wi_next,
                                 preferred_element_type=jnp.float32) + b_in_next
        return h_new

    return lax.fori_loop(0, chunk, step, h0, unroll=unroll)


def _gru_seq_kernel(g_ref, wh_ref, bhn_ref, wi_next_ref, bin_next_ref,
                    gnext_ref, h_scratch, *, chunk, hidden, t_valid, unroll):
    c = pl.program_id(1)

    @pl.when(c == 0)
    def _():
        h_scratch[...] = jnp.zeros_like(h_scratch)

    h_final = _gru_steps(
        g_ref, wh_ref[...], bhn_ref[...], h_scratch[...],
        chunk=chunk, hidden=hidden, t_valid=t_valid, chunk_idx=c, unroll=unroll,
        out_ref=gnext_ref, wi_next=wi_next_ref[...], b_in_next=bin_next_ref[...])
    h_scratch[...] = h_final


def _gru_last_kernel(g_ref, wh_ref, bhn_ref, wfc_ref, bfc_ref, o_ref, h_scratch,
                     *, chunk, hidden, t_valid, unroll):
    c = pl.program_id(1)

    @pl.when(c == 0)
    def _():
        h_scratch[...] = jnp.zeros_like(h_scratch)

    h_final = _gru_steps(
        g_ref, wh_ref[...], bhn_ref[...], h_scratch[...],
        chunk=chunk, hidden=hidden, t_valid=t_valid, chunk_idx=c, unroll=unroll)
    h_scratch[...] = h_final

    # Fused fc on the final hidden state only (no (T,B,H) HBM writeback).
    @pl.when(c == pl.num_programs(1) - 1)
    def _():
        o_ref[...] = (
            jnp.dot(h_final, wfc_ref[...], preferred_element_type=jnp.float32)
            + bfc_ref[...]
        )


def gru_recurrent_seq_fused(gates, wh_c, b_hn, wi_next, b_in_next, *,
                            hidden, chunk, t_valid):
    """Non-last GRU layer over precomputed gates (Tp,B,3H); emits the NEXT
    layer's input gates (Tp, B, 3H_next) directly."""
    Tp, B, G = gates.shape
    Gn = wi_next.shape[1]
    nb = _num_batch_blocks(B)
    Bb = B // nb
    unroll = _pick_unroll(Bb, hidden)
    kernel = functools.partial(_gru_seq_kernel, chunk=chunk, hidden=hidden,
                               t_valid=t_valid, unroll=unroll)
    vmem = _vmem_limit(
        2 * chunk * _round_up(Bb, 8) * G * 4,      # double-buffered gates in
        2 * chunk * _round_up(Bb, 8) * Gn * 4,     # double-buffered gates out
        _nbytes(wh_c), _nbytes(wi_next), _nbytes(b_hn), _nbytes(b_in_next),
        _round_up(Bb, 8) * hidden * 4)             # h scratch
    return pl.pallas_call(
        kernel,
        out_shape=jax.ShapeDtypeStruct((Tp, B, Gn), jnp.float32),
        grid_spec=pltpu.PrefetchScalarGridSpec(
            num_scalar_prefetch=0,
            grid=(nb, Tp // chunk),
            in_specs=[
                pl.BlockSpec((chunk, Bb, G), lambda b, c: (c, b, 0)),
                # constant weights/biases: resident in VMEM, no double-buffering
                pl.BlockSpec(memory_space=pltpu.MemorySpace.VMEM),
                pl.BlockSpec(memory_space=pltpu.MemorySpace.VMEM),
                pl.BlockSpec(memory_space=pltpu.MemorySpace.VMEM),
                pl.BlockSpec(memory_space=pltpu.MemorySpace.VMEM),
            ],
            out_specs=pl.BlockSpec((chunk, Bb, Gn), lambda b, c: (c, b, 0)),
            scratch_shapes=[pltpu.VMEM((Bb, hidden), jnp.float32)],
        ),
        compiler_params=pltpu.CompilerParams(
            # batch blocks are independent (v7x megacore); time chunks are serial
            dimension_semantics=("parallel", "arbitrary"),
            vmem_limit_bytes=vmem,
        ),
    )(gates, wh_c, b_hn, wi_next, b_in_next)


def gru_recurrent_last_fc(gates, wh_c, b_hn, w_fc, b_fc, *, hidden, chunk, t_valid):
    """Last GRU layer + fused Linear on the final hidden state -> (B, output_dim)."""
    Tp, B, G = gates.shape
    O = w_fc.shape[1]
    nb = _num_batch_blocks(B)
    Bb = B // nb
    unroll = _pick_unroll(Bb, hidden)
    kernel = functools.partial(_gru_last_kernel, chunk=chunk, hidden=hidden,
                               t_valid=t_valid, unroll=unroll)
    vmem = _vmem_limit(
        2 * chunk * _round_up(Bb, 8) * G * 4,
        _nbytes(wh_c), _nbytes(b_hn), _nbytes(w_fc), _nbytes(b_fc),
        _round_up(Bb, 8) * hidden * 4,
        _round_up(Bb, 8) * max(O, LANE) * 4)
    return pl.pallas_call(
        kernel,
        out_shape=jax.ShapeDtypeStruct((B, O), jnp.float32),
        grid_spec=pltpu.PrefetchScalarGridSpec(
            num_scalar_prefetch=0,
            grid=(nb, Tp // chunk),
            in_specs=[
                pl.BlockSpec((chunk, Bb, G), lambda b, c: (c, b, 0)),
                pl.BlockSpec(memory_space=pltpu.MemorySpace.VMEM),
                pl.BlockSpec(memory_space=pltpu.MemorySpace.VMEM),
                pl.BlockSpec(memory_space=pltpu.MemorySpace.VMEM),
                pl.BlockSpec(memory_space=pltpu.MemorySpace.VMEM),
            ],
            out_specs=pl.BlockSpec((Bb, O), lambda b, c: (b, 0)),  # resident accumulator
            scratch_shapes=[pltpu.VMEM((Bb, hidden), jnp.float32)],
        ),
        compiler_params=pltpu.CompilerParams(
            dimension_semantics=("parallel", "arbitrary"),
            vmem_limit_bytes=vmem,
        ),
    )(gates, wh_c, b_hn, w_fc, b_fc)


# ---------------------------------------------------------------------------
# Parameters (PyTorch-equivalent raw per-gate form) + folding / padding / bf16
# ---------------------------------------------------------------------------
def init_params(key, input_dim, hidden_dim, num_layers, output_dim):
    """Synthetic parameters matching nn.GRU / nn.Linear shapes (gate order r,z,n)."""
    params = {"layers": []}
    scale = 1.0 / jnp.sqrt(jnp.float32(hidden_dim))
    for layer in range(num_layers):
        d_in = input_dim if layer == 0 else hidden_dim
        key, k1, k2, k3, k4 = jax.random.split(key, 5)
        wi = jax.random.uniform(k1, (3, d_in, hidden_dim), jnp.float32, -scale, scale)
        wh = jax.random.uniform(k2, (3, hidden_dim, hidden_dim), jnp.float32, -scale, scale)
        bi = jax.random.uniform(k3, (3, hidden_dim), jnp.float32, -scale, scale)
        bh = jax.random.uniform(k4, (3, hidden_dim), jnp.float32, -scale, scale)
        params["layers"].append((wi, wh, bi, bh))
    key, k5, k6 = jax.random.split(key, 3)
    params["w_fc"] = jax.random.uniform(
        k5, (hidden_dim, output_dim), jnp.float32, -scale, scale)
    params["b_fc"] = jax.random.uniform(k6, (1, output_dim), jnp.float32, -scale, scale)
    return params


def _prepare_layer(wi, wh, bi, bh, in_rows_pad, h_pad):
    """Fuse gates (r,z,n), fold biases, zero-pad to lane-dense widths, and cast
    the matmul weights to bf16 (MXU-native).  Padded lanes stay exactly zero
    through the recurrence (zero weights/biases -> n=0, h stays 0)."""
    H = wi.shape[2]

    def pad2(w, rows, cols):
        return jnp.pad(w, ((0, rows - w.shape[0]), (0, cols - w.shape[1])))

    def pad1(b):
        return jnp.pad(b, (0, h_pad - H))

    wi_c = jnp.concatenate([pad2(wi[g], in_rows_pad, h_pad) for g in range(3)], axis=1)
    wh_c = jnp.concatenate([pad2(wh[g], h_pad, h_pad) for g in range(3)], axis=1)
    # bi_r+bh_r, bi_z+bh_z and bi_n fold into the precomputed input gates.
    b_in = jnp.concatenate([pad1(bi[0] + bh[0]), pad1(bi[1] + bh[1]), pad1(bi[2])])[None, :]
    # bh_n must stay inside the recurrence (it is scaled by r); n-slice only.
    b_hn = pad1(bh[2])[None, :]
    return wi_c.astype(MXU_DTYPE), wh_c.astype(MXU_DTYPE), b_in, b_hn


# ---------------------------------------------------------------------------
# Full forward (matches the PyTorch module: out = fc(gru(x)[0][:, -1, :]))
# ---------------------------------------------------------------------------
@jax.jit
def gru_forward(x_btd, params):
    x = jnp.transpose(x_btd, (1, 0, 2)).astype(jnp.float32)          # (T, B, Din)
    T, B, Din = x.shape
    layers = params["layers"]
    L = len(layers)
    H = layers[0][1].shape[-1]
    Hp = _round_up(H, LANE)                                          # lane-dense hidden

    # Chunk the time axis; pad T up so awkward T never degenerates to chunk=1.
    n_chunks = pl.cdiv(T, MAX_CHUNK)
    chunk = pl.cdiv(T, n_chunks)
    Tp = chunk * pl.cdiv(T, chunk)

    prepped = []
    in_rows = Din
    for (wi, wh, bi, bh) in layers:
        prepped.append(_prepare_layer(wi, wh, bi, bh, in_rows, Hp))
        in_rows = Hp

    # 1) Layer-0 input projection for all timesteps: one big row-parallel matmul.
    wi0, _, b_in0, _ = prepped[0]
    gates = input_proj(x.reshape(T * B, Din), wi0, b_in0).reshape(T, B, 3 * Hp)
    if Tp > T:
        gates = jnp.pad(gates, ((0, Tp - T), (0, 0), (0, 0)))

    w_fc = jnp.pad(params["w_fc"], ((0, Hp - H), (0, 0)))            # (Hp, O) f32
    b_fc = params["b_fc"]

    # 2) Serial recurrences; non-last layers emit the NEXT layer's gates directly.
    out = None
    for li in range(L):
        _, wh_c, _, b_hn = prepped[li]
        if li == L - 1:
            out = gru_recurrent_last_fc(gates, wh_c, b_hn, w_fc, b_fc,
                                        hidden=Hp, chunk=chunk, t_valid=T)
        else:
            wi_next, _, b_in_next, _ = prepped[li + 1]
            gates = gru_recurrent_seq_fused(gates, wh_c, b_hn, wi_next, b_in_next,
                                            hidden=Hp, chunk=chunk, t_valid=T)
    return out                                                       # (B, output_dim)


# ---------------------------------------------------------------------------
# Pure-JAX reference implementing the exact PyTorch GRU formulas (raw params).
# With mxu_dtype set, matmul operands are rounded to it, mimicking the kernel's
# bf16 MXU inputs (f32 accumulation); with None it is the pure-f32 reference.
# ---------------------------------------------------------------------------
def gru_forward_ref(x_btd, params, mxu_dtype=None):
    def mm(a, b):
        if mxu_dtype is not None:
            a = a.astype(mxu_dtype).astype(jnp.float32)
            b = b.astype(mxu_dtype).astype(jnp.float32)
        return a @ b

    x = jnp.transpose(x_btd, (1, 0, 2)).astype(jnp.float32)
    for (wi, wh, bi, bh) in params["layers"]:
        T, B, _ = x.shape
        H = wi.shape[-1]
        h = jnp.zeros((B, H), jnp.float32)
        outs = []
        for t in range(T):
            xt = x[t]
            r = jax.nn.sigmoid(mm(xt, wi[0]) + bi[0] + mm(h, wh[0]) + bh[0])
            z = jax.nn.sigmoid(mm(xt, wi[1]) + bi[1] + mm(h, wh[1]) + bh[1])
            n = jnp.tanh(mm(xt, wi[2]) + bi[2] + r * (mm(h, wh[2]) + bh[2]))
            h = (1.0 - z) * n + z * h
            outs.append(h)
        x = jnp.stack(outs, axis=0)
    return x[-1] @ params["w_fc"] + params["b_fc"]     # fc kept f32 in the kernel too


if __name__ == "__main__":
    B, T, input_dim, hidden_dim, num_layers, output_dim = 2, 8, 4, 32, 2, 3

    key = jax.random.PRNGKey(0)
    key, kx, kp = jax.random.split(key, 3)
    x = jax.random.normal(kx, (B, T, input_dim), jnp.float32)
    params = init_params(kp, input_dim, hidden_dim, num_layers, output_dim)

    out = gru_forward(x, params)
    jax.block_until_ready(out)
    assert out.shape == (B, output_dim)

    # Tight check against a reference that uses the same bf16 MXU operands.
    ref_bf16 = gru_forward_ref(x, params, mxu_dtype=MXU_DTYPE)
    assert jnp.allclose(out, ref_bf16, atol=5e-3, rtol=5e-3), float(
        jnp.max(jnp.abs(out - ref_bf16)))

    # Loose check against the pure-f32 PyTorch formulas (gap = bf16 MXU rounding).
    ref_f32 = gru_forward_ref(x, params)
    assert jnp.allclose(out, ref_f32, atol=5e-2, rtol=5e-2), float(
        jnp.max(jnp.abs(out - ref_f32)))

    print("KERNEL_OK")
</pallas_src>

<mosaic_0001>
module attributes {stable_mosaic.version = 11 : i64} {
  func.func @_input_proj_kernel(%arg0: i32, %arg1: memref<16x4xf32, #tpu.memory_space<vmem>>, %arg2: memref<4x384xbf16, #tpu.memory_space<vmem>>, %arg3: memref<1x384xf32, #tpu.memory_space<vmem>>, %arg4: memref<16x384xf32, #tpu.memory_space<vmem>>) attributes {dimension_semantics = [#tpu.dimension_semantics<parallel>], iteration_bounds = array<i64: 1>, scalar_prefetch = 0 : i64, scratch_operands = 0 : i64, tpu.core_type = #tpu.core_type<tc>, window_params = [{transform_indices = @transform_0, window_bounds = array<i64: 16, 4>}, {pipeline_mode = #tpu.pipeline_mode<synchronous>, transform_indices = @transform_1, window_bounds = array<i64: 4, 384>}, {pipeline_mode = #tpu.pipeline_mode<synchronous>, transform_indices = @transform_2, window_bounds = array<i64: 1, 384>}, {transform_indices = @transform_3, window_bounds = array<i64: 16, 384>}]} {
    %c0 = arith.constant 0 : index
    %c0_0 = arith.constant 0 : index
    %0 = vector.load %arg1[%c0, %c0_0] : memref<16x4xf32, #tpu.memory_space<vmem>>, vector<16x4xf32>
    %1 = arith.truncf %0 : vector<16x4xf32> to vector<16x4xbf16>
    %c0_1 = arith.constant 0 : index
    %c0_2 = arith.constant 0 : index
    %2 = vector.load %arg2[%c0_1, %c0_2] : memref<4x384xbf16, #tpu.memory_space<vmem>>, vector<4x384xbf16>
    %cst = arith.constant dense<0.000000e+00> : vector<16x384xf32>
    %3 = tpu.matmul %1, %2, %cst {dimension_numbers = #tpu.dot_dimension_numbers<[1], [0], [0], [1], [0, 0, 1, 1], [], []>} : vector<16x4xbf16>, vector<4x384xbf16>, vector<16x384xf32> -> vector<16x384xf32>
    %c0_3 = arith.constant 0 : index
    %c0_4 = arith.constant 0 : index
    %4 = vector.load %arg3[%c0_3, %c0_4] : memref<1x384xf32, #tpu.memory_space<vmem>>, vector<1x384xf32>
    %5 = vector.broadcast %4 : vector<1x384xf32> to vector<16x384xf32>
    %6 = arith.addf %3, %5 : vector<16x384xf32>
    %c0_5 = arith.constant 0 : index
    %c0_6 = arith.constant 0 : index
    %7 = vector.load %arg4[%c0_5, %c0_6] : memref<16x384xf32, #tpu.memory_space<vmem>>, vector<16x384xf32>
    tpu.vector_store %arg4[%c0_5, %c0_6], %6 {strides = array<i32>} : memref<16x384xf32, #tpu.memory_space<vmem>>, vector<16x384xf32>,
    return
  }
  func.func @transform_0(%arg0: i32) -> (i32, i32) {
    %c0_i32 = arith.constant 0 : i32
    %c0_i32_0 = arith.constant 0 : i32
    return %arg0, %c0_i32 : i32, i32
  }
  func.func @transform_1(%arg0: i32) -> (i32, i32) {
    %c0_i32 = arith.constant 0 : i32
    %c0_i32_0 = arith.constant 0 : i32
    %c0_i32_1 = arith.constant 0 : i32
    return %c0_i32, %c0_i32_0 : i32, i32
  }
  func.func @transform_2(%arg0: i32) -> (i32, i32) {
    %c0_i32 = arith.constant 0 : i32
    %c0_i32_0 = arith.constant 0 : i32
    %c0_i32_1 = arith.constant 0 : i32
    return %c0_i32, %c0_i32_0 : i32, i32
  }
  func.func @transform_3(%arg0: i32) -> (i32, i32) {
    %c0_i32 = arith.constant 0 : i32
    %c0_i32_0 = arith.constant 0 : i32
    return %arg0, %c0_i32 : i32, i32
  }
}

module attributes {stable_mosaic.version = 11 : i64} {
  func.func @_gru_seq_kernel(%arg0: i32, %arg1: i32, %arg2: memref<8x2x384xf32, #tpu.memory_space<vmem>>, %arg3: memref<128x384xbf16, #tpu.memory_space<vmem>>, %arg4: memref<1x128xf32, #tpu.memory_space<vmem>>, %arg5: memref<128x384xbf16, #tpu.memory_space<vmem>>, %arg6: memref<1x384xf32, #tpu.memory_space<vmem>>, %arg7: memref<8x2x384xf32, #tpu.memory_space<vmem>>, %arg8: memref<2x128xf32, #tpu.memory_space<vmem>>) attributes {dimension_semantics = [#tpu.dimension_semantics<parallel>, #tpu.dimension_semantics<arbitrary>], iteration_bounds = array<i64: 1, 1>, scalar_prefetch = 0 : i64, scratch_operands = 1 : i64, tpu.core_type = #tpu.core_type<tc>, window_params = [{transform_indices = @transform_0, window_bounds = array<i64: 8, 2, 384>}, {pipeline_mode = #tpu.pipeline_mode<synchronous>, transform_indices = @transform_1, window_bounds = array<i64: 128, 384>}, {pipeline_mode = #tpu.pipeline_mode<synchronous>, transform_indices = @transform_2, window_bounds = array<i64: 1, 128>}, {pipeline_mode = #tpu.pipeline_mode<synchronous>, transform_indices = @transform_3, window_bounds = array<i64: 128, 384>}, {pipeline_mode = #tpu.pipeline_mode<synchronous>, transform_indices = @transform_4, window_bounds = array<i64: 1, 384>}, {transform_indices = @transform_5, window_bounds = array<i64: 8, 2, 384>}]} {
    %c0_i32 = arith.constant 0 : i32
    %0 = arith.cmpi eq, %arg1, %c0_i32 : i32
    %1 = arith.extui %0 : i1 to i32
    %c0_i32_0 = arith.constant 0 : i32
    %2 = arith.cmpi ne, %1, %c0_i32_0 : i32
    scf.if %2 {
      %cst_84 = arith.constant 0.000000e+00 : f32
      %305 = vector.broadcast %cst_84 : f32 to vector<2x128xf32>
      %c0_85 = arith.constant 0 : index
      %c0_86 = arith.constant 0 : index
      %306 = vector.load %arg8[%c0_85, %c0_86] : memref<2x128xf32, #tpu.memory_space<vmem>>, vector<2x128xf32>
      tpu.vector_store %arg8[%c0_85, %c0_86], %305 {strides = array<i32>} : memref<2x128xf32, #tpu.memory_space<vmem>>, vector<2x128xf32>,
    } else {
    }
    %c0 = arith.constant 0 : index
    %c0_1 = arith.constant 0 : index
    %3 = vector.load %arg3[%c0, %c0_1] : memref<128x384xbf16, #tpu.memory_space<vmem>>, vector<128x384xbf16>
    %c0_2 = arith.constant 0 : index
    %c0_3 = arith.constant 0 : index
    %4 = vector.load %arg4[%c0_2, %c0_3] : memref<1x128xf32, #tpu.memory_space<vmem>>, vector<1x128xf32>
    %c0_4 = arith.constant 0 : index
    %c0_5 = arith.constant 0 : index
    %5 = vector.load %arg8[%c0_4, %c0_5] : memref<2x128xf32, #tpu.memory_space<vmem>>, vector<2x128xf32>
    %c0_6 = arith.constant 0 : index
    %c0_7 = arith.constant 0 : index
    %6 = vector.load %arg5[%c0_6, %c0_7] : memref<128x384xbf16, #tpu.memory_space<vmem>>, vector<128x384xbf16>
    %c0_8 = arith.constant 0 : index
    %c0_9 = arith.constant 0 : index
    %7 = vector.load %arg6[%c0_8, %c0_9] : memref<1x384xf32, #tpu.memory_space<vmem>>, vector<1x384xf32>
    %c0_i32_10 = arith.constant 0 : i32
    %8 = arith.index_cast %c0_i32_10 : i32 to index
    %c0_11 = arith.constant 0 : index
    %c0_12 = arith.constant 0 : index
    %9 = vector.load %arg2[%8, %c0_11, %c0_12] : memref<8x2x384xf32, #tpu.memory_space<vmem>>, vector<1x2x384xf32>
    %10 = vector.shape_cast %9 : vector<1x2x384xf32> to vector<2x384xf32>
    %11 = arith.truncf %5 : vector<2x128xf32> to vector<2x128xbf16>
    %cst = arith.constant dense<0.000000e+00> : vector<2x384xf32>
    %12 = tpu.matmul %11, %3, %cst {dimension_numbers = #tpu.dot_dimension_numbers<[1], [0], [0], [1], [0, 0, 1, 1], [], []>} : vector<2x128xbf16>, vector<128x384xbf16>, vector<2x384xf32> -> vector<2x384xf32>
    %13 = vector.extract_strided_slice %10 {offsets = [0, 0], sizes = [2, 256], strides = [1, 1]} : vector<2x384xf32> to vector<2x256xf32>
    %14 = vector.extract_strided_slice %12 {offsets = [0, 0], sizes = [2, 256], strides = [1, 1]} : vector<2x384xf32> to vector<2x256xf32>
    %15 = arith.addf %13, %14 : vector<2x256xf32>
    %16 = arith.negf %15 : vector<2x256xf32>
    %17 = math.exp %16 : vector<2x256xf32>
    %cst_13 = arith.constant 1.000000e+00 : f32
    %18 = vector.broadcast %cst_13 : f32 to vector<2x256xf32>
    %19 = arith.addf %18, %17 : vector<2x256xf32>
    %20 = arith.divf %18, %19 : vector<2x256xf32>
    %21 = vector.extract_strided_slice %20 {offsets = [0, 0], sizes = [2, 128], strides = [1, 1]} : vector<2x256xf32> to vector<2x128xf32>
    %22 = vector.extract_strided_slice %20 {offsets = [0, 128], sizes = [2, 128], strides = [1, 1]} : vector<2x256xf32> to vector<2x128xf32>
    %23 = vector.extract_strided_slice %10 {offsets = [0, 256], sizes = [2, 128], strides = [1, 1]} : vector<2x384xf32> to vector<2x128xf32>
    %24 = vector.extract_strided_slice %12 {offsets = [0, 256], sizes = [2, 128], strides = [1, 1]} : vector<2x384xf32> to vector<2x128xf32>
    %25 = vector.broadcast %4 : vector<1x128xf32> to vector<2x128xf32>
    %26 = arith.addf %24, %25 : vector<2x128xf32>
    %27 = arith.mulf %21, %26 : vector<2x128xf32>
    %28 = arith.addf %23, %27 : vector<2x128xf32>
    %29 = math.tanh %28 : vector<2x128xf32>
    %30 = arith.subf %5, %29 : vector<2x128xf32>
    %31 = arith.mulf %22, %30 : vector<2x128xf32>
    %32 = arith.addf %29, %31 : vector<2x128xf32>
    %c8_i32 = arith.constant 8 : i32
    %33 = arith.muli %arg1, %c8_i32 : i32
    %34 = arith.addi %33, %c0_i32_10 : i32
    %c8_i32_14 = arith.constant 8 : i32
    %35 = arith.cmpi slt, %34, %c8_i32_14 : i32
    %36 = arith.select %35, %32, %5 : vector<2x128xf32>
    %37 = arith.truncf %36 : vector<2x128xf32> to vector<2x128xbf16>
    %cst_15 = arith.constant dense<0.000000e+00> : vector<2x384xf32>
    %38 = tpu.matmul %37, %6, %cst_15 {dimension_numbers = #tpu.dot_dimension_numbers<[1], [0], [0], [1], [0, 0, 1, 1], [], []>} : vector<2x128xbf16>, vector<128x384xbf16>, vector<2x384xf32> -> vector<2x384xf32>
    %39 = vector.broadcast %7 : vector<1x384xf32> to vector<2x384xf32>
    %40 = arith.addf %38, %39 : vector<2x384xf32>
    %41 = arith.index_cast %c0_i32_10 : i32 to index
    %c0_16 = arith.constant 0 : index
    %c0_17 = arith.constant 0 : index
    %42 = vector.load %arg7[%41, %c0_16, %c0_17] : memref<8x2x384xf32, #tpu.memory_space<vmem>>, vector<1x2x384xf32>
    %43 = vector.shape_cast %42 : vector<1x2x384xf32> to vector<2x384xf32>
    %44 = vector.shape_cast %40 : vector<2x384xf32> to vector<1x2x384xf32>
    tpu.vector_store %arg7[%41, %c0_16, %c0_17], %44 {strides = array<i32>} : memref<8x2x384xf32, #tpu.memory_space<vmem>>, vector<1x2x384xf32>,
    %c1_i32 = arith.constant 1 : i32
    %45 = arith.index_cast %c1_i32 : i32 to index
    %c0_18 = arith.constant 0 : index
    %c0_19 = arith.constant 0 : index
    %46 = vector.load %arg2[%45, %c0_18, %c0_19] : memref<8x2x384xf32, #tpu.memory_space<vmem>>, vector<1x2x384xf32>
    %47 = vector.shape_cast %46 : vector<1x2x384xf32> to vector<2x384xf32>
    %48 = arith.truncf %36 : vector<2x128xf32> to vector<2x128xbf16>
    %cst_20 = arith.constant dense<0.000000e+00> : vector<2x384xf32>
    %49 = tpu.matmul %48, %3, %cst_20 {dimension_numbers = #tpu.dot_dimension_numbers<[1], [0], [0], [1], [0, 0, 1, 1], [], []>} : vector<2x128xbf16>, vector<128x384xbf16>, vector<2x384xf32> -> vector<2x384xf32>
    %50 = vector.extract_strided_slice %47 {offsets = [0, 0], sizes = [2, 256], strides = [1, 1]} : vector<2x384xf32> to vector<2x256xf32>
    %51 = vector.extract_strided_slice %49 {offsets = [0, 0], sizes = [2, 256], strides = [1, 1]} : vector<2x384xf32> to vector<2x256xf32>
    %52 = arith.addf %50, %51 : vector<2x256xf32>
    %53 = arith.negf %52 : vector<2x256xf32>
    %54 = math.exp %53 : vector<2x256xf32>
    %cst_21 = arith.constant 1.000000e+00 : f32
    %55 = vector.broadcast %cst_21 : f32 to vector<2x256xf32>
    %56 = arith.addf %55, %54 : vector<2x256xf32>
    %57 = arith.divf %55, %56 : vector<2x256xf32>
    %58 = vector.extract_strided_slice %57 {offsets = [0, 0], sizes = [2, 128], strides = [1, 1]} : vector<2x256xf32> to vector<2x128xf32>
    %59 = vector.extract_strided_slice %57 {offsets = [0, 128], sizes = [2, 128], strides = [1, 1]} : vector<2x256xf32> to vector<2x128xf32>
    %60 = vector.extract_strided_slice %47 {offsets = [0, 256], sizes = [2, 128], strides = [1, 1]} : vector<2x384xf32> to vector<2x128xf32>
    %61 = vector.extract_strided_slice %49 {offsets = [0, 256], sizes = [2, 128], strides = [1, 1]} : vector<2x384xf32> to vector<2x128xf32>
    %62 = vector.broadcast %4 : vector<1x128xf32> to vector<2x128xf32>
    %63 = arith.addf %61, %62 : vector<2x128xf32>
    %64 = arith.mulf %58, %63 : vector<2x128xf32>
    %65 = arith.addf %60, %64 : vector<2x128xf32>
    %66 = math.tanh %65 : vector<2x128xf32>
    %67 = arith.subf %36, %66 : vector<2x128xf32>
    %68 = arith.mulf %59, %67 : vector<2x128xf32>
    %69 = arith.addf %66, %68 : vector<2x128xf32>
    %c8_i32_22 = arith.constant 8 : i32
    %70 = arith.muli %arg1, %c8_i32_22 : i32
    %71 = arith.addi %70, %c1_i32 : i32
    %c8_i32_23 = arith.constant 8 : i32
    %72 = arith.cmpi slt, %71, %c8_i32_23 : i32
    %73 = arith.select %72, %69, %36 : vector<2x128xf32>
    %74 = arith.truncf %73 : vector<2x128xf32> to vector<2x128xbf16>
    %cst_24 = arith.constant dense<0.000000e+00> : vector<2x384xf32>
    %75 = tpu.matmul %74, %6, %cst_24 {dimension_numbers = #tpu.dot_dimension_numbers<[1], [0], [0], [1], [0, 0, 1, 1], [], []>} : vector<2x128xbf16>, vector<128x384xbf16>, vector<2x384xf32> -> vector<2x384xf32>
    %76 = vector.broadcast %7 : vector<1x384xf32> to vector<2x384xf32>
    %77 = arith.addf %75, %76 : vector<2x384xf32>
    %78 = arith.index_cast %c1_i32 : i32 to index
    %c0_25 = arith.constant 0 : index
    %c0_26 = arith.constant 0 : index
    %79 = vector.load %arg7[%78, %c0_25, %c0_26] : memref<8x2x384xf32, #tpu.memory_space<vmem>>, vector<1x2x384xf32>
    %80 = vector.shape_cast %79 : vector<1x2x384xf32> to vector<2x384xf32>
    %81 = vector.shape_cast %77 : vector<2x384xf32> to vector<1x2x384xf32>
    tpu.vector_store %arg7[%78, %c0_25, %c0_26], %81 {strides = array<i32>} : memref<8x2x384xf32, #tpu.memory_space<vmem>>, vector<1x2x384xf32>,
    %c2_i32 = arith.constant 2 : i32
    %82 = arith.index_cast %c2_i32 : i32 to index
    %c0_27 = arith.constant 0 : index
    %c0_28 = arith.constant 0 : index
    %83 = vector.load %arg2[%82, %c0_27, %c0_28] : memref<8x2x384xf32, #tpu.memory_space<vmem>>, vector<1x2x384xf32>
    %84 = vector.shape_cast %83 : vector<1x2x384xf32> to vector<2x384xf32>
    %85 = arith.truncf %73 : vector<2x128xf32> to vector<2x128xbf16>
    %cst_29 = arith.constant dense<0.000000e+00> : vector<2x384xf32>
    %86 = tpu.matmul %85, %3, %cst_29 {dimension_numbers = #tpu.dot_dimension_numbers<[1], [0], [0], [1], [0, 0, 1, 1], [], []>} : vector<2x128xbf16>, vector<128x384xbf16>, vector<2x384xf32> -> vector<2x384xf32>
    %87 = vector.extract_strided_slice %84 {offsets = [0, 0], sizes = [2, 256], strides = [1, 1]} : vector<2x384xf32> to vector<2x256xf32>
    %88 = vector.extract_strided_slice %86 {offsets = [0, 0], sizes = [2, 256], strides = [1, 1]} : vector<2x384xf32> to vector<2x256xf32>
    %89 = arith.addf %87, %88 : vector<2x256xf32>
    %90 = arith.negf %89 : vector<2x256xf32>
    %91 = math.exp %90 : vector<2x256xf32>
    %cst_30 = arith.constant 1.000000e+00 : f32
    %92 = vector.broadcast %cst_30 : f32 to vector<2x256xf32>
    %93 = arith.addf %92, %91 : vector<2x256xf32>
    %94 = arith.divf %92, %93 : vector<2x256xf32>
    %95 = vector.extract_strided_slice %94 {offsets = [0, 0], sizes = [2, 128], strides = [1, 1]} : vector<2x256xf32> to vector<2x128xf32>
    %96 = vector.extract_strided_slice %94 {offsets = [0, 128], sizes = [2, 128], strides = [1, 1]} : vector<2x256xf32> to vector<2x128xf32>
    %97 = vector.extract_strided_slice %84 {offsets = [0, 256], sizes = [2, 128], strides = [1, 1]} : vector<2x384xf32> to vector<2x128xf32>
    %98 = vector.extract_strided_slice %86 {offsets = [0, 256], sizes = [2, 128], strides = [1, 1]} : vector<2x384xf32> to vector<2x128xf32>
    %99 = vector.broadcast %4 : vector<1x128xf32> to vector<2x128xf32>
    %100 = arith.addf %98, %99 : vector<2x128xf32>
    %101 = arith.mulf %95, %100 : vector<2x128xf32>
    %102 = arith.addf %97, %101 : vector<2x128xf32>
    %103 = math.tanh %102 : vector<2x128xf32>
    %104 = arith.subf %73, %103 : vector<2x128xf32>
    %105 = arith.mulf %96, %104 : vector<2x128xf32>
    %106 = arith.addf %103, %105 : vector<2x128xf32>
    %c8_i32_31 = arith.constant 8 : i32
    %107 = arith.muli %arg1, %c8_i32_31 : i32
    %108 = arith.addi %107, %c2_i32 : i32
    %c8_i32_32 = arith.constant 8 : i32
    %109 = arith.cmpi slt, %108, %c8_i32_32 : i32
    %110 = arith.select %109, %106, %73 : vector<2x128xf32>
    %111 = arith.truncf %110 : vector<2x128xf32> to vector<2x128xbf16>
    %cst_33 = arith.constant dense<0.000000e+00> : vector<2x384xf32>
    %112 = tpu.matmul %111, %6, %cst_33 {dimension_numbers = #tpu.dot_dimension_numbers<[1], [0], [0], [1], [0, 0, 1, 1], [], []>} : vector<2x128xbf16>, vector<128x384xbf16>, vector<2x384xf32> -> vector<2x384xf32>
    %113 = vector.broadcast %7 : vector<1x384xf32> to vector<2x384xf32>
    %114 = arith.addf %112, %113 : vector<2x384xf32>
    %115 = arith.index_cast %c2_i32 : i32 to index
    %c0_34 = arith.constant 0 : index
    %c0_35 = arith.constant 0 : index
    %116 = vector.load %arg7[%115, %c0_34, %c0_35] : memref<8x2x384xf32, #tpu.memory_space<vmem>>, vector<1x2x384xf32>
    %117 = vector.shape_cast %116 : vector<1x2x384xf32> to vector<2x384xf32>
    %118 = vector.shape_cast %114 : vector<2x384xf32> to vector<1x2x384xf32>
    tpu.vector_store %arg7[%115, %c0_34, %c0_35], %118 {strides = array<i32>} : memref<8x2x384xf32, #tpu.memory_space<vmem>>, vector<1x2x384xf32>,
    %c3_i32 = arith.constant 3 : i32
    %119 = arith.index_cast %c3_i32 : i32 to index
    %c0_36 = arith.constant 0 : index
    %c0_37 = arith.constant 0 : index
    %120 = vector.load %arg2[%119, %c0_36, %c0_37] : memref<8x2x384xf32, #tpu.memory_space<vmem>>, vector<1x2x384xf32>
    %121 = vector.shape_cast %120 : vector<1x2x384xf32> to vector<2x384xf32>
    %122 = arith.truncf %110 : vector<2x128xf32> to vector<2x128xbf16>
    %cst_38 = arith.constant dense<0.000000e+00> : vector<2x384xf32>
    %123 = tpu.matmul %122, %3, %cst_38 {dimension_numbers = #tpu.dot_dimension_numbers<[1], [0], [0], [1], [0, 0, 1, 1], [], []>} : vector<2x128xbf16>, vector<128x384xbf16>, vector<2x384xf32> -> vector<2x384xf32>
    %124 = vector.extract_strided_slice %121 {offsets = [0, 0], sizes = [2, 256], strides = [1, 1]} : vector<2x384xf32> to vector<2x256xf32>
    %125 = vector.extract_strided_slice %123 {offsets = [0, 0], sizes = [2, 256], strides = [1, 1]} : vector<2x384xf32> to vector<2x256xf32>
    %126 = arith.addf %124, %125 : vector<2x256xf32>
    %127 = arith.negf %126 : vector<2x256xf32>
    %128 = math.exp %127 : vector<2x256xf32>
    %cst_39 = arith.constant 1.000000e+00 : f32
    %129 = vector.broadcast %cst_39 : f32 to vector<2x256xf32>
    %130 = arith.addf %129, %128 : vector<2x256xf32>
    %131 = arith.divf %129, %130 : vector<2x256xf32>
    %132 = vector.extract_strided_slice %131 {offsets = [0, 0], sizes = [2, 128], strides = [1, 1]} : vector<2x256xf32> to vector<2x128xf32>
    %133 = vector.extract_strided_slice %131 {offsets = [0, 128], sizes = [2, 128], strides = [1, 1]} : vector<2x256xf32> to vector<2x128xf32>
    %134 = vector.extract_strided_slice %121 {offsets = [0, 256], sizes = [2, 128], strides = [1, 1]} : vector<2x384xf32> to vector<2x128xf32>
    %135 = vector.extract_strided_slice %123 {offsets = [0, 256], sizes = [2, 128], strides = [1, 1]} : vector<2x384xf32> to vector<2x128xf32>
    %136 = vector.broadcast %4 : vector<1x128xf32> to vector<2x128xf32>
    %137 = arith.addf %135, %136 : vector<2x128xf32>
    %138 = arith.mulf %132, %137 : vector<2x128xf32>
    %139 = arith.addf %134, %138 : vector<2x128xf32>
    %140 = math.tanh %139 : vector<2x128xf32>
    %141 = arith.subf %110, %140 : vector<2x128xf32>
    %142 = arith.mulf %133, %141 : vector<2x128xf32>
    %143 = arith.addf %140, %142 : vector<2x128xf32>
    %c8_i32_40 = arith.constant 8 : i32
    %144 = arith.muli %arg1, %c8_i32_40 : i32
    %145 = arith.addi %144, %c3_i32 : i32
    %c8_i32_41 = arith.constant 8 : i32
    %146 = arith.cmpi slt, %145, %c8_i32_41 : i32
    %147 = arith.select %146, %143, %110 : vector<2x128xf32>
    %148 = arith.truncf %147 : vector<2x128xf32> to vector<2x128xbf16>
    %cst_42 = arith.constant dense<0.000000e+00> : vector<2x384xf32>
    %149 = tpu.matmul %148, %6, %cst_42 {dimension_numbers = #tpu.dot_dimension_numbers<[1], [0], [0], [1], [0, 0, 1, 1], [], []>} : vector<2x128xbf16>, vector<128x384xbf16>, vector<2x384xf32> -> vector<2x384xf32>
    %150 = vector.broadcast %7 : vector<1x384xf32> to vector<2x384xf32>
    %151 = arith.addf %149, %150 : vector<2x384xf32>
    %152 = arith.index_cast %c3_i32 : i32 to index
    %c0_43 = arith.constant 0 : index
    %c0_44 = arith.constant 0 : index
    %153 = vector.load %arg7[%152, %c0_43, %c0_44] : memref<8x2x384xf32, #tpu.memory_space<vmem>>, vector<1x2x384xf32>
    %154 = vector.shape_cast %153 : vector<1x2x384xf32> to vector<2x384xf32>
    %155 = vector.shape_cast %151 : vector<2x384xf32> to vector<1x2x384xf32>
    tpu.vector_store %arg7[%152, %c0_43, %c0_44], %155 {strides = array<i32>} : memref<8x2x384xf32, #tpu.memory_space<vmem>>, vector<1x2x384xf32>,
    %c4_i32 = arith.constant 4 : i32
    %156 = arith.index_cast %c4_i32 : i32 to index
    %c0_45 = arith.constant 0 : index
    %c0_46 = arith.constant 0 : index
    %157 = vector.load %arg2[%156, %c0_45, %c0_46] : memref<8x2x384xf32, #tpu.memory_space<vmem>>, vector<1x2x384xf32>
    %158 = vector.shape_cast %157 : vector<1x2x384xf32> to vector<2x384xf32>
    %159 = arith.truncf %147 : vector<2x128xf32> to vector<2x128xbf16>
    %cst_47 = arith.constant dense<0.000000e+00> : vector<2x384xf32>
    %160 = tpu.matmul %159, %3, %cst_47 {dimension_numbers = #tpu.dot_dimension_numbers<[1], [0], [0], [1], [0, 0, 1, 1], [], []>} : vector<2x128xbf16>, vector<128x384xbf16>, vector<2x384xf32> -> vector<2x384xf32>
    %161 = vector.extract_strided_slice %158 {offsets = [0, 0], sizes = [2, 256], strides = [1, 1]} : vector<2x384xf32> to vector<2x256xf32>
    %162 = vector.extract_strided_slice %160 {offsets = [0, 0], sizes = [2, 256], strides = [1, 1]} : vector<2x384xf32> to vector<2x256xf32>
    %163 = arith.addf %161, %162 : vector<2x256xf32>
    %164 = arith.negf %163 : vector<2x256xf32>
    %165 = math.exp %164 : vector<2x256xf32>
    %cst_48 = arith.constant 1.000000e+00 : f32
    %166 = vector.broadcast %cst_48 : f32 to vector<2x256xf32>
    %167 = arith.addf %166, %165 : vector<2x256xf32>
    %168 = arith.divf %166, %167 : vector<2x256xf32>
    %169 = vector.extract_strided_slice %168 {offsets = [0, 0], sizes = [2, 128], strides = [1, 1]} : vector<2x256xf32> to vector<2x128xf32>
    %170 = vector.extract_strided_slice %168 {offsets = [0, 128], sizes = [2, 128], strides = [1, 1]} : vector<2x256xf32> to vector<2x128xf32>
    %171 = vector.extract_strided_slice %158 {offsets = [0, 256], sizes = [2, 128], strides = [1, 1]} : vector<2x384xf32> to vector<2x128xf32>
    %172 = vector.extract_strided_slice %160 {offsets = [0, 256], sizes = [2, 128], strides = [1, 1]} : vector<2x384xf32> to vector<2x128xf32>
    %173 = vector.broadcast %4 : vector<1x128xf32> to vector<2x128xf32>
    %174 = arith.addf %172, %173 : vector<2x128xf32>
    %175 = arith.mulf %169, %174 : vector<2x128xf32>
    %176 = arith.addf %171, %175 : vector<2x128xf32>
    %177 = math.tanh %176 : vector<2x128xf32>
    %178 = arith.subf %147, %177 : vector<2x128xf32>
    %179 = arith.mulf %170, %178 : vector<2x128xf32>
    %180 = arith.addf %177, %179 : vector<2x128xf32>
    %c8_i32_49 = arith.constant 8 : i32
    %181 = arith.muli %arg1, %c8_i32_49 : i32
    %182 = arith.addi %181, %c4_i32 : i32
    %c8_i32_50 = arith.constant 8 : i32
    %183 = arith.cmpi slt, %182, %c8_i32_50 : i32
    %184 = arith.select %183, %180, %147 : vector<2x128xf32>
    %185 = arith.truncf %184 : vector<2x128xf32> to vector<2x128xbf16>
    %cst_51 = arith.constant dense<0.000000e+00> : vector<2x384xf32>
    %186 = tpu.matmul %185, %6, %cst_51 {dimension_numbers = #tpu.dot_dimension_numbers<[1], [0], [0], [1], [0, 0, 1, 1], [], []>} : vector<2x128xbf16>, vector<128x384xbf16>, vector<2x384xf32> -> vector<2x384xf32>
    %187 = vector.broadcast %7 : vector<1x384xf32> to vector<2x384xf32>
    %188 = arith.addf %186, %187 : vector<2x384xf32>
    %189 = arith.index_cast %c4_i32 : i32 to index
    %c0_52 = arith.constant 0 : index
    %c0_53 = arith.constant 0 : index
    %190 = vector.load %arg7[%189, %c0_52, %c0_53] : memref<8x2x384xf32, #tpu.memory_space<vmem>>, vector<1x2x384xf32>
    %191 = vector.shape_cast %190 : vector<1x2x384xf32> to vector<2x384xf32>
    %192 = vector.shape_cast %188 : vector<2x384xf32> to vector<1x2x384xf32>
    tpu.vector_store %arg7[%189, %c0_52, %c0_53], %192 {strides = array<i32>} : memref<8x2x384xf32, #tpu.memory_space<vmem>>, vector<1x2x384xf32>,
    %c5_i32 = arith.constant 5 : i32
    %193 = arith.index_cast %c5_i32 : i32 to index
    %c0_54 = arith.constant 0 : index
    %c0_55 = arith.constant 0 : index
    %194 = vector.load %arg2[%193, %c0_54, %c0_55] : memref<8x2x384xf32, #tpu.memory_space<vmem>>, vector<1x2x384xf32>
    %195 = vector.shape_cast %194 : vector<1x2x384xf32> to vector<2x384xf32>
    %196 = arith.truncf %184 : vector<2x128xf32> to vector<2x128xbf16>
    %cst_56 = arith.constant dense<0.000000e+00> : vector<2x384xf32>
    %197 = tpu.matmul %196, %3, %cst_56 {dimension_numbers = #tpu.dot_dimension_numbers<[1], [0], [0], [1], [0, 0, 1, 1], [], []>} : vector<2x128xbf16>, vector<128x384xbf16>, vector<2x384xf32> -> vector<2x384xf32>
    %198 = vector.extract_strided_slice %195 {offsets = [0, 0], sizes = [2, 256], strides = [1, 1]} : vector<2x384xf32> to vector<2x256xf32>
    %199 = vector.extract_strided_slice %197 {offsets = [0, 0], sizes = [2, 256], strides = [1, 1]} : vector<2x384xf32> to vector<2x256xf32>
    %200 = arith.addf %198, %199 : vector<2x256xf32>
    %201 = arith.negf %200 : vector<2x256xf32>
    %202 = math.exp %201 : vector<2x256xf32>
    %cst_57 = arith.constant 1.000000e+00 : f32
    %203 = vector.broadcast %cst_57 : f32 to vector<2x256xf32>
    %204 = arith.addf %203, %202 : vector<2x256xf32>
    %205 = arith.divf %203, %204 : vector<2x256xf32>
    %206 = vector.extract_strided_slice %205 {offsets = [0, 0], sizes = [2, 128], strides = [1, 1]} : vector<2x256xf32> to vector<2x128xf32>
    %207 = vector.extract_strided_slice %205 {offsets = [0, 128], sizes = [2, 128], strides = [1, 1]} : vector<2x256xf32> to vector<2x128xf32>
    %208 = vector.extract_strided_slice %195 {offsets = [0, 256], sizes = [2, 128], strides = [1, 1]} : vector<2x384xf32> to vector<2x128xf32>
    %209 = vector.extract_strided_slice %197 {offsets = [0, 256], sizes = [2, 128], strides = [1, 1]} : vector<2x384xf32> to vector<2x128xf32>
    %210 = vector.broadcast %4 : vector<1x128xf32> to vector<2x128xf32>
    %211 = arith.addf %209, %210 : vector<2x128xf32>
    %212 = arith.mulf %206, %211 : vector<2x128xf32>
    %213 = arith.addf %208, %212 : vector<2x128xf32>
    %214 = math.tanh %213 : vector<2x128xf32>
    %215 = arith.subf %184, %214 : vector<2x128xf32>
    %216 = arith.mulf %207, %215 : vector<2x128xf32>
    %217 = arith.addf %214, %216 : vector<2x128xf32>
    %c8_i32_58 = arith.constant 8 : i32
    %218 = arith.muli %arg1, %c8_i32_58 : i32
    %219 = arith.addi %218, %c5_i32 : i32
    %c8_i32_59 = arith.constant 8 : i32
    %220 = arith.cmpi slt, %219, %c8_i32_59 : i32
    %221 = arith.select %220, %217, %184 : vector<2x128xf32>
    %222 = arith.truncf %221 : vector<2x128xf32> to vector<2x128xbf16>
    %cst_60 = arith.constant dense<0.000000e+00> : vector<2x384xf32>
    %223 = tpu.matmul %222, %6, %cst_60 {dimension_numbers = #tpu.dot_dimension_numbers<[1], [0], [0], [1], [0, 0, 1, 1], [], []>} : vector<2x128xbf16>, vector<128x384xbf16>, vector<2x384xf32> -> vector<2x384xf32>
    %224 = vector.broadcast %7 : vector<1x384xf32> to vector<2x384xf32>
    %225 = arith.addf %223, %224 : vector<2x384xf32>
    %226 = arith.index_cast %c5_i32 : i32 to index
    %c0_61 = arith.constant 0 : index
    %c0_62 = arith.constant 0 : index
    %227 = vector.load %arg7[%226, %c0_61, %c0_62] : memref<8x2x384xf32, #tpu.memory_space<vmem>>, vector<1x2x384xf32>
    %228 = vector.shape_cast %227 : vector<1x2x384xf32> to vector<2x384xf32>
    %229 = vector.shape_cast %225 : vector<2x384xf32> to vector<1x2x384xf32>
    tpu.vector_store %arg7[%226, %c0_61, %c0_62], %229 {strides = array<i32>} : memref<8x2x384xf32, #tpu.memory_space<vmem>>, vector<1x2x384xf32>,
    %c6_i32 = arith.constant 6 : i32
    %230 = arith.index_cast %c6_i32 : i32 to index
    %c0_63 = arith.constant 0 : index
    %c0_64 = arith.constant 0 : index
    %231 = vector.load %arg2[%230, %c0_63, %c0_64] : memref<8x2x384xf32, #tpu.memory_space<vmem>>, vector<1x2x384xf32>
    %232 = vector.shape_cast %231 : vector<1x2x384xf32> to vector<2x384xf32>
    %233 = arith.truncf %221 : vector<2x128xf32> to vector<2x128xbf16>
    %cst_65 = arith.constant dense<0.000000e+00> : vector<2x384xf32>
    %234 = tpu.matmul %233, %3, %cst_65 {dimension_numbers = #tpu.dot_dimension_numbers<[1], [0], [0], [1], [0, 0, 1, 1], [], []>} : vector<2x128xbf16>, vector<128x384xbf16>, vector<2x384xf32> -> vector<2x384xf32>
    %235 = vector.extract_strided_slice %232 {offsets = [0, 0], sizes = [2, 256], strides = [1, 1]} : vector<2x384xf32> to vector<2x256xf32>
    %236 = vector.extract_strided_slice %234 {offsets = [0, 0], sizes = [2, 256], strides = [1, 1]} : vector<2x384xf32> to vector<2x256xf32>
    %237 = arith.addf %235, %236 : vector<2x256xf32>
    %238 = arith.negf %237 : vector<2x256xf32>
    %239 = math.exp %238 : vector<2x256xf32>
    %cst_66 = arith.constant 1.000000e+00 : f32
    %240 = vector.broadcast %cst_66 : f32 to vector<2x256xf32>
    %241 = arith.addf %240, %239 : vector<2x256xf32>
    %242 = arith.divf %240, %241 : vector<2x256xf32>
    %243 = vector.extract_strided_slice %242 {offsets = [0, 0], sizes = [2, 128], strides = [1, 1]} : vector<2x256xf32> to vector<2x128xf32>
    %244 = vector.extract_strided_slice %242 {offsets = [0, 128], sizes = [2, 128], strides = [1, 1]} : vector<2x256xf32> to vector<2x128xf32>
    %245 = vector.extract_strided_slice %232 {offsets = [0, 256], sizes = [2, 128], strides = [1, 1]} : vector<2x384xf32> to vector<2x128xf32>
    %246 = vector.extract_strided_slice %234 {offsets = [0, 256], sizes = [2, 128], strides = [1, 1]} : vector<2x384xf32> to vector<2x128xf32>
    %247 = vector.broadcast %4 : vector<1x128xf32> to vector<2x128xf32>
    %248 = arith.addf %246, %247 : vector<2x128xf32>
    %249 = arith.mulf %243, %248 : vector<2x128xf32>
    %250 = arith.addf %245, %249 : vector<2x128xf32>
    %251 = math.tanh %250 : vector<2x128xf32>
    %252 = arith.subf %221, %251 : vector<2x128xf32>
    %253 = arith.mulf %244, %252 : vector<2x128xf32>
    %254 = arith.addf %251, %253 : vector<2x128xf32>
    %c8_i32_67 = arith.constant 8 : i32
    %255 = arith.muli %arg1, %c8_i32_67 : i32
    %256 = arith.addi %255, %c6_i32 : i32
    %c8_i32_68 = arith.constant 8 : i32
    %257 = arith.cmpi slt, %256, %c8_i32_68 : i32
    %258 = arith.select %257, %254, %221 : vector<2x128xf32>
    %259 = arith.truncf %258 : vector<2x128xf32> to vector<2x128xbf16>
    %cst_69 = arith.constant dense<0.000000e+00> : vector<2x384xf32>
    %260 = tpu.matmul %259, %6, %cst_69 {dimension_numbers = #tpu.dot_dimension_numbers<[1], [0], [0], [1], [0, 0, 1, 1], [], []>} : vector<2x128xbf16>, vector<128x384xbf16>, vector<2x384xf32> -> vector<2x384xf32>
    %261 = vector.broadcast %7 : vector<1x384xf32> to vector<2x384xf32>
    %262 = arith.addf %260, %261 : vector<2x384xf32>
    %263 = arith.index_cast %c6_i32 : i32 to index
    %c0_70 = arith.constant 0 : index
    %c0_71 = arith.constant 0 : index
    %264 = vector.load %arg7[%263, %c0_70, %c0_71] : memref<8x2x384xf32, #tpu.memory_space<vmem>>, vector<1x2x384xf32>
    %265 = vector.shape_cast %264 : vector<1x2x384xf32> to vector<2x384xf32>
    %266 = vector.shape_cast %262 : vector<2x384xf32> to vector<1x2x384xf32>
    tpu.vector_store %arg7[%263, %c0_70, %c0_71], %266 {strides = array<i32>} : memref<8x2x384xf32, #tpu.memory_space<vmem>>, vector<1x2x384xf32>,
    %c7_i32 = arith.constant 7 : i32
    %267 = arith.index_cast %c7_i32 : i32 to index
    %c0_72 = arith.constant 0 : index
    %c0_73 = arith.constant 0 : index
    %268 = vector.load %arg2[%267, %c0_72, %c0_73] : memref<8x2x384xf32, #tpu.memory_space<vmem>>, vector<1x2x384xf32>
    %269 = vector.shape_cast %268 : vector<1x2x384xf32> to vector<2x384xf32>
    %270 = arith.truncf %258 : vector<2x128xf32> to vector<2x128xbf16>
    %cst_74 = arith.constant dense<0.000000e+00> : vector<2x384xf32>
    %271 = tpu.matmul %270, %3, %cst_74 {dimension_numbers = #tpu.dot_dimension_numbers<[1], [0], [0], [1], [0, 0, 1, 1], [], []>} : vector<2x128xbf16>, vector<128x384xbf16>, vector<2x384xf32> -> vector<2x384xf32>
    %272 = vector.extract_strided_slice %269 {offsets = [0, 0], sizes = [2, 256], strides = [1, 1]} : vector<2x384xf32> to vector<2x256xf32>
    %273 = vector.extract_strided_slice %271 {offsets = [0, 0], sizes = [2, 256], strides = [1, 1]} : vector<2x384xf32> to vector<2x256xf32>
    %274 = arith.addf %272, %273 : vector<2x256xf32>
    %275 = arith.negf %274 : vector<2x256xf32>
    %276 = math.exp %275 : vector<2x256xf32>
    %cst_75 = arith.constant 1.000000e+00 : f32
    %277 = vector.broadcast %cst_75 : f32 to vector<2x256xf32>
    %278 = arith.addf %277, %276 : vector<2x256xf32>
    %279 = arith.divf %277, %278 : vector<2x256xf32>
    %280 = vector.extract_strided_slice %279 {offsets = [0, 0], sizes = [2, 128], strides = [1, 1]} : vector<2x256xf32> to vector<2x128xf32>
    %281 = vector.extract_strided_slice %279 {offsets = [0, 128], sizes = [2, 128], strides = [1, 1]} : vector<2x256xf32> to vector<2x128xf32>
    %282 = vector.extract_strided_slice %269 {offsets = [0, 256], sizes = [2, 128], strides = [1, 1]} : vector<2x384xf32> to vector<2x128xf32>
    %283 = vector.extract_strided_slice %271 {offsets = [0, 256], sizes = [2, 128], strides = [1, 1]} : vector<2x384xf32> to vector<2x128xf32>
    %284 = vector.broadcast %4 : vector<1x128xf32> to vector<2x128xf32>
    %285 = arith.addf %283, %284 : vector<2x128xf32>
    %286 = arith.mulf %280, %285 : vector<2x128xf32>
    %287 = arith.addf %282, %286 : vector<2x128xf32>
    %288 = math.tanh %287 : vector<2x128xf32>
    %289 = arith.subf %258, %288 : vector<2x128xf32>
    %290 = arith.mulf %281, %289 : vector<2x128xf32>
    %291 = arith.addf %288, %290 : vector<2x128xf32>
    %c8_i32_76 = arith.constant 8 : i32
    %292 = arith.muli %arg1, %c8_i32_76 : i32
    %293 = arith.addi %292, %c7_i32 : i32
    %c8_i32_77 = arith.constant 8 : i32
    %294 = arith.cmpi slt, %293, %c8_i32_77 : i32
    %295 = arith.select %294, %291, %258 : vector<2x128xf32>
    %296 = arith.truncf %295 : vector<2x128xf32> to vector<2x128xbf16>
    %cst_78 = arith.constant dense<0.000000e+00> : vector<2x384xf32>
    %297 = tpu.matmul %296, %6, %cst_78 {dimension_numbers = #tpu.dot_dimension_numbers<[1], [0], [0], [1], [0, 0, 1, 1], [], []>} : vector<2x128xbf16>, vector<128x384xbf16>, vector<2x384xf32> -> vector<2x384xf32>
    %298 = vector.broadcast %7 : vector<1x384xf32> to vector<2x384xf32>
    %299 = arith.addf %297, %298 : vector<2x384xf32>
    %300 = arith.index_cast %c7_i32 : i32 to index
    %c0_79 = arith.constant 0 : index
    %c0_80 = arith.constant 0 : index
    %301 = vector.load %arg7[%300, %c0_79, %c0_80] : memref<8x2x384xf32, #tpu.memory_space<vmem>>, vector<1x2x384xf32>
    %302 = vector.shape_cast %301 : vector<1x2x384xf32> to vector<2x384xf32>
    %303 = vector.shape_cast %299 : vector<2x384xf32> to vector<1x2x384xf32>
    tpu.vector_store %arg7[%300, %c0_79, %c0_80], %303 {strides = array<i32>} : memref<8x2x384xf32, #tpu.memory_space<vmem>>, vector<1x2x384xf32>,
    %c8_i32_81 = arith.constant 8 : i32
    %c0_82 = arith.constant 0 : index
    %c0_83 = arith.constant 0 : index
    %304 = vector.load %arg8[%c0_82, %c0_83] : memref<2x128xf32, #tpu.memory_space<vmem>>, vector<2x128xf32>
    tpu.vector_store %arg8[%c0_82, %c0_83], %295 {strides = array<i32>} : memref<2x128xf32, #tpu.memory_space<vmem>>, vector<2x128xf32>,
    return
  }
  func.func @transform_0(%arg0: i32, %arg1: i32) -> (i32, i32, i32) {
    %c0_i32 = arith.constant 0 : i32
    %c0_i32_0 = arith.constant 0 : i32
    return %arg1, %arg0, %c0_i32 : i32, i32, i32
  }
  func.func @transform_1(%arg0: i32, %arg1: i32) -> (i32, i32) {
    %c0_i32 = arith.constant 0 : i32
    %c0_i32_0 = arith.constant 0 : i32
    %c0_i32_1 = arith.constant 0 : i32
    return %c0_i32, %c0_i32_0 : i32, i32
  }
  func.func @transform_2(%arg0: i32, %arg1: i32) -> (i32, i32) {
    %c0_i32 = arith.constant 0 : i32
    %c0_i32_0 = arith.constant 0 : i32
    %c0_i32_1 = arith.constant 0 : i32
    return %c0_i32, %c0_i32_0 : i32, i32
  }
  func.func @transform_3(%arg0: i32, %arg1: i32) -> (i32, i32) {
    %c0_i32 = arith.constant 0 : i32
    %c0_i32_0 = arith.constant 0 : i32
    %c0_i32_1 = arith.constant 0 : i32
    return %c0_i32, %c0_i32_0 : i32, i32
  }
  func.func @transform_4(%arg0: i32, %arg1: i32) -> (i32, i32) {
    %c0_i32 = arith.constant 0 : i32
    %c0_i32_0 = arith.constant 0 : i32
    %c0_i32_1 = arith.constant 0 : i32
    return %c0_i32, %c0_i32_0 : i32, i32
  }
  func.func @transform_5(%arg0: i32, %arg1: i32) -> (i32, i32, i32) {
    %c0_i32 = arith.constant 0 : i32
    %c0_i32_0 = arith.constant 0 : i32
    return %arg1, %arg0, %c0_i32 : i32, i32, i32
  }
}

module attributes {stable_mosaic.version = 11 : i64} {
  func.func @_gru_last_kernel(%arg0: i32, %arg1: i32, %arg2: memref<8x2x384xf32, #tpu.memory_space<vmem>>, %arg3: memref<128x384xbf16, #tpu.memory_space<vmem>>, %arg4: memref<1x128xf32, #tpu.memory_space<vmem>>, %arg5: memref<128x3xf32, #tpu.memory_space<vmem>>, %arg6: memref<1x3xf32, #tpu.memory_space<vmem>>, %arg7: memref<2x3xf32, #tpu.memory_space<vmem>>, %arg8: memref<2x128xf32, #tpu.memory_space<vmem>>) attributes {dimension_semantics = [#tpu.dimension_semantics<parallel>, #tpu.dimension_semantics<arbitrary>], iteration_bounds = array<i64: 1, 1>, scalar_prefetch = 0 : i64, scratch_operands = 1 : i64, tpu.core_type = #tpu.core_type<tc>, window_params = [{transform_indices = @transform_0, window_bounds = array<i64: 8, 2, 384>}, {pipeline_mode = #tpu.pipeline_mode<synchronous>, transform_indices = @transform_1, window_bounds = array<i64: 128, 384>}, {pipeline_mode = #tpu.pipeline_mode<synchronous>, transform_indices = @transform_2, window_bounds = array<i64: 1, 128>}, {pipeline_mode = #tpu.pipeline_mode<synchronous>, transform_indices = @transform_3, window_bounds = array<i64: 128, 3>}, {pipeline_mode = #tpu.pipeline_mode<synchronous>, transform_indices = @transform_4, window_bounds = array<i64: 1, 3>}, {transform_indices = @transform_5, window_bounds = array<i64: 2, 3>}]} {
    %c0_i32 = arith.constant 0 : i32
    %0 = arith.cmpi eq, %arg1, %c0_i32 : i32
    %1 = arith.extui %0 : i1 to i32
    %c0_i32_0 = arith.constant 0 : i32
    %2 = arith.cmpi ne, %1, %c0_i32_0 : i32
    scf.if %2 {
      %cst_58 = arith.constant 0.000000e+00 : f32
      %242 = vector.broadcast %cst_58 : f32 to vector<2x128xf32>
      %c0_59 = arith.constant 0 : index
      %c0_60 = arith.constant 0 : index
      %243 = vector.load %arg8[%c0_59, %c0_60] : memref<2x128xf32, #tpu.memory_space<vmem>>, vector<2x128xf32>
      tpu.vector_store %arg8[%c0_59, %c0_60], %242 {strides = array<i32>} : memref<2x128xf32, #tpu.memory_space<vmem>>, vector<2x128xf32>,
    } else {
    }
    %c0 = arith.constant 0 : index
    %c0_1 = arith.constant 0 : index
    %3 = vector.load %arg3[%c0, %c0_1] : memref<128x384xbf16, #tpu.memory_space<vmem>>, vector<128x384xbf16>
    %c0_2 = arith.constant 0 : index
    %c0_3 = arith.constant 0 : index
    %4 = vector.load %arg4[%c0_2, %c0_3] : memref<1x128xf32, #tpu.memory_space<vmem>>, vector<1x128xf32>
    %c0_4 = arith.constant 0 : index
    %c0_5 = arith.constant 0 : index
    %5 = vector.load %arg8[%c0_4, %c0_5] : memref<2x128xf32, #tpu.memory_space<vmem>>, vector<2x128xf32>
    %c0_i32_6 = arith.constant 0 : i32
    %6 = arith.index_cast %c0_i32_6 : i32 to index
    %c0_7 = arith.constant 0 : index
    %c0_8 = arith.constant 0 : index
    %7 = vector.load %arg2[%6, %c0_7, %c0_8] : memref<8x2x384xf32, #tpu.memory_space<vmem>>, vector<1x2x384xf32>
    %8 = vector.shape_cast %7 : vector<1x2x384xf32> to vector<2x384xf32>
    %9 = arith.truncf %5 : vector<2x128xf32> to vector<2x128xbf16>
    %cst = arith.constant dense<0.000000e+00> : vector<2x384xf32>
    %10 = tpu.matmul %9, %3, %cst {dimension_numbers = #tpu.dot_dimension_numbers<[1], [0], [0], [1], [0, 0, 1, 1], [], []>} : vector<2x128xbf16>, vector<128x384xbf16>, vector<2x384xf32> -> vector<2x384xf32>
    %11 = vector.extract_strided_slice %8 {offsets = [0, 0], sizes = [2, 256], strides = [1, 1]} : vector<2x384xf32> to vector<2x256xf32>
    %12 = vector.extract_strided_slice %10 {offsets = [0, 0], sizes = [2, 256], strides = [1, 1]} : vector<2x384xf32> to vector<2x256xf32>
    %13 = arith.addf %11, %12 : vector<2x256xf32>
    %14 = arith.negf %13 : vector<2x256xf32>
    %15 = math.exp %14 : vector<2x256xf32>
    %cst_9 = arith.constant 1.000000e+00 : f32
    %16 = vector.broadcast %cst_9 : f32 to vector<2x256xf32>
    %17 = arith.addf %16, %15 : vector<2x256xf32>
    %18 = arith.divf %16, %17 : vector<2x256xf32>
    %19 = vector.extract_strided_slice %18 {offsets = [0, 0], sizes = [2, 128], strides = [1, 1]} : vector<2x256xf32> to vector<2x128xf32>
    %20 = vector.extract_strided_slice %18 {offsets = [0, 128], sizes = [2, 128], strides = [1, 1]} : vector<2x256xf32> to vector<2x128xf32>
    %21 = vector.extract_strided_slice %8 {offsets = [0, 256], sizes = [2, 128], strides = [1, 1]} : vector<2x384xf32> to vector<2x128xf32>
    %22 = vector.extract_strided_slice %10 {offsets = [0, 256], sizes = [2, 128], strides = [1, 1]} : vector<2x384xf32> to vector<2x128xf32>
    %23 = vector.broadcast %4 : vector<1x128xf32> to vector<2x128xf32>
    %24 = arith.addf %22, %23 : vector<2x128xf32>
    %25 = arith.mulf %19, %24 : vector<2x128xf32>
    %26 = arith.addf %21, %25 : vector<2x128xf32>
    %27 = math.tanh %26 : vector<2x128xf32>
    %28 = arith.subf %5, %27 : vector<2x128xf32>
    %29 = arith.mulf %20, %28 : vector<2x128xf32>
    %30 = arith.addf %27, %29 : vector<2x128xf32>
    %c8_i32 = arith.constant 8 : i32
    %31 = arith.muli %arg1, %c8_i32 : i32
    %32 = arith.addi %31, %c0_i32_6 : i32
    %c8_i32_10 = arith.constant 8 : i32
    %33 = arith.cmpi slt, %32, %c8_i32_10 : i32
    %34 = arith.select %33, %30, %5 : vector<2x128xf32>
    %c1_i32 = arith.constant 1 : i32
    %35 = arith.index_cast %c1_i32 : i32 to index
    %c0_11 = arith.constant 0 : index
    %c0_12 = arith.constant 0 : index
    %36 = vector.load %arg2[%35, %c0_11, %c0_12] : memref<8x2x384xf32, #tpu.memory_space<vmem>>, vector<1x2x384xf32>
    %37 = vector.shape_cast %36 : vector<1x2x384xf32> to vector<2x384xf32>
    %38 = arith.truncf %34 : vector<2x128xf32> to vector<2x128xbf16>
    %cst_13 = arith.constant dense<0.000000e+00> : vector<2x384xf32>
    %39 = tpu.matmul %38, %3, %cst_13 {dimension_numbers = #tpu.dot_dimension_numbers<[1], [0], [0], [1], [0, 0, 1, 1], [], []>} : vector<2x128xbf16>, vector<128x384xbf16>, vector<2x384xf32> -> vector<2x384xf32>
    %40 = vector.extract_strided_slice %37 {offsets = [0, 0], sizes = [2, 256], strides = [1, 1]} : vector<2x384xf32> to vector<2x256xf32>
    %41 = vector.extract_strided_slice %39 {offsets = [0, 0], sizes = [2, 256], strides = [1, 1]} : vector<2x384xf32> to vector<2x256xf32>
    %42 = arith.addf %40, %41 : vector<2x256xf32>
    %43 = arith.negf %42 : vector<2x256xf32>
    %44 = math.exp %43 : vector<2x256xf32>
    %cst_14 = arith.constant 1.000000e+00 : f32
    %45 = vector.broadcast %cst_14 : f32 to vector<2x256xf32>
    %46 = arith.addf %45, %44 : vector<2x256xf32>
    %47 = arith.divf %45, %46 : vector<2x256xf32>
    %48 = vector.extract_strided_slice %47 {offsets = [0, 0], sizes = [2, 128], strides = [1, 1]} : vector<2x256xf32> to vector<2x128xf32>
    %49 = vector.extract_strided_slice %47 {offsets = [0, 128], sizes = [2, 128], strides = [1, 1]} : vector<2x256xf32> to vector<2x128xf32>
    %50 = vector.extract_strided_slice %37 {offsets = [0, 256], sizes = [2, 128], strides = [1, 1]} : vector<2x384xf32> to vector<2x128xf32>
    %51 = vector.extract_strided_slice %39 {offsets = [0, 256], sizes = [2, 128], strides = [1, 1]} : vector<2x384xf32> to vector<2x128xf32>
    %52 = vector.broadcast %4 : vector<1x128xf32> to vector<2x128xf32>
    %53 = arith.addf %51, %52 : vector<2x128xf32>
    %54 = arith.mulf %48, %53 : vector<2x128xf32>
    %55 = arith.addf %50, %54 : vector<2x128xf32>
    %56 = math.tanh %55 : vector<2x128xf32>
    %57 = arith.subf %34, %56 : vector<2x128xf32>
    %58 = arith.mulf %49, %57 : vector<2x128xf32>
    %59 = arith.addf %56, %58 : vector<2x128xf32>
    %c8_i32_15 = arith.constant 8 : i32
    %60 = arith.muli %arg1, %c8_i32_15 : i32
    %61 = arith.addi %60, %c1_i32 : i32
    %c8_i32_16 = arith.constant 8 : i32
    %62 = arith.cmpi slt, %61, %c8_i32_16 : i32
    %63 = arith.select %62, %59, %34 : vector<2x128xf32>
    %c2_i32 = arith.constant 2 : i32
    %64 = arith.index_cast %c2_i32 : i32 to index
    %c0_17 = arith.constant 0 : index
    %c0_18 = arith.constant 0 : index
    %65 = vector.load %arg2[%64, %c0_17, %c0_18] : memref<8x2x384xf32, #tpu.memory_space<vmem>>, vector<1x2x384xf32>
    %66 = vector.shape_cast %65 : vector<1x2x384xf32> to vector<2x384xf32>
    %67 = arith.truncf %63 : vector<2x128xf32> to vector<2x128xbf16>
    %cst_19 = arith.constant dense<0.000000e+00> : vector<2x384xf32>
    %68 = tpu.matmul %67, %3, %cst_19 {dimension_numbers = #tpu.dot_dimension_numbers<[1], [0], [0], [1], [0, 0, 1, 1], [], []>} : vector<2x128xbf16>, vector<128x384xbf16>, vector<2x384xf32> -> vector<2x384xf32>
    %69 = vector.extract_strided_slice %66 {offsets = [0, 0], sizes = [2, 256], strides = [1, 1]} : vector<2x384xf32> to vector<2x256xf32>
    %70 = vector.extract_strided_slice %68 {offsets = [0, 0], sizes = [2, 256], strides = [1, 1]} : vector<2x384xf32> to vector<2x256xf32>
    %71 = arith.addf %69, %70 : vector<2x256xf32>
    %72 = arith.negf %71 : vector<2x256xf32>
    %73 = math.exp %72 : vector<2x256xf32>
    %cst_20 = arith.constant 1.000000e+00 : f32
    %74 = vector.broadcast %cst_20 : f32 to vector<2x256xf32>
    %75 = arith.addf %74, %73 : vector<2x256xf32>
    %76 = arith.divf %74, %75 : vector<2x256xf32>
    %77 = vector.extract_strided_slice %76 {offsets = [0, 0], sizes = [2, 128], strides = [1, 1]} : vector<2x256xf32> to vector<2x128xf32>
    %78 = vector.extract_strided_slice %76 {offsets = [0, 128], sizes = [2, 128], strides = [1, 1]} : vector<2x256xf32> to vector<2x128xf32>
    %79 = vector.extract_strided_slice %66 {offsets = [0, 256], sizes = [2, 128], strides = [1, 1]} : vector<2x384xf32> to vector<2x128xf32>
    %80 = vector.extract_strided_slice %68 {offsets = [0, 256], sizes = [2, 128], strides = [1, 1]} : vector<2x384xf32> to vector<2x128xf32>
    %81 = vector.broadcast %4 : vector<1x128xf32> to vector<2x128xf32>
    %82 = arith.addf %80, %81 : vector<2x128xf32>
    %83 = arith.mulf %77, %82 : vector<2x128xf32>
    %84 = arith.addf %79, %83 : vector<2x128xf32>
    %85 = math.tanh %84 : vector<2x128xf32>
    %86 = arith.subf %63, %85 : vector<2x128xf32>
    %87 = arith.mulf %78, %86 : vector<2x128xf32>
    %88 = arith.addf %85, %87 : vector<2x128xf32>
    %c8_i32_21 = arith.constant 8 : i32
    %89 = arith.muli %arg1, %c8_i32_21 : i32
    %90 = arith.addi %89, %c2_i32 : i32
    %c8_i32_22 = arith.constant 8 : i32
    %91 = arith.cmpi slt, %90, %c8_i32_22 : i32
    %92 = arith.select %91, %88, %63 : vector<2x128xf32>
    %c3_i32 = arith.constant 3 : i32
    %93 = arith.index_cast %c3_i32 : i32 to index
    %c0_23 = arith.constant 0 : index
    %c0_24 = arith.constant 0 : index
    %94 = vector.load %arg2[%93, %c0_23, %c0_24] : memref<8x2x384xf32, #tpu.memory_space<vmem>>, vector<1x2x384xf32>
    %95 = vector.shape_cast %94 : vector<1x2x384xf32> to vector<2x384xf32>
    %96 = arith.truncf %92 : vector<2x128xf32> to vector<2x128xbf16>
    %cst_25 = arith.constant dense<0.000000e+00> : vector<2x384xf32>
    %97 = tpu.matmul %96, %3, %cst_25 {dimension_numbers = #tpu.dot_dimension_numbers<[1], [0], [0], [1], [0, 0, 1, 1], [], []>} : vector<2x128xbf16>, vector<128x384xbf16>, vector<2x384xf32> -> vector<2x384xf32>
    %98 = vector.extract_strided_slice %95 {offsets = [0, 0], sizes = [2, 256], strides = [1, 1]} : vector<2x384xf32> to vector<2x256xf32>
    %99 = vector.extract_strided_slice %97 {offsets = [0, 0], sizes = [2, 256], strides = [1, 1]} : vector<2x384xf32> to vector<2x256xf32>
    %100 = arith.addf %98, %99 : vector<2x256xf32>
    %101 = arith.negf %100 : vector<2x256xf32>
    %102 = math.exp %101 : vector<2x256xf32>
    %cst_26 = arith.constant 1.000000e+00 : f32
    %103 = vector.broadcast %cst_26 : f32 to vector<2x256xf32>
    %104 = arith.addf %103, %102 : vector<2x256xf32>
    %105 = arith.divf %103, %104 : vector<2x256xf32>
    %106 = vector.extract_strided_slice %105 {offsets = [0, 0], sizes = [2, 128], strides = [1, 1]} : vector<2x256xf32> to vector<2x128xf32>
    %107 = vector.extract_strided_slice %105 {offsets = [0, 128], sizes = [2, 128], strides = [1, 1]} : vector<2x256xf32> to vector<2x128xf32>
    %108 = vector.extract_strided_slice %95 {offsets = [0, 256], sizes = [2, 128], strides = [1, 1]} : vector<2x384xf32> to vector<2x128xf32>
    %109 = vector.extract_strided_slice %97 {offsets = [0, 256], sizes = [2, 128], strides = [1, 1]} : vector<2x384xf32> to vector<2x128xf32>
    %110 = vector.broadcast %4 : vector<1x128xf32> to vector<2x128xf32>
    %111 = arith.addf %109, %110 : vector<2x128xf32>
    %112 = arith.mulf %106, %111 : vector<2x128xf32>
    %113 = arith.addf %108, %112 : vector<2x128xf32>
    %114 = math.tanh %113 : vector<2x128xf32>
    %115 = arith.subf %92, %114 : vector<2x128xf32>
    %116 = arith.mulf %107, %115 : vector<2x128xf32>
    %117 = arith.addf %114, %116 : vector<2x128xf32>
    %c8_i32_27 = arith.constant 8 : i32
    %118 = arith.muli %arg1, %c8_i32_27 : i32
    %119 = arith.addi %118, %c3_i32 : i32
    %c8_i32_28 = arith.constant 8 : i32
    %120 = arith.cmpi slt, %119, %c8_i32_28 : i32
    %121 = arith.select %120, %117, %92 : vector<2x128xf32>
    %c4_i32 = arith.constant 4 : i32
    %122 = arith.index_cast %c4_i32 : i32 to index
    %c0_29 = arith.constant 0 : index
    %c0_30 = arith.constant 0 : index
    %123 = vector.load %arg2[%122, %c0_29, %c0_30] : memref<8x2x384xf32, #tpu.memory_space<vmem>>, vector<1x2x384xf32>
    %124 = vector.shape_cast %123 : vector<1x2x384xf32> to vector<2x384xf32>
    %125 = arith.truncf %121 : vector<2x128xf32> to vector<2x128xbf16>
    %cst_31 = arith.constant dense<0.000000e+00> : vector<2x384xf32>
    %126 = tpu.matmul %125, %3, %cst_31 {dimension_numbers = #tpu.dot_dimension_numbers<[1], [0], [0], [1], [0, 0, 1, 1], [], []>} : vector<2x128xbf16>, vector<128x384xbf16>, vector<2x384xf32> -> vector<2x384xf32>
    %127 = vector.extract_strided_slice %124 {offsets = [0, 0], sizes = [2, 256], strides = [1, 1]} : vector<2x384xf32> to vector<2x256xf32>
    %128 = vector.extract_strided_slice %126 {offsets = [0, 0], sizes = [2, 256], strides = [1, 1]} : vector<2x384xf32> to vector<2x256xf32>
    %129 = arith.addf %127, %128 : vector<2x256xf32>
    %130 = arith.negf %129 : vector<2x256xf32>
    %131 = math.exp %130 : vector<2x256xf32>
    %cst_32 = arith.constant 1.000000e+00 : f32
    %132 = vector.broadcast %cst_32 : f32 to vector<2x256xf32>
    %133 = arith.addf %132, %131 : vector<2x256xf32>
    %134 = arith.divf %132, %133 : vector<2x256xf32>
    %135 = vector.extract_strided_slice %134 {offsets = [0, 0], sizes = [2, 128], strides = [1, 1]} : vector<2x256xf32> to vector<2x128xf32>
    %136 = vector.extract_strided_slice %134 {offsets = [0, 128], sizes = [2, 128], strides = [1, 1]} : vector<2x256xf32> to vector<2x128xf32>
    %137 = vector.extract_strided_slice %124 {offsets = [0, 256], sizes = [2, 128], strides = [1, 1]} : vector<2x384xf32> to vector<2x128xf32>
    %138 = vector.extract_strided_slice %126 {offsets = [0, 256], sizes = [2, 128], strides = [1, 1]} : vector<2x384xf32> to vector<2x128xf32>
    %139 = vector.broadcast %4 : vector<1x128xf32> to vector<2x128xf32>
    %140 = arith.addf %138, %139 : vector<2x128xf32>
    %141 = arith.mulf %135, %140 : vector<2x128xf32>
    %142 = arith.addf %137, %141 : vector<2x128xf32>
    %143 = math.tanh %142 : vector<2x128xf32>
    %144 = arith.subf %121, %143 : vector<2x128xf32>
    %145 = arith.mulf %136, %144 : vector<2x128xf32>
    %146 = arith.addf %143, %145 : vector<2x128xf32>
    %c8_i32_33 = arith.constant 8 : i32
    %147 = arith.muli %arg1, %c8_i32_33 : i32
    %148 = arith.addi %147, %c4_i32 : i32
    %c8_i32_34 = arith.constant 8 : i32
    %149 = arith.cmpi slt, %148, %c8_i32_34 : i32
    %150 = arith.select %149, %146, %121 : vector<2x128xf32>
    %c5_i32 = arith.constant 5 : i32
    %151 = arith.index_cast %c5_i32 : i32 to index
    %c0_35 = arith.constant 0 : index
    %c0_36 = arith.constant 0 : index
    %152 = vector.load %arg2[%151, %c0_35, %c0_36] : memref<8x2x384xf32, #tpu.memory_space<vmem>>, vector<1x2x384xf32>
    %153 = vector.shape_cast %152 : vector<1x2x384xf32> to vector<2x384xf32>
    %154 = arith.truncf %150 : vector<2x128xf32> to vector<2x128xbf16>
    %cst_37 = arith.constant dense<0.000000e+00> : vector<2x384xf32>
    %155 = tpu.matmul %154, %3, %cst_37 {dimension_numbers = #tpu.dot_dimension_numbers<[1], [0], [0], [1], [0, 0, 1, 1], [], []>} : vector<2x128xbf16>, vector<128x384xbf16>, vector<2x384xf32> -> vector<2x384xf32>
    %156 = vector.extract_strided_slice %153 {offsets = [0, 0], sizes = [2, 256], strides = [1, 1]} : vector<2x384xf32> to vector<2x256xf32>
    %157 = vector.extract_strided_slice %155 {offsets = [0, 0], sizes = [2, 256], strides = [1, 1]} : vector<2x384xf32> to vector<2x256xf32>
    %158 = arith.addf %156, %157 : vector<2x256xf32>
    %159 = arith.negf %158 : vector<2x256xf32>
    %160 = math.exp %159 : vector<2x256xf32>
    %cst_38 = arith.constant 1.000000e+00 : f32
    %161 = vector.broadcast %cst_38 : f32 to vector<2x256xf32>
    %162 = arith.addf %161, %160 : vector<2x256xf32>
    %163 = arith.divf %161, %162 : vector<2x256xf32>
    %164 = vector.extract_strided_slice %163 {offsets = [0, 0], sizes = [2, 128], strides = [1, 1]} : vector<2x256xf32> to vector<2x128xf32>
    %165 = vector.extract_strided_slice %163 {offsets = [0, 128], sizes = [2, 128], strides = [1, 1]} : vector<2x256xf32> to vector<2x128xf32>
    %166 = vector.extract_strided_slice %153 {offsets = [0, 256], sizes = [2, 128], strides = [1, 1]} : vector<2x384xf32> to vector<2x128xf32>
    %167 = vector.extract_strided_slice %155 {offsets = [0, 256], sizes = [2, 128], strides = [1, 1]} : vector<2x384xf32> to vector<2x128xf32>
    %168 = vector.broadcast %4 : vector<1x128xf32> to vector<2x128xf32>
    %169 = arith.addf %167, %168 : vector<2x128xf32>
    %170 = arith.mulf %164, %169 : vector<2x128xf32>
    %171 = arith.addf %166, %170 : vector<2x128xf32>
    %172 = math.tanh %171 : vector<2x128xf32>
    %173 = arith.subf %150, %172 : vector<2x128xf32>
    %174 = arith.mulf %165, %173 : vector<2x128xf32>
    %175 = arith.addf %172, %174 : vector<2x128xf32>
    %c8_i32_39 = arith.constant 8 : i32
    %176 = arith.muli %arg1, %c8_i32_39 : i32
    %177 = arith.addi %176, %c5_i32 : i32
    %c8_i32_40 = arith.constant 8 : i32
    %178 = arith.cmpi slt, %177, %c8_i32_40 : i32
    %179 = arith.select %178, %175, %150 : vector<2x128xf32>
    %c6_i32 = arith.constant 6 : i32
    %180 = arith.index_cast %c6_i32 : i32 to index
    %c0_41 = arith.constant 0 : index
    %c0_42 = arith.constant 0 : index
    %181 = vector.load %arg2[%180, %c0_41, %c0_42] : memref<8x2x384xf32, #tpu.memory_space<vmem>>, vector<1x2x384xf32>
    %182 = vector.shape_cast %181 : vector<1x2x384xf32> to vector<2x384xf32>
    %183 = arith.truncf %179 : vector<2x128xf32> to vector<2x128xbf16>
    %cst_43 = arith.constant dense<0.000000e+00> : vector<2x384xf32>
    %184 = tpu.matmul %183, %3, %cst_43 {dimension_numbers = #tpu.dot_dimension_numbers<[1], [0], [0], [1], [0, 0, 1, 1], [], []>} : vector<2x128xbf16>, vector<128x384xbf16>, vector<2x384xf32> -> vector<2x384xf32>
    %185 = vector.extract_strided_slice %182 {offsets = [0, 0], sizes = [2, 256], strides = [1, 1]} : vector<2x384xf32> to vector<2x256xf32>
    %186 = vector.extract_strided_slice %184 {offsets = [0, 0], sizes = [2, 256], strides = [1, 1]} : vector<2x384xf32> to vector<2x256xf32>
    %187 = arith.addf %185, %186 : vector<2x256xf32>
    %188 = arith.negf %187 : vector<2x256xf32>
    %189 = math.exp %188 : vector<2x256xf32>
    %cst_44 = arith.constant 1.000000e+00 : f32
    %190 = vector.broadcast %cst_44 : f32 to vector<2x256xf32>
    %191 = arith.addf %190, %189 : vector<2x256xf32>
    %192 = arith.divf %190, %191 : vector<2x256xf32>
    %193 = vector.extract_strided_slice %192 {offsets = [0, 0], sizes = [2, 128], strides = [1, 1]} : vector<2x256xf32> to vector<2x128xf32>
    %194 = vector.extract_strided_slice %192 {offsets = [0, 128], sizes = [2, 128], strides = [1, 1]} : vector<2x256xf32> to vector<2x128xf32>
    %195 = vector.extract_strided_slice %182 {offsets = [0, 256], sizes = [2, 128], strides = [1, 1]} : vector<2x384xf32> to vector<2x128xf32>
    %196 = vector.extract_strided_slice %184 {offsets = [0, 256], sizes = [2, 128], strides = [1, 1]} : vector<2x384xf32> to vector<2x128xf32>
    %197 = vector.broadcast %4 : vector<1x128xf32> to vector<2x128xf32>
    %198 = arith.addf %196, %197 : vector<2x128xf32>
    %199 = arith.mulf %193, %198 : vector<2x128xf32>
    %200 = arith.addf %195, %199 : vector<2x128xf32>
    %201 = math.tanh %200 : vector<2x128xf32>
    %202 = arith.subf %179, %201 : vector<2x128xf32>
    %203 = arith.mulf %194, %202 : vector<2x128xf32>
    %204 = arith.addf %201, %203 : vector<2x128xf32>
    %c8_i32_45 = arith.constant 8 : i32
    %205 = arith.muli %arg1, %c8_i32_45 : i32
    %206 = arith.addi %205, %c6_i32 : i32
    %c8_i32_46 = arith.constant 8 : i32
    %207 = arith.cmpi slt, %206, %c8_i32_46 : i32
    %208 = arith.select %207, %204, %179 : vector<2x128xf32>
    %c7_i32 = arith.constant 7 : i32
    %209 = arith.index_cast %c7_i32 : i32 to index
    %c0_47 = arith.constant 0 : index
    %c0_48 = arith.constant 0 : index
    %210 = vector.load %arg2[%209, %c0_47, %c0_48] : memref<8x2x384xf32, #tpu.memory_space<vmem>>, vector<1x2x384xf32>
    %211 = vector.shape_cast %210 : vector<1x2x384xf32> to vector<2x384xf32>
    %212 = arith.truncf %208 : vector<2x128xf32> to vector<2x128xbf16>
    %cst_49 = arith.constant dense<0.000000e+00> : vector<2x384xf32>
    %213 = tpu.matmul %212, %3, %cst_49 {dimension_numbers = #tpu.dot_dimension_numbers<[1], [0], [0], [1], [0, 0, 1, 1], [], []>} : vector<2x128xbf16>, vector<128x384xbf16>, vector<2x384xf32> -> vector<2x384xf32>
    %214 = vector.extract_strided_slice %211 {offsets = [0, 0], sizes = [2, 256], strides = [1, 1]} : vector<2x384xf32> to vector<2x256xf32>
    %215 = vector.extract_strided_slice %213 {offsets = [0, 0], sizes = [2, 256], strides = [1, 1]} : vector<2x384xf32> to vector<2x256xf32>
    %216 = arith.addf %214, %215 : vector<2x256xf32>
    %217 = arith.negf %216 : vector<2x256xf32>
    %218 = math.exp %217 : vector<2x256xf32>
    %cst_50 = arith.constant 1.000000e+00 : f32
    %219 = vector.broadcast %cst_50 : f32 to vector<2x256xf32>
    %220 = arith.addf %219, %218 : vector<2x256xf32>
    %221 = arith.divf %219, %220 : vector<2x256xf32>
    %222 = vector.extract_strided_slice %221 {offsets = [0, 0], sizes = [2, 128], strides = [1, 1]} : vector<2x256xf32> to vector<2x128xf32>
    %223 = vector.extract_strided_slice %221 {offsets = [0, 128], sizes = [2, 128], strides = [1, 1]} : vector<2x256xf32> to vector<2x128xf32>
    %224 = vector.extract_strided_slice %211 {offsets = [0, 256], sizes = [2, 128], strides = [1, 1]} : vector<2x384xf32> to vector<2x128xf32>
    %225 = vector.extract_strided_slice %213 {offsets = [0, 256], sizes = [2, 128], strides = [1, 1]} : vector<2x384xf32> to vector<2x128xf32>
    %226 = vector.broadcast %4 : vector<1x128xf32> to vector<2x128xf32>
    %227 = arith.addf %225, %226 : vector<2x128xf32>
    %228 = arith.mulf %222, %227 : vector<2x128xf32>
    %229 = arith.addf %224, %228 : vector<2x128xf32>
    %230 = math.tanh %229 : vector<2x128xf32>
    %231 = arith.subf %208, %230 : vector<2x128xf32>
    %232 = arith.mulf %223, %231 : vector<2x128xf32>
    %233 = arith.addf %230, %232 : vector<2x128xf32>
    %c8_i32_51 = arith.constant 8 : i32
    %234 = arith.muli %arg1, %c8_i32_51 : i32
    %235 = arith.addi %234, %c7_i32 : i32
    %c8_i32_52 = arith.constant 8 : i32
    %236 = arith.cmpi slt, %235, %c8_i32_52 : i32
    %237 = arith.select %236, %233, %208 : vector<2x128xf32>
    %c8_i32_53 = arith.constant 8 : i32
    %c0_54 = arith.constant 0 : index
    %c0_55 = arith.constant 0 : index
    %238 = vector.load %arg8[%c0_54, %c0_55] : memref<2x128xf32, #tpu.memory_space<vmem>>, vector<2x128xf32>
    tpu.vector_store %arg8[%c0_54, %c0_55], %237 {strides = array<i32>} : memref<2x128xf32, #tpu.memory_space<vmem>>, vector<2x128xf32>,
    %c0_i32_56 = arith.constant 0 : i32
    %239 = arith.cmpi eq, %arg1, %c0_i32_56 : i32
    %240 = arith.extui %239 : i1 to i32
    %c0_i32_57 = arith.constant 0 : i32
    %241 = arith.cmpi ne, %240, %c0_i32_57 : i32
    scf.if %241 {
      %c0_58 = arith.constant 0 : index
      %c0_59 = arith.constant 0 : index
      %242 = vector.load %arg5[%c0_58, %c0_59] : memref<128x3xf32, #tpu.memory_space<vmem>>, vector<128x3xf32>
      %cst_60 = arith.constant dense<0.000000e+00> : vector<2x3xf32>
      %243 = tpu.matmul %237, %242, %cst_60 {dimension_numbers = #tpu.dot_dimension_numbers<[1], [0], [0], [1], [0, 0, 1, 1], [], []>} : vector<2x128xf32>, vector<128x3xf32>, vector<2x3xf32> -> vector<2x3xf32>
      %c0_61 = arith.constant 0 : index
      %c0_62 = arith.constant 0 : index
      %244 = vector.load %arg6[%c0_61, %c0_62] : memref<1x3xf32, #tpu.memory_space<vmem>>, vector<1x3xf32>
      %245 = vector.broadcast %244 : vector<1x3xf32> to vector<2x3xf32>
      %246 = arith.addf %243, %245 : vector<2x3xf32>
      %c0_63 = arith.constant 0 : index
      %c0_64 = arith.constant 0 : index
      %247 = vector.load %arg7[%c0_63, %c0_64] : memref<2x3xf32, #tpu.memory_space<vmem>>, vector<2x3xf32>
      tpu.vector_store %arg7[%c0_63, %c0_64], %246 {strides = array<i32>} : memref<2x3xf32, #tpu.memory_space<vmem>>, vector<2x3xf32>,
    } else {
    }
    return
  }
  func.func @transform_0(%arg0: i32, %arg1: i32) -> (i32, i32, i32) {
    %c0_i32 = arith.constant 0 : i32
    %c0_i32_0 = arith.constant 0 : i32
    return %arg1, %arg0, %c0_i32 : i32, i32, i32
  }
  func.func @transform_1(%arg0: i32, %arg1: i32) -> (i32, i32) {
    %c0_i32 = arith.constant 0 : i32
    %c0_i32_0 = arith.constant 0 : i32
    %c0_i32_1 = arith.constant 0 : i32
    return %c0_i32, %c0_i32_0 : i32, i32
  }
  func.func @transform_2(%arg0: i32, %arg1: i32) -> (i32, i32) {
    %c0_i32 = arith.constant 0 : i32
    %c0_i32_0 = arith.constant 0 : i32
    %c0_i32_1 = arith.constant 0 : i32
    return %c0_i32, %c0_i32_0 : i32, i32
  }
  func.func @transform_3(%arg0: i32, %arg1: i32) -> (i32, i32) {
    %c0_i32 = arith.constant 0 : i32
    %c0_i32_0 = arith.constant 0 : i32
    %c0_i32_1 = arith.constant 0 : i32
    return %c0_i32, %c0_i32_0 : i32, i32
  }
  func.func @transform_4(%arg0: i32, %arg1: i32) -> (i32, i32) {
    %c0_i32 = arith.constant 0 : i32
    %c0_i32_0 = arith.constant 0 : i32
    %c0_i32_1 = arith.constant 0 : i32
    return %c0_i32, %c0_i32_0 : i32, i32
  }
  func.func @transform_5(%arg0: i32, %arg1: i32) -> (i32, i32) {
    %c0_i32 = arith.constant 0 : i32
    %c0_i32_0 = arith.constant 0 : i32
    return %arg0, %c0_i32 : i32, i32
  }
}

</mosaic_0001>

<bundles_post_ra>
// kernel: gru_forward.3
= control target key start
LH: loop header
LB: loop body
LE: loop exit
PB: predicated region body
PF: predicated region fallthrough
CT: control target
= control target key end

     0   :  { %vm36_vm0 = vcmask 1041408   ;;  %vm32_vm1 = vcmask 31744   ;;  %s148_s1 = inlined_call_operand.vmem [shape: bf16[4,384], index: 1, kind: input, shape index: {}]   ;;  %s149_s0 = inlined_call_operand.vmem [shape: f32[16,4], index: 0, kind: input, shape index: {}]   ;;  %s150_s2 = inlined_call_operand.vmem [shape: f32[1,384], index: 2, kind: input, shape index: {}]   ;;  %s151_s3 = inlined_call_operand.vmem [shape: f32[16,384], index: 3, kind: output, shape index: {}]  }
   0x1   :  { %v18_v0 = vld [vmem:[%s148_s1] sm:$0x3f]  ;;  %v16_v2 = vld [vmem:[%s149_s0 + $0x8] sm:$0xff] }
   0x2   :  { %28 = vst [vmem:[#allocation1] ss:$4 sm:$0xff] %v18_v0  ;;  %v15_v1 = vld [vmem:[%s149_s0] sm:$0xff] }
   0x3   :  { %v17_v8 = vpack.c.bf16 %v16_v2, %v15_v1  ;;  %v19_v10 = vld [vmem:[%s150_s2] sm:$0x7] }
   0x4   :  { %v21_v11 = vperm.slane %v19_v10, 0  ;;  %v22_v12 = vperm.slane %v19_v10, 1  ;;  %v23_v17 = vperm.slane %v19_v10, 2 }
   0x9   :  { %v29_v3 = vld.sshfl [vmem:[#allocation1] sm:$0xff pattern:$0x73625140]  ;;  %v30_v4 = vld.sshfl [vmem:[#allocation1 + $0x8] sm:$0xff pattern:$0x73625140] }
   0xa   :  { %v37_v5 = vsel %vm36_vm0, %v29_v3, 0  ;;  %v39_v6 = vsel %vm36_vm0, %v30_v4, 0  ;;  %v31_v7 = vld.sshfl [vmem:[#allocation1 + $0x10] sm:$0xff pattern:$0x73625140] }
   0xb   :  { %50 = vmatpush.bf16.msra.mxu0 %v37_v5  ;;  %64 = vmatpush.bf16.msra.mxu1 %v39_v6  ;;  %v41_v9 = vsel %vm36_vm0, %v31_v7, 0 }
   0xc   :  { %78 = vmatpush.bf16.msra.mxu2 %v41_v9 }
   0xe   :  { %95 = vmatmul.msk.bf16.vlgmr.msra.gmra.mxu0 %vm32_vm1, %v17_v8  ;;  %96 = vmatmul.msk.bf16.vlgmr.msra.gmra.mxu1 %vm32_vm1, %v17_v8 }
   0xf   :  { %97 = vmatmul.msk.bf16.vlgmr.msra.gmra.mxu2 %vm32_vm1, %v17_v8 }
  0x8b   :  { %v52_v13 = vpop.f32.mrf.mxu0  ;;  %v66_v14 = vpop.f32.mrf.mxu1 }
  0x8c   :  { %v53_v15 = vadd.f32 %v52_v13, %v21_v11  ;;  %v67_v16 = vadd.f32 %v66_v14, %v22_v12 }
  0x8e   :  { %85 = vst [vmem:[%s151_s3] sm:$0xff] %v53_v15 }
  0x8f   :  { %86 = vst [vmem:[%s151_s3 + $0x8] sm:$0xff] %v67_v16 }
  0x92   :  { %v80_v18 = vpop.f32.mrf.mxu2 }
  0x93   :  { %v81_v19 = vadd.f32 %v80_v18, %v23_v17  ;;  %v54_v20 = vpop.f32.mrf.mxu0  ;;  %v68_v21 = vpop.f32.mrf.mxu1 }
  0x94   :  { %v55_v22 = vadd.f32 %v54_v20, %v21_v11  ;;  %v69_v23 = vadd.f32 %v68_v21, %v22_v12 }
  0x95   :  { %87 = vst [vmem:[%s151_s3 + $0x10] sm:$0xff] %v81_v19 }
  0x96   :  { %88 = vst [vmem:[%s151_s3 + $0x18] sm:$0xff] %v55_v22 }
  0x97   :  { %89 = vst [vmem:[%s151_s3 + $0x20] sm:$0xff] %v69_v23 }
  0x9a   :  { %v82_v24 = vpop.f32.mrf.mxu2 }
  0x9b   :  { %v83_v25 = vadd.f32 %v82_v24, %v23_v17 }
  0x9d   :  { %90 = vst [vmem:[%s151_s3 + $0x28] sm:$0xff] %v83_v25 }

// kernel: gru_forward.5
= control target key start
LH: loop header
LB: loop body
LE: loop exit
PB: predicated region body
PF: predicated region fallthrough
CT: control target
= control target key end

     0   :  { %v1154_v37 = vmov 0.0   ;;  %s1699_s0 = inlined_call_operand.vmem [shape: f32[8,2,384], index: 0, kind: input, shape index: {}]   ;;  %s1700_s1 = inlined_call_operand.vmem [shape: bf16[128,384], index: 1, kind: input, shape index: {}]   ;;  %s1701_s2 = inlined_call_operand.vmem [shape: f32[1,128], index: 2, kind: input, shape index: {}]   ;;  %s1702_s3 = inlined_call_operand.vmem [shape: f32[128,3], index: 3, kind: input, shape index: {}]   ;;  %s1703_s4 = inlined_call_operand.vmem [shape: f32[1,3], index: 4, kind: input, shape index: {}]   ;;  %s1704_s5 = inlined_call_operand.hbm [shape: f32[2,3], index: 5, kind: output, shape index: {}]  }
   0x1   :  { %v1027_v0 = vld [vmem:[%s1700_s1 + $0xa8] sm:$0xf]  ;;  %v1074_v1 = vld [vmem:[%s1700_s1 + $0xb0] sm:$0xf0]  ;;  %v1073_v2 = vld [vmem:[%s1700_s1 + $0xac] sm:$0xf] }
   0x2   :  { %v1195_v3 = vor.u32 %v1074_v1, %v1027_v0  ;;  %v1029_v4 = vld [vmem:[%s1700_s1 + $0xb4] sm:$0xf0]  ;;  %v1015_v5 = vld [vmem:[%s1700_s1 + $0x90] sm:$0xf]  ;;  %v1071_v6 = vld [vmem:[%s1700_s1 + $0x98] sm:$0xf0] }
   0x3   :  { %v1206_v7 = vor.u32 %v1073_v2, %v1029_v4  ;;  %v1070_v8 = vld [vmem:[%s1700_s1 + $0x94] sm:$0xf]  ;;  %v1017_v9 = vld [vmem:[%s1700_s1 + $0x9c] sm:$0xf0]  ;;  %v1215_v10 = vor.u32 %v1071_v6, %v1015_v5  ;;  %v1003_v12 = vld [vmem:[%s1700_s1 + $0x78] sm:$0xf] }
   0x4   :  { %190 = vmatpush.bf16.msra.mxu0 %v1195_v3  ;;  %280 = vmatpush.bf16.msra.mxu3 %v1195_v3  ;;  %v1219_v11 = vor.u32 %v1070_v8, %v1017_v9  ;;  %v1068_v13 = vld [vmem:[%s1700_s1 + $0x80] sm:$0xf0]  ;;  %v1067_v14 = vld [vmem:[%s1700_s1 + $0x7c] sm:$0xf]  ;;  %v1005_v15 = vld [vmem:[%s1700_s1 + $0x84] sm:$0xf0] }
   0x5   :  { %203 = vmatpush.bf16.msra.mxu1 %v1206_v7  ;;  %v1035_v16 = vld [vmem:[%s1700_s1 + $0xb0] sm:$0xf]  ;;  %v1237_v17 = vor.u32 %v1068_v13, %v1003_v12  ;;  %v1075_v18 = vld [vmem:[%s1700_s1 + $0xb8] sm:$0xf0]  ;;  %v1244_v19 = vor.u32 %v1067_v14, %v1005_v15  ;;  %v991_v20 = vld [vmem:[%s1700_s1 + $0x60] sm:$0xf] }
   0x6   :  { %v1065_v21 = vld [vmem:[%s1700_s1 + $0x68] sm:$0xf0]  ;;  %v1252_v22 = vor.u32 %v1075_v18, %v1035_v16  ;;  %v1023_v23 = vld [vmem:[%s1700_s1 + $0x98] sm:$0xf]  ;;  %v1064_v24 = vld [vmem:[%s1700_s1 + $0x64] sm:$0xf] }
   0x7   :  { %v993_v25 = vld [vmem:[%s1700_s1 + $0x6c] sm:$0xf0]  ;;  %v1072_v26 = vld [vmem:[%s1700_s1 + $0xa0] sm:$0xf0]  ;;  %v1270_v28 = vor.u32 %v1065_v21, %v991_v20  ;;  %v1011_v29 = vld [vmem:[%s1700_s1 + $0x80] sm:$0xf] }
   0x8   :  { %191 = vmatpush.bf16.msra.mxu0 %v1215_v10  ;;  %281 = vmatpush.bf16.msra.mxu3 %v1215_v10  ;;  %v1267_v27 = vor.u32 %v1072_v26, %v1023_v23  ;;  %v1069_v30 = vld [vmem:[%s1700_s1 + $0x88] sm:$0xf0]  ;;  %v1280_v31 = vor.u32 %v1064_v24, %v993_v25  ;;  %v979_v32 = vld [vmem:[%s1700_s1 + $0x48] sm:$0xf]  ;;  %v1062_v33 = vld [vmem:[%s1700_s1 + $0x50] sm:$0xf0] }
   0x9   :  { %204 = vmatpush.bf16.msra.mxu1 %v1219_v11  ;;  %216 = vmatpush.bf16.msra.mxu2 %v1252_v22  ;;  %v1061_v34 = vld [vmem:[%s1700_s1 + $0x4c] sm:$0xf]  ;;  %v981_v35 = vld [vmem:[%s1700_s1 + $0x54] sm:$0xf0]  ;;  %v1295_v36 = vor.u32 %v1069_v30, %v1011_v29  ;;  %25 = vst [vmem:[#allocation2] sm:$0x3] %v1154_v37  ;;  %v1298_v38 = vor.u32 %v1062_v33, %v979_v32 }
   0xa   :  { %v967_v39 = vld [vmem:[%s1700_s1 + $0x30] sm:$0xf]  ;;  %v999_v40 = vld [vmem:[%s1700_s1 + $0x68] sm:$0xf]  ;;  %v1066_v41 = vld [vmem:[%s1700_s1 + $0x70] sm:$0xf0]  ;;  %v1311_v42 = vor.u32 %v1061_v34, %v981_v35 }
   0xb   :  { %v1059_v43 = vld [vmem:[%s1700_s1 + $0x38] sm:$0xf0]  ;;  %v1058_v44 = vld [vmem:[%s1700_s1 + $0x34] sm:$0xf]  ;;  %v969_v45 = vld [vmem:[%s1700_s1 + $0x3c] sm:$0xf0] }
   0xc   :  { %192 = vmatpush.bf16.msra.mxu0 %v1237_v17  ;;  %282 = vmatpush.bf16.msra.mxu3 %v1237_v17 }
   0xd   :  { %205 = vmatpush.bf16.msra.mxu1 %v1244_v19  ;;  %217 = vmatpush.bf16.msra.mxu2 %v1267_v27 }
  0x10   :  { %193 = vmatpush.bf16.msra.mxu0 %v1270_v28  ;;  %283 = vmatpush.bf16.msra.mxu3 %v1270_v28 }
  0x11   :  { %206 = vmatpush.bf16.msra.mxu1 %v1280_v31 }
  0x12   :  { %10 = vsyncpa [#allocation4], 0  ;;  %218 = vmatpush.bf16.msra.mxu2 %v1295_v36  ;;  %v1323_v46 = vor.u32 %v1066_v41, %v999_v40  ;;  %v1326_v47 = vor.u32 %v1059_v43, %v967_v39  ;;  %v987_v48 = vld [vmem:[%s1700_s1 + $0x50] sm:$0xf]  ;;  %v1063_v49 = vld [vmem:[%s1700_s1 + $0x58] sm:$0xf0]  ;;  %v1336_v50 = vor.u32 %v1058_v44, %v969_v45 }
  0x13   :  { %v955_v51 = vld [vmem:[%s1700_s1 + $0x18] sm:$0xf]  ;;  %v1056_v52 = vld [vmem:[%s1700_s1 + $0x20] sm:$0xf0]  ;;  %v1055_v53 = vld [vmem:[%s1700_s1 + $0x1c] sm:$0xf]  ;;  %v1351_v55 = vor.u32 %v1063_v49, %v987_v48 }
  0x14   :  { %194 = vmatpush.bf16.msra.mxu0 %v1298_v38  ;;  %284 = vmatpush.bf16.msra.mxu3 %v1298_v38  ;;  %v957_v54 = vld [vmem:[%s1700_s1 + $0x24] sm:$0xf0]  ;;  %v1354_v56 = vor.u32 %v1056_v52, %v955_v51  ;;  %v975_v57 = vld [vmem:[%s1700_s1 + $0x38] sm:$0xf]  ;;  %v1060_v58 = vld [vmem:[%s1700_s1 + $0x40] sm:$0xf0] }
  0x15   :  { %207 = vmatpush.bf16.msra.mxu1 %v1311_v42  ;;  %v1364_v59 = vor.u32 %v1055_v53, %v957_v54  ;;  %v943_v60 = vld [vmem:[%s1700_s1] sm:$0xf]  ;;  %v1053_v61 = vld [vmem:[%s1700_s1 + $0x8] sm:$0xf0]  ;;  %v1052_v62 = vld [vmem:[%s1700_s1 + $0x4] sm:$0xf]  ;;  %v1379_v0 = vor.u32 %v1060_v58, %v975_v57 }
  0x16   :  { %219 = vmatpush.bf16.msra.mxu2 %v1323_v46  ;;  %v945_v63 = vld [vmem:[%s1700_s1 + $0xc] sm:$0xf0]  ;;  %v1382_v1 = vor.u32 %v1053_v61, %v943_v60  ;;  %v1384_v2 = vld [vmem:[#allocation2] sm:$0x3]  ;;  %v1057_v5 = vld [vmem:[%s1700_s1 + $0x28] sm:$0xf0] }
  0x17   :  { %v963_v4 = vld [vmem:[%s1700_s1 + $0x20] sm:$0xf]  ;;  %v1394_v6 = vor.u32 %v1052_v62, %v945_v63  ;;  %v61_v8 = vpack.c.bf16 %v1384_v2, %v1384_v2  ;;  %v951_v12 = vld [vmem:[%s1700_s1 + $0x8] sm:$0xf]  ;;  %v1054_v13 = vld [vmem:[%s1700_s1 + $0x10] sm:$0xf0] }
  0x18   :  { %195 = vmatpush.bf16.msra.mxu0 %v1326_v47  ;;  %285 = vmatpush.bf16.msra.mxu3 %v1326_v47  ;;  %v1399_v9 = vor.u32 %v1057_v5, %v963_v4  ;;  %v1414_v14 = vor.u32 %v1054_v13, %v951_v12  ;;  %vm232_vm0 = vcmask 1041408   ;;  %v60_v18 = vld [vmem:[%s1699_s0] sm:$0x3f]  ;;  %s1155_s10 = smov [#allocation3]   ;;  %s932_s1 = sshll.u32 %s1704_s5, 4  ;;  %s933_s1 = int_to_ptr.hbm [resolvable:$true] %s932_s1 }
  0x19   :  { %208 = vmatpush.bf16.msra.mxu1 %v1336_v50  ;;  %v1477_v39 = vld [vmem:[%s1701_s2] ss:$0 sm:$0xff]  ;;  %v261_v51 = vrot.slane %v60_v18, 4  ;;  %s930_s11 = sshll.u32 %s1155_s10, 4  ;;  %s931_s11 = int_to_ptr.vmem [resolvable:$true] %s930_s11 }
  0x1a   :  { %220 = vmatpush.bf16.msra.mxu2 %v1351_v55 }
  0x1c   :  { %196 = vmatpush.bf16.msra.mxu0 %v1354_v56  ;;  %286 = vmatpush.bf16.msra.mxu3 %v1354_v56 }
  0x1d   :  { %209 = vmatpush.bf16.msra.mxu1 %v1364_v59 }
  0x1e   :  { %221 = vmatpush.bf16.msra.mxu2 %v1379_v0 }
  0x20   :  { %197 = vmatpush.bf16.msra.mxu0 %v1382_v1  ;;  %287 = vmatpush.bf16.msra.mxu3 %v1382_v1 }
  0x21   :  { %210 = vmatpush.bf16.msra.mxu1 %v1394_v6 }
  0x22   :  { %222 = vmatpush.bf16.msra.mxu2 %v1399_v9 }
  0x23   :  { %198 = vmatmul.bf16.vlgmr.msra.gmra.mxu0 %v61_v8 }
  0x24   :  { %293 = vmatpush.bf16.msrb.mxu0 %v1206_v7  ;;  %379 = vmatpush.bf16.msrb.mxu3 %v1206_v7 }
  0x25   :  { %306 = vmatpush.bf16.msrb.mxu1 %v1252_v22 }
  0x26   :  { %211 = vmatmul.bf16.vlgmr.msra.gmra.mxu1 %v61_v8  ;;  %223 = vmatpush.bf16.msra.mxu2 %v1414_v14 }
  0x28   :  { %294 = vmatpush.bf16.msrb.mxu0 %v1219_v11  ;;  %380 = vmatpush.bf16.msrb.mxu3 %v1219_v11 }
  0x29   :  { %307 = vmatpush.bf16.msrb.mxu1 %v1267_v27  ;;  %224 = vmatmul.bf16.vlgmr.msra.gmra.mxu2 %v61_v8  ;;  %v1038_v8 = vld [vmem:[%s1699_s0 + $0x6] sm:$0x3f] }
  0x2a   :  { %366 = vmatpush.bf16.msrb.mxu2 %v1195_v3 }
  0x2c   :  { %295 = vmatpush.bf16.msrb.mxu0 %v1244_v19  ;;  %381 = vmatpush.bf16.msrb.mxu3 %v1244_v19 }
  0x2d   :  { %308 = vmatpush.bf16.msrb.mxu1 %v1295_v36 }
  0x2e   :  { %367 = vmatpush.bf16.msrb.mxu2 %v1215_v10 }
  0x30   :  { %296 = vmatpush.bf16.msrb.mxu0 %v1280_v31  ;;  %382 = vmatpush.bf16.msrb.mxu3 %v1280_v31 }
  0x31   :  { %309 = vmatpush.bf16.msrb.mxu1 %v1323_v46 }
  0x32   :  { %368 = vmatpush.bf16.msrb.mxu2 %v1237_v17 }
  0x34   :  { %297 = vmatpush.bf16.msrb.mxu0 %v1311_v42  ;;  %383 = vmatpush.bf16.msrb.mxu3 %v1311_v42 }
  0x35   :  { %310 = vmatpush.bf16.msrb.mxu1 %v1351_v55 }
  0x36   :  { %369 = vmatpush.bf16.msrb.mxu2 %v1270_v28 }
  0x38   :  { %298 = vmatpush.bf16.msrb.mxu0 %v1336_v50  ;;  %384 = vmatpush.bf16.msrb.mxu3 %v1336_v50 }
  0x39   :  { %311 = vmatpush.bf16.msrb.mxu1 %v1379_v0 }
  0x3a   :  { %370 = vmatpush.bf16.msrb.mxu2 %v1298_v38 }
  0x3c   :  { %299 = vmatpush.bf16.msrb.mxu0 %v1364_v59  ;;  %385 = vmatpush.bf16.msrb.mxu3 %v1364_v59 }
  0x3d   :  { %312 = vmatpush.bf16.msrb.mxu1 %v1399_v9 }
  0x3e   :  { %371 = vmatpush.bf16.msrb.mxu2 %v1326_v47 }
  0x40   :  { %300 = vmatpush.bf16.msrb.mxu0 %v1394_v6  ;;  %386 = vmatpush.bf16.msrb.mxu3 %v1394_v6 }
  0x41   :  { %313 = vmatpush.bf16.msrb.mxu1 %v1414_v14 }
  0x42   :  { %372 = vmatpush.bf16.msrb.mxu2 %v1354_v56 }
  0x44   :  { %392 = vmatpush.bf16.msra.mxu0 %v1252_v22 }
  0x45   :  { %452 = vmatpush.bf16.msra.mxu1 %v1195_v3 }
  0x46   :  { %373 = vmatpush.bf16.msrb.mxu2 %v1382_v1 }
  0x48   :  { %393 = vmatpush.bf16.msra.mxu0 %v1267_v27 }
  0x49   :  { %453 = vmatpush.bf16.msra.mxu1 %v1215_v10 }
  0x4a   :  { %465 = vmatpush.bf16.msra.mxu2 %v1206_v7 }
  0x4c   :  { %394 = vmatpush.bf16.msra.mxu0 %v1295_v36 }
  0x4d   :  { %454 = vmatpush.bf16.msra.mxu1 %v1237_v17 }
  0x4e   :  { %466 = vmatpush.bf16.msra.mxu2 %v1219_v11 }
  0x50   :  { %395 = vmatpush.bf16.msra.mxu0 %v1323_v46 }
  0x51   :  { %455 = vmatpush.bf16.msra.mxu1 %v1270_v28 }
  0x52   :  { %467 = vmatpush.bf16.msra.mxu2 %v1244_v19 }
  0x54   :  { %396 = vmatpush.bf16.msra.mxu0 %v1351_v55 }
  0x55   :  { %456 = vmatpush.bf16.msra.mxu1 %v1298_v38 }
  0x56   :  { %468 = vmatpush.bf16.msra.mxu2 %v1280_v31 }
  0x58   :  { %397 = vmatpush.bf16.msra.mxu0 %v1379_v0 }
  0x59   :  { %457 = vmatpush.bf16.msra.mxu1 %v1326_v47 }
  0x5a   :  { %469 = vmatpush.bf16.msra.mxu2 %v1311_v42 }
  0x5c   :  { %398 = vmatpush.bf16.msra.mxu0 %v1399_v9 }
  0x5d   :  { %458 = vmatpush.bf16.msra.mxu1 %v1354_v56 }
  0x5e   :  { %470 = vmatpush.bf16.msra.mxu2 %v1336_v50 }
  0x60   :  { %399 = vmatpush.bf16.msra.mxu0 %v1414_v14 }
  0x61   :  { %459 = vmatpush.bf16.msra.mxu1 %v1382_v1 }
  0x62   :  { %471 = vmatpush.bf16.msra.mxu2 %v1364_v59 }
  0x66   :  { %472 = vmatpush.bf16.msra.mxu2 %v1394_v6 }
  0xa0   :  { %v199_v15 = vpop.f32.mrf.mxu0 }
  0xa3   :  { %v212_v16 = vpop.f32.mrf.mxu1 }
  0xa4   :  { %v231_v20 = vrot.slane %v212_v16, 6 }
  0xa6   :  { %v233_v21 = vsel %vm232_vm0, %v199_v15, %v231_v20 }
  0xa7   :  { %v235_v23 = vadd.f32 %v233_v21, %v60_v18 }
  0xa8   :  { %v201_v25 = vpop.f32.mrf.mxu0 }
  0xa9   :  { %v1037_v24 = vmul.f32 -1.442695, %v235_v23 }
  0xab   :  { %1080 = vpow2.f32 %v1037_v24  ;;  %v214_v26 = vpop.f32.mrf.mxu1 }
  0xac   :  { %v225_v29 = vpop.f32.mrf.mxu2 }
  0xad   :  { %v258_v45 = vadd.f32 %v1477_v39, %v225_v29 }
  0xb1   :  { %v1081_v30 = vpop.eup %1080 }
  0xb2   :  { %v239_v32 = vadd.f32 1.0, %v1081_v30 }
  0xb4   :  { %1082 = vrcp.f32 %v239_v32  ;;  %v227_v33 = vpop.f32.mrf.mxu2  ;;  %v251_v40 = vand.u32 2147483648, %v239_v32  ;;  %v249_v43 = vand.u32 2147483647, %v239_v32  ;;  %vm245_vm2 = vweird.f32 %v239_v32 }
  0xb6   :  { %v252_v48 = vor.u32 1.1754944e-38, %v251_v40  ;;  %vm250_vm4 = vcmp.eq.f32.partialorder %v249_v43, 8.507059e+37 }
  0xba   :  { %v1083_v34 = vpop.eup %1082 }
  0xbb   :  { %v241_v35 = vmul.f32 %v1083_v34, %v239_v32  ;;  %vm246_vm1 = vweird.f32 %v1083_v34 }
  0xbc   :  { %vm247_vm3 = vmor %vm245_vm2, %vm246_vm1 }
  0xbd   :  { %v242_v37 = vsub.f32 1.0, %v241_v35 }
  0xbf   :  { %v243_v41 = vmul.f32 %v1083_v34, %v242_v37 }
  0xc1   :  { %v244_v44 = vadd.f32 %v1083_v34, %v243_v41  ;;  %v347_v41 = vrot.slane %v1038_v8, 4 }
  0xc3   :  { %v248_v49 = vsel %vm247_vm3, %v1083_v34, %v244_v44 }
  0xc4   :  { %v253_v52 = vsel %vm250_vm4, %v252_v48, %v248_v49 }
  0xc5   :  { %v259_v53 = vmul.f32 %v258_v45, %v253_v52  ;;  %v267_v60 = vrot.slane %v253_v52, 2 }
  0xc7   :  { %v263_v54 = vadd.f32 %v261_v51, %v259_v53 }
  0xc9   :  { %1084 = vtanh.f32 %v263_v54 }
  0xcf   :  { %v1085_v57 = vpop.eup %1084 }
  0xd0   :  { %v265_v58 = vsub.f32 %v1384_v2, %v1085_v57 }
  0xd2   :  { %v269_v61 = vmul.f32 %v267_v60, %v265_v58 }
  0xd4   :  { %v1481_v62 = vadd.f32 %v1085_v57, %v269_v61  ;;  %v1040_v61 = vld [vmem:[%s1699_s0 + $0xc] sm:$0x3f] }
  0xd6   :  { %v279_v63 = vpack.c.bf16 %v1481_v62, %v1481_v62 }
  0xd8   :  { %288 = vmatmul.bf16.vlgmr.msra.gmra.mxu3 %v279_v63  ;;  %301 = vmatmul.bf16.vlgmr.msrb.gmra.mxu0 %v279_v63 }
  0xd9   :  { %314 = vmatmul.bf16.vlgmr.msrb.gmra.mxu1 %v279_v63  ;;  %478 = vmatpush.bf16.msra.mxu3 %v1252_v22 }
  0xda   :  { %538 = vmatpush.bf16.msrb.mxu0 %v1195_v3  ;;  %551 = vmatpush.bf16.msrb.mxu1 %v1206_v7 }
  0xdd   :  { %479 = vmatpush.bf16.msra.mxu3 %v1267_v27 }
  0xde   :  { %539 = vmatpush.bf16.msrb.mxu0 %v1215_v10  ;;  %552 = vmatpush.bf16.msrb.mxu1 %v1219_v11 }
  0xe1   :  { %480 = vmatpush.bf16.msra.mxu3 %v1295_v36 }
  0xe2   :  { %540 = vmatpush.bf16.msrb.mxu0 %v1237_v17  ;;  %553 = vmatpush.bf16.msrb.mxu1 %v1244_v19 }
  0xe5   :  { %481 = vmatpush.bf16.msra.mxu3 %v1323_v46 }
  0xe6   :  { %541 = vmatpush.bf16.msrb.mxu0 %v1270_v28  ;;  %554 = vmatpush.bf16.msrb.mxu1 %v1280_v31 }
  0xe9   :  { %482 = vmatpush.bf16.msra.mxu3 %v1351_v55 }
  0xea   :  { %542 = vmatpush.bf16.msrb.mxu0 %v1298_v38  ;;  %555 = vmatpush.bf16.msrb.mxu1 %v1311_v42 }
  0xed   :  { %483 = vmatpush.bf16.msra.mxu3 %v1379_v0 }
  0xee   :  { %543 = vmatpush.bf16.msrb.mxu0 %v1326_v47  ;;  %556 = vmatpush.bf16.msrb.mxu1 %v1336_v50 }
  0xf1   :  { %484 = vmatpush.bf16.msra.mxu3 %v1399_v9 }
  0xf2   :  { %544 = vmatpush.bf16.msrb.mxu0 %v1354_v56  ;;  %557 = vmatpush.bf16.msrb.mxu1 %v1364_v59 }
  0xf5   :  { %485 = vmatpush.bf16.msra.mxu3 %v1414_v14 }
  0xf6   :  { %545 = vmatpush.bf16.msrb.mxu0 %v1382_v1  ;;  %558 = vmatpush.bf16.msrb.mxu1 %v1394_v6 }
 0x155   :  { %v302_v2 = vpop.f32.mrf.mxu0 }
 0x156   :  { %v315_v4 = vpop.f32.mrf.mxu1  ;;  %v321_v5 = vrot.slane %v302_v2, 6 }
 0x157   :  { %v344_v37 = vadd.f32 %v1477_v39, %v315_v4 }
 0x15b   :  { %v289_v12 = vpop.f32.mrf.mxu3 }
 0x15c   :  { %v322_v13 = vsel %vm232_vm0, %v289_v12, %v321_v5 }
 0x15d   :  { %v324_v15 = vadd.f32 %v1038_v8, %v322_v13  ;;  %v304_v16 = vpop.f32.mrf.mxu0 }
 0x15e   :  { %v317_v18 = vpop.f32.mrf.mxu1 }
 0x15f   :  { %v1039_v20 = vmul.f32 -1.442695, %v324_v15 }
 0x161   :  { %1086 = vpow2.f32 %v1039_v20 }
 0x163   :  { %v291_v21 = vpop.f32.mrf.mxu3 }
 0x167   :  { %v1087_v23 = vpop.eup %1086 }
 0x168   :  { %v328_v24 = vadd.f32 1.0, %v1087_v23 }
 0x16a   :  { %1088 = vrcp.f32 %v328_v24  ;;  %v340_v30 = vand.u32 2147483648, %v328_v24  ;;  %v338_v33 = vand.u32 2147483647, %v328_v24  ;;  %vm334_vm6 = vweird.f32 %v328_v24 }
 0x16c   :  { %v341_v35 = vor.u32 1.1754944e-38, %v340_v30  ;;  %vm339_vm8 = vcmp.eq.f32.partialorder %v338_v33, 8.507059e+37 }
 0x170   :  { %v1089_v25 = vpop.eup %1088 }
 0x171   :  { %v330_v26 = vmul.f32 %v1089_v25, %v328_v24  ;;  %vm335_vm5 = vweird.f32 %v1089_v25 }
 0x172   :  { %vm336_vm7 = vmor %vm334_vm6, %vm335_vm5 }
 0x173   :  { %v331_v29 = vsub.f32 1.0, %v330_v26 }
 0x175   :  { %v332_v32 = vmul.f32 %v1089_v25, %v331_v29 }
 0x177   :  { %v333_v34 = vadd.f32 %v1089_v25, %v332_v32  ;;  %v433_v32 = vrot.slane %v1040_v61, 4 }
 0x179   :  { %v337_v40 = vsel %vm336_vm7, %v1089_v25, %v333_v34 }
 0x17a   :  { %v342_v43 = vsel %vm339_vm8, %v341_v35, %v337_v40 }
 0x17b   :  { %v345_v44 = vmul.f32 %v344_v37, %v342_v43  ;;  %v353_v51 = vrot.slane %v342_v43, 2 }
 0x17d   :  { %v349_v45 = vadd.f32 %v347_v41, %v345_v44 }
 0x17f   :  { %1090 = vtanh.f32 %v349_v45 }
 0x185   :  { %v1091_v48 = vpop.eup %1090 }
 0x186   :  { %v351_v49 = vsub.f32 %v1481_v62, %v1091_v48 }
 0x188   :  { %v355_v52 = vmul.f32 %v353_v51, %v351_v49  ;;  %v1042_v51 = vld [vmem:[%s1699_s0 + $0x12] sm:$0x3f] }
 0x18a   :  { %v1515_v53 = vadd.f32 %v1091_v48, %v355_v52 }
 0x18c   :  { %v365_v54 = vpack.c.bf16 %v1515_v53, %v1515_v53 }
 0x18e   :  { %374 = vmatmul.bf16.vlgmr.msrb.gmra.mxu2 %v365_v54  ;;  %387 = vmatmul.bf16.vlgmr.msrb.gmra.mxu3 %v365_v54 }
 0x18f   :  { %400 = vmatmul.bf16.vlgmr.msra.gmra.mxu0 %v365_v54  ;;  %564 = vmatpush.bf16.msrb.mxu2 %v1252_v22 }
 0x190   :  { %624 = vmatpush.bf16.msrb.mxu3 %v1195_v3  ;;  %637 = vmatpush.bf16.msra.mxu0 %v1206_v7 }
 0x193   :  { %565 = vmatpush.bf16.msrb.mxu2 %v1267_v27 }
 0x194   :  { %625 = vmatpush.bf16.msrb.mxu3 %v1215_v10  ;;  %638 = vmatpush.bf16.msra.mxu0 %v1219_v11 }
 0x197   :  { %566 = vmatpush.bf16.msrb.mxu2 %v1295_v36 }
 0x198   :  { %626 = vmatpush.bf16.msrb.mxu3 %v1237_v17  ;;  %639 = vmatpush.bf16.msra.mxu0 %v1244_v19 }
 0x19b   :  { %567 = vmatpush.bf16.msrb.mxu2 %v1323_v46 }
 0x19c   :  { %627 = vmatpush.bf16.msrb.mxu3 %v1270_v28  ;;  %640 = vmatpush.bf16.msra.mxu0 %v1280_v31 }
 0x19f   :  { %568 = vmatpush.bf16.msrb.mxu2 %v1351_v55 }
 0x1a0   :  { %628 = vmatpush.bf16.msrb.mxu3 %v1298_v38  ;;  %641 = vmatpush.bf16.msra.mxu0 %v1311_v42 }
 0x1a3   :  { %569 = vmatpush.bf16.msrb.mxu2 %v1379_v0 }
 0x1a4   :  { %629 = vmatpush.bf16.msrb.mxu3 %v1326_v47  ;;  %642 = vmatpush.bf16.msra.mxu0 %v1336_v50 }
 0x1a7   :  { %570 = vmatpush.bf16.msrb.mxu2 %v1399_v9 }
 0x1a8   :  { %630 = vmatpush.bf16.msrb.mxu3 %v1354_v56  ;;  %643 = vmatpush.bf16.msra.mxu0 %v1364_v59 }
 0x1ab   :  { %571 = vmatpush.bf16.msrb.mxu2 %v1414_v14 }
 0x1ac   :  { %631 = vmatpush.bf16.msrb.mxu3 %v1382_v1  ;;  %644 = vmatpush.bf16.msra.mxu0 %v1394_v6 }
 0x20c   :  { %v401_v57 = vpop.f32.mrf.mxu0 }
 0x20d   :  { %v430_v29 = vadd.f32 %v1477_v39, %v401_v57 }
 0x211   :  { %v375_v58 = vpop.f32.mrf.mxu2  ;;  %v388_v60 = vpop.f32.mrf.mxu3 }
 0x212   :  { %v407_v62 = vrot.slane %v388_v60, 6 }
 0x214   :  { %v408_v63 = vsel %vm232_vm0, %v375_v58, %v407_v62  ;;  %v403_v2 = vpop.f32.mrf.mxu0 }
 0x215   :  { %v410_v4 = vadd.f32 %v1040_v61, %v408_v63 }
 0x217   :  { %v1041_v5 = vmul.f32 -1.442695, %v410_v4 }
 0x219   :  { %1092 = vpow2.f32 %v1041_v5  ;;  %v377_v8 = vpop.f32.mrf.mxu2  ;;  %v390_v12 = vpop.f32.mrf.mxu3 }
 0x21f   :  { %v1093_v13 = vpop.eup %1092 }
 0x220   :  { %v414_v15 = vadd.f32 1.0, %v1093_v13 }
 0x222   :  { %1094 = vrcp.f32 %v414_v15  ;;  %v426_v21 = vand.u32 2147483648, %v414_v15  ;;  %v424_v24 = vand.u32 2147483647, %v414_v15  ;;  %vm420_vm10 = vweird.f32 %v414_v15 }
 0x224   :  { %v427_v26 = vor.u32 1.1754944e-38, %v426_v21  ;;  %vm425_vm12 = vcmp.eq.f32.partialorder %v424_v24, 8.507059e+37 }
 0x228   :  { %v1095_v16 = vpop.eup %1094 }
 0x229   :  { %v416_v18 = vmul.f32 %v1095_v16, %v414_v15  ;;  %vm421_vm9 = vweird.f32 %v1095_v16 }
 0x22a   :  { %vm422_vm11 = vmor %vm420_vm10, %vm421_vm9 }
 0x22b   :  { %v417_v20 = vsub.f32 1.0, %v416_v18 }
 0x22d   :  { %v418_v23 = vmul.f32 %v1095_v16, %v417_v20 }
 0x22f   :  { %v419_v25 = vadd.f32 %v1095_v16, %v418_v23  ;;  %v519_v23 = vrot.slane %v1042_v51, 4 }
 0x231   :  { %v423_v30 = vsel %vm422_vm11, %v1095_v16, %v419_v25 }
 0x232   :  { %v428_v33 = vsel %vm425_vm12, %v427_v26, %v423_v30 }
 0x233   :  { %v431_v34 = vmul.f32 %v430_v29, %v428_v33  ;;  %v439_v41 = vrot.slane %v428_v33, 2 }
 0x235   :  { %v435_v35 = vadd.f32 %v433_v32, %v431_v34 }
 0x237   :  { %1096 = vtanh.f32 %v435_v35 }
 0x23d   :  { %v1097_v37 = vpop.eup %1096 }
 0x23e   :  { %v437_v40 = vsub.f32 %v1515_v53, %v1097_v37 }
 0x240   :  { %v441_v43 = vmul.f32 %v439_v41, %v437_v40 }
 0x242   :  { %v1549_v44 = vadd.f32 %v1097_v37, %v441_v43 }
 0x244   :  { %v451_v45 = vpack.c.bf16 %v1549_v44, %v1549_v44 }
 0x246   :  { %460 = vmatmul.bf16.vlgmr.msra.gmra.mxu1 %v451_v45  ;;  %473 = vmatmul.bf16.vlgmr.msra.gmra.mxu2 %v451_v45 }
 0x247   :  { %486 = vmatmul.bf16.vlgmr.msra.gmra.mxu3 %v451_v45  ;;  %650 = vmatpush.bf16.msra.mxu1 %v1252_v22 }
 0x248   :  { %710 = vmatpush.bf16.msra.mxu2 %v1195_v3  ;;  %723 = vmatpush.bf16.msra.mxu3 %v1206_v7 }
 0x24b   :  { %651 = vmatpush.bf16.msra.mxu1 %v1267_v27 }
 0x24c   :  { %711 = vmatpush.bf16.msra.mxu2 %v1215_v10  ;;  %724 = vmatpush.bf16.msra.mxu3 %v1219_v11 }
 0x24f   :  { %652 = vmatpush.bf16.msra.mxu1 %v1295_v36 }
 0x250   :  { %712 = vmatpush.bf16.msra.mxu2 %v1237_v17  ;;  %725 = vmatpush.bf16.msra.mxu3 %v1244_v19 }
 0x253   :  { %653 = vmatpush.bf16.msra.mxu1 %v1323_v46 }
 0x254   :  { %713 = vmatpush.bf16.msra.mxu2 %v1270_v28  ;;  %726 = vmatpush.bf16.msra.mxu3 %v1280_v31 }
 0x257   :  { %654 = vmatpush.bf16.msra.mxu1 %v1351_v55 }
 0x258   :  { %714 = vmatpush.bf16.msra.mxu2 %v1298_v38  ;;  %727 = vmatpush.bf16.msra.mxu3 %v1311_v42 }
 0x25b   :  { %655 = vmatpush.bf16.msra.mxu1 %v1379_v0 }
 0x25c   :  { %715 = vmatpush.bf16.msra.mxu2 %v1326_v47  ;;  %728 = vmatpush.bf16.msra.mxu3 %v1336_v50 }
 0x25f   :  { %656 = vmatpush.bf16.msra.mxu1 %v1399_v9 }
 0x260   :  { %716 = vmatpush.bf16.msra.mxu2 %v1354_v56  ;;  %729 = vmatpush.bf16.msra.mxu3 %v1364_v59 }
 0x263   :  { %657 = vmatpush.bf16.msra.mxu1 %v1414_v14 }
 0x264   :  { %717 = vmatpush.bf16.msra.mxu2 %v1382_v1  ;;  %730 = vmatpush.bf16.msra.mxu3 %v1394_v6 }
 0x2c3   :  { %v461_v48 = vpop.f32.mrf.mxu1 }
 0x2c9   :  { %v474_v49 = vpop.f32.mrf.mxu2 }
 0x2ca   :  { %v493_v52 = vrot.slane %v474_v49, 6  ;;  %v487_v53 = vpop.f32.mrf.mxu3 }
 0x2cb   :  { %v463_v54 = vpop.f32.mrf.mxu1  ;;  %v516_v21 = vadd.f32 %v1477_v39, %v487_v53 }
 0x2cc   :  { %v494_v57 = vsel %vm232_vm0, %v461_v48, %v493_v52 }
 0x2cd   :  { %v496_v58 = vadd.f32 %v1042_v51, %v494_v57 }
 0x2cf   :  { %v1043_v60 = vmul.f32 -1.442695, %v496_v58 }
 0x2d1   :  { %1098 = vpow2.f32 %v1043_v60  ;;  %v476_v61 = vpop.f32.mrf.mxu2 }
 0x2d2   :  { %v489_v62 = vpop.f32.mrf.mxu3 }
 0x2d7   :  { %v1099_v63 = vpop.eup %1098 }
 0x2d8   :  { %v500_v2 = vadd.f32 1.0, %v1099_v63 }
 0x2da   :  { %1100 = vrcp.f32 %v500_v2  ;;  %v512_v12 = vand.u32 2147483648, %v500_v2  ;;  %v510_v15 = vand.u32 2147483647, %v500_v2  ;;  %vm506_vm14 = vweird.f32 %v500_v2 }
 0x2dc   :  { %v513_v18 = vor.u32 1.1754944e-38, %v512_v12  ;;  %vm511_vm1 = vcmp.eq.f32.partialorder %v510_v15, 8.507059e+37 }
 0x2e0   :  { %v1101_v4 = vpop.eup %1100 }
 0x2e1   :  { %v502_v5 = vmul.f32 %v1101_v4, %v500_v2  ;;  %vm507_vm13 = vweird.f32 %v1101_v4 }
 0x2e2   :  { %vm508_vm15 = vmor %vm506_vm14, %vm507_vm13 }
 0x2e3   :  { %v503_v8 = vsub.f32 1.0, %v502_v5 }
 0x2e5   :  { %v504_v13 = vmul.f32 %v1101_v4, %v503_v8 }
 0x2e7   :  { %v505_v16 = vadd.f32 %v1101_v4, %v504_v13 }
 0x2e9   :  { %v509_v20 = vsel %vm508_vm15, %v1101_v4, %v505_v16 }
 0x2ea   :  { %v514_v24 = vsel %vm511_vm1, %v513_v18, %v509_v20 }
 0x2eb   :  { %v517_v25 = vmul.f32 %v516_v21, %v514_v24  ;;  %v525_v32 = vrot.slane %v514_v24, 2 }
 0x2ed   :  { %v521_v26 = vadd.f32 %v519_v23, %v517_v25 }
 0x2ef   :  { %1102 = vtanh.f32 %v521_v26 }
 0x2f5   :  { %v1103_v29 = vpop.eup %1102 }
 0x2f6   :  { %v523_v30 = vsub.f32 %v1549_v44, %v1103_v29 }
 0x2f8   :  { %v527_v33 = vmul.f32 %v525_v32, %v523_v30 }
 0x2fa   :  { %v1583_v34 = vadd.f32 %v1103_v29, %v527_v33 }
 0x2fc   :  { %v537_v35 = vpack.c.bf16 %v1583_v34, %v1583_v34 }
 0x2fe   :  { %546 = vmatmul.bf16.vlgmr.msrb.gmra.mxu0 %v537_v35  ;;  %559 = vmatmul.bf16.vlgmr.msrb.gmra.mxu1 %v537_v35 }
 0x2ff   :  { %572 = vmatmul.bf16.vlgmr.msrb.gmra.mxu2 %v537_v35  ;;  %736 = vmatpush.bf16.msrb.mxu0 %v1252_v22 }
 0x300   :  { %796 = vmatpush.bf16.msrb.mxu1 %v1195_v3  ;;  %809 = vmatpush.bf16.msrb.mxu2 %v1206_v7 }
 0x303   :  { %737 = vmatpush.bf16.msrb.mxu0 %v1267_v27 }
 0x304   :  { %797 = vmatpush.bf16.msrb.mxu1 %v1215_v10  ;;  %810 = vmatpush.bf16.msrb.mxu2 %v1219_v11  ;;  %v1044_v10 = vld [vmem:[%s1699_s0 + $0x18] sm:$0x3f] }
 0x305   :  { %v605_v49 = vrot.slane %v1044_v10, 4 }
 0x307   :  { %738 = vmatpush.bf16.msrb.mxu0 %v1295_v36 }
 0x308   :  { %798 = vmatpush.bf16.msrb.mxu1 %v1237_v17  ;;  %811 = vmatpush.bf16.msrb.mxu2 %v1244_v19 }
 0x30b   :  { %739 = vmatpush.bf16.msrb.mxu0 %v1323_v46 }
 0x30c   :  { %799 = vmatpush.bf16.msrb.mxu1 %v1270_v28  ;;  %812 = vmatpush.bf16.msrb.mxu2 %v1280_v31 }
 0x30f   :  { %740 = vmatpush.bf16.msrb.mxu0 %v1351_v55 }
 0x310   :  { %800 = vmatpush.bf16.msrb.mxu1 %v1298_v38  ;;  %813 = vmatpush.bf16.msrb.mxu2 %v1311_v42 }
 0x313   :  { %741 = vmatpush.bf16.msrb.mxu0 %v1379_v0 }
 0x314   :  { %801 = vmatpush.bf16.msrb.mxu1 %v1326_v47  ;;  %814 = vmatpush.bf16.msrb.mxu2 %v1336_v50 }
 0x317   :  { %742 = vmatpush.bf16.msrb.mxu0 %v1399_v9 }
 0x318   :  { %802 = vmatpush.bf16.msrb.mxu1 %v1354_v56  ;;  %815 = vmatpush.bf16.msrb.mxu2 %v1364_v59 }
 0x31b   :  { %743 = vmatpush.bf16.msrb.mxu0 %v1414_v14 }
 0x31c   :  { %803 = vmatpush.bf16.msrb.mxu1 %v1382_v1  ;;  %816 = vmatpush.bf16.msrb.mxu2 %v1394_v6 }
 0x37b   :  { %v547_v3 = vpop.f32.mrf.mxu0  ;;  %v560_v7 = vpop.f32.mrf.mxu1 }
 0x37c   :  { %v579_v11 = vrot.slane %v560_v7, 6 }
 0x37e   :  { %v580_v17 = vsel %vm232_vm0, %v547_v3, %v579_v11 }
 0x37f   :  { %v582_v19 = vadd.f32 %v1044_v10, %v580_v17 }
 0x381   :  { %v1045_v28 = vmul.f32 -1.442695, %v582_v19 }
 0x382   :  { %v573_v31 = vpop.f32.mrf.mxu2 }
 0x383   :  { %1104 = vpow2.f32 %v1045_v28  ;;  %v549_v38 = vpop.f32.mrf.mxu0  ;;  %v562_v42 = vpop.f32.mrf.mxu1  ;;  %v602_v48 = vadd.f32 %v1477_v39, %v573_v31  ;;  %v1048_v28 = vld [vmem:[%s1699_s0 + $0x24] sm:$0x3f] }
 0x389   :  { %v1105_v47 = vpop.eup %1104 }
 0x38a   :  { %v586_v50 = vadd.f32 1.0, %v1105_v47  ;;  %v575_v56 = vpop.f32.mrf.mxu2 }
 0x38c   :  { %1106 = vrcp.f32 %v586_v50  ;;  %v598_v37 = vand.u32 2147483648, %v586_v50  ;;  %v596_v41 = vand.u32 2147483647, %v586_v50  ;;  %vm592_vm3 = vweird.f32 %v586_v50 }
 0x38e   :  { %v599_v44 = vor.u32 1.1754944e-38, %v598_v37  ;;  %vm597_vm5 = vcmp.eq.f32.partialorder %v596_v41, 8.507059e+37 }
 0x392   :  { %v1107_v59 = vpop.eup %1106 }
 0x393   :  { %v588_v1 = vmul.f32 %v1107_v59, %v586_v50  ;;  %vm593_vm2 = vweird.f32 %v1107_v59 }
 0x394   :  { %vm594_vm4 = vmor %vm592_vm3, %vm593_vm2  ;;  %vm923_vm2 = vcmask 17408  }
 0x395   :  { %v589_v6 = vsub.f32 1.0, %v588_v1 }
 0x397   :  { %v590_v40 = vmul.f32 %v1107_v59, %v589_v6 }
 0x399   :  { %v591_v43 = vadd.f32 %v1107_v59, %v590_v40 }
 0x39b   :  { %v595_v45 = vsel %vm594_vm4, %v1107_v59, %v591_v43 }
 0x39c   :  { %v600_v51 = vsel %vm597_vm5, %v599_v44, %v595_v45 }
 0x39d   :  { %v603_v52 = vmul.f32 %v602_v48, %v600_v51  ;;  %v611_v58 = vrot.slane %v600_v51, 2 }
 0x39f   :  { %v607_v53 = vadd.f32 %v605_v49, %v603_v52 }
 0x3a1   :  { %1108 = vtanh.f32 %v607_v53  ;;  %v777_v53 = vrot.slane %v1048_v28, 4 }
 0x3a7   :  { %v1109_v54 = vpop.eup %1108 }
 0x3a8   :  { %v609_v57 = vsub.f32 %v1583_v34, %v1109_v54 }
 0x3aa   :  { %v613_v60 = vmul.f32 %v611_v58, %v609_v57 }
 0x3ac   :  { %v614_v61 = vadd.f32 %v1109_v54, %v613_v60 }
 0x3ae   :  { %v623_v62 = vpack.c.bf16 %v614_v61, %v614_v61 }
 0x3b0   :  { %632 = vmatmul.bf16.vlgmr.msrb.gmra.mxu3 %v623_v62  ;;  %645 = vmatmul.bf16.vlgmr.msra.gmra.mxu0 %v623_v62 }
 0x3b1   :  { %658 = vmatmul.bf16.vlgmr.msra.gmra.mxu1 %v623_v62  ;;  %822 = vmatpush.bf16.msrb.mxu3 %v1252_v22  ;;  %v1046_v22 = vld [vmem:[%s1699_s0 + $0x1e] sm:$0x3f] }
 0x3b2   :  { %v691_v26 = vrot.slane %v1046_v22, 4 }
 0x3b5   :  { %823 = vmatpush.bf16.msrb.mxu3 %v1267_v27 }
 0x3b9   :  { %824 = vmatpush.bf16.msrb.mxu3 %v1295_v36 }
 0x3bd   :  { %825 = vmatpush.bf16.msrb.mxu3 %v1323_v46 }
 0x3c1   :  { %826 = vmatpush.bf16.msrb.mxu3 %v1351_v55 }
 0x3c5   :  { %827 = vmatpush.bf16.msrb.mxu3 %v1379_v0 }
 0x3c9   :  { %828 = vmatpush.bf16.msrb.mxu3 %v1399_v9 }
 0x3cd   :  { %829 = vmatpush.bf16.msrb.mxu3 %v1414_v14 }
 0x42d   :  { %v646_v63 = vpop.f32.mrf.mxu0 }
 0x42e   :  { %v659_v2 = vpop.f32.mrf.mxu1  ;;  %v665_v4 = vrot.slane %v646_v63, 6 }
 0x42f   :  { %v688_v24 = vadd.f32 %v1477_v39, %v659_v2 }
 0x433   :  { %v633_v27 = vpop.f32.mrf.mxu3 }
 0x434   :  { %v666_v36 = vsel %vm232_vm0, %v633_v27, %v665_v4  ;;  %v897_v27 = vld [vmem:[%s1702_s3 + $0x70] sm:$0xff] }
 0x435   :  { %v668_v5 = vadd.f32 %v1046_v22, %v666_v36  ;;  %v648_v46 = vpop.f32.mrf.mxu0  ;;  %v898_v22 = vld [vmem:[%s1702_s3 + $0x78] sm:$0xff]  ;;  %v896_v36 = vld [vmem:[%s1702_s3 + $0x68] sm:$0xff] }
 0x436   :  { %v661_v8 = vpop.f32.mrf.mxu1  ;;  %903 = vmatpush.msra.mxu0 %v898_v22  ;;  %v895_v46 = vld [vmem:[%s1702_s3 + $0x60] sm:$0xff] }
 0x437   :  { %v1047_v55 = vmul.f32 -1.442695, %v668_v5  ;;  %v894_v8 = vld [vmem:[%s1702_s3 + $0x58] sm:$0xff] }
 0x438   :  { %904 = vmatpush.msra.mxu0 %v897_v27 }
 0x439   :  { %1110 = vpow2.f32 %v1047_v55  ;;  %v893_v55 = vld [vmem:[%s1702_s3 + $0x50] sm:$0xff] }
 0x43a   :  { %905 = vmatpush.msra.mxu0 %v896_v36 }
 0x43b   :  { %v635_v0 = vpop.f32.mrf.mxu3 }
 0x43c   :  { %906 = vmatpush.msra.mxu0 %v895_v46 }
 0x43e   :  { %907 = vmatpush.msra.mxu0 %v894_v8 }
 0x43f   :  { %v1111_v12 = vpop.eup %1110 }
 0x440   :  { %v672_v9 = vadd.f32 1.0, %v1111_v12  ;;  %908 = vmatpush.msra.mxu0 %v893_v55  ;;  %v892_v12 = vld [vmem:[%s1702_s3 + $0x48] sm:$0xff] }
 0x442   :  { %1112 = vrcp.f32 %v672_v9  ;;  %v684_v16 = vand.u32 2147483648, %v672_v9  ;;  %v682_v20 = vand.u32 2147483647, %v672_v9  ;;  %vm678_vm7 = vweird.f32 %v672_v9  ;;  %909 = vmatpush.msra.mxu0 %v892_v12 }
 0x444   :  { %v685_v23 = vor.u32 1.1754944e-38, %v684_v16  ;;  %vm683_vm9 = vcmp.eq.f32.partialorder %v682_v20, 8.507059e+37  ;;  %v891_v16 = vld [vmem:[%s1702_s3 + $0x40] sm:$0xff] }
 0x445   :  { %910 = vmatpush.msra.mxu0 %v891_v16 }
 0x448   :  { %v1113_v14 = vpop.eup %1112 }
 0x449   :  { %v674_v13 = vmul.f32 %v1113_v14, %v672_v9  ;;  %vm679_vm6 = vweird.f32 %v1113_v14  ;;  %v1050_v9 = vld [vmem:[%s1699_s0 + $0x2a] sm:$0x3f] }
 0x44a   :  { %vm680_vm8 = vmor %vm678_vm7, %vm679_vm6 }
 0x44b   :  { %v675_v15 = vsub.f32 1.0, %v674_v13 }
 0x44d   :  { %v676_v18 = vmul.f32 %v1113_v14, %v675_v15 }
 0x44f   :  { %v677_v21 = vadd.f32 %v1113_v14, %v676_v18 }
 0x451   :  { %v681_v25 = vsel %vm680_vm8, %v1113_v14, %v677_v21  ;;  %v890_v21 = vld [vmem:[%s1702_s3 + $0x38] sm:$0xff] }
 0x452   :  { %v686_v29 = vsel %vm683_vm9, %v685_v23, %v681_v25  ;;  %911 = vmatpush.msra.mxu0 %v890_v21 }
 0x453   :  { %v689_v30 = vmul.f32 %v688_v24, %v686_v29  ;;  %v697_v34 = vrot.slane %v686_v29, 2  ;;  %v889_v24 = vld [vmem:[%s1702_s3 + $0x30] sm:$0xff] }
 0x454   :  { %912 = vmatpush.msra.mxu0 %v889_v24 }
 0x455   :  { %v693_v32 = vadd.f32 %v691_v26, %v689_v30  ;;  %v888_v26 = vld [vmem:[%s1702_s3 + $0x28] sm:$0xff]  ;;  %v887_v30 = vld [vmem:[%s1702_s3 + $0x20] sm:$0xff] }
 0x456   :  { %913 = vmatpush.msra.mxu0 %v888_v26 }
 0x457   :  { %1114 = vtanh.f32 %v693_v32  ;;  %v886_v32 = vld [vmem:[%s1702_s3 + $0x18] sm:$0xff] }
 0x458   :  { %914 = vmatpush.msra.mxu0 %v887_v30 }
 0x45a   :  { %915 = vmatpush.msra.mxu0 %v886_v32 }
 0x45d   :  { %v1115_v33 = vpop.eup %1114 }
 0x45e   :  { %v695_v35 = vsub.f32 %v614_v61, %v1115_v33 }
 0x460   :  { %v699_v3 = vmul.f32 %v697_v34, %v695_v35  ;;  %v885_v34 = vld [vmem:[%s1702_s3 + $0x10] sm:$0xff] }
 0x461   :  { %916 = vmatpush.msra.mxu0 %v885_v34 }
 0x462   :  { %v700_v7 = vadd.f32 %v1115_v33, %v699_v3  ;;  %v884_v3 = vld [vmem:[%s1702_s3 + $0x8] sm:$0xff] }
 0x463   :  { %917 = vmatpush.msra.mxu0 %v884_v3 }
 0x464   :  { %v709_v10 = vpack.c.bf16 %v700_v7, %v700_v7 }
 0x466   :  { %718 = vmatmul.bf16.vlgmr.msra.gmra.mxu2 %v709_v10  ;;  %731 = vmatmul.bf16.vlgmr.msra.gmra.mxu3 %v709_v10 }
 0x467   :  { %744 = vmatmul.bf16.vlgmr.msrb.gmra.mxu0 %v709_v10 }
 0x4e4   :  { %v745_v11 = vpop.f32.mrf.mxu0 }
 0x4e5   :  { %v774_v51 = vadd.f32 %v1477_v39, %v745_v11 }
 0x4e9   :  { %v719_v17 = vpop.f32.mrf.mxu2  ;;  %v732_v19 = vpop.f32.mrf.mxu3 }
 0x4ea   :  { %v751_v31 = vrot.slane %v732_v19, 6 }
 0x4ec   :  { %v752_v38 = vsel %vm232_vm0, %v719_v17, %v751_v31  ;;  %v747_v42 = vpop.f32.mrf.mxu0 }
 0x4ed   :  { %v754_v47 = vadd.f32 %v1048_v28, %v752_v38 }
 0x4ef   :  { %v1049_v50 = vmul.f32 -1.442695, %v754_v47 }
 0x4f1   :  { %1116 = vpow2.f32 %v1049_v50  ;;  %v721_v56 = vpop.f32.mrf.mxu2  ;;  %v734_v59 = vpop.f32.mrf.mxu3 }
 0x4f2   :  { %v863_v56 = vrot.slane %v1050_v9, 4 }
 0x4f7   :  { %v1117_v1 = vpop.eup %1116 }
 0x4f8   :  { %v758_v6 = vadd.f32 1.0, %v1117_v1 }
 0x4fa   :  { %1118 = vrcp.f32 %v758_v6  ;;  %v770_v43 = vand.u32 2147483648, %v758_v6  ;;  %v768_v45 = vand.u32 2147483647, %v758_v6  ;;  %vm764_vm11 = vweird.f32 %v758_v6 }
 0x4fc   :  { %v771_v49 = vor.u32 1.1754944e-38, %v770_v43  ;;  %vm769_vm13 = vcmp.eq.f32.partialorder %v768_v45, 8.507059e+37  ;;  %v1079_v45 = vld [vmem:[%s1703_s4] ss:$0 sm:$0xff] }
 0x500   :  { %v1119_v37 = vpop.eup %1118 }
 0x501   :  { %v760_v40 = vmul.f32 %v1119_v37, %v758_v6  ;;  %vm765_vm10 = vweird.f32 %v1119_v37 }
 0x502   :  { %vm766_vm12 = vmor %vm764_vm11, %vm765_vm10 }
 0x503   :  { %v761_v41 = vsub.f32 1.0, %v760_v40 }
 0x505   :  { %v762_v44 = vmul.f32 %v1119_v37, %v761_v41 }
 0x507   :  { %v763_v48 = vadd.f32 %v1119_v37, %v762_v44 }
 0x509   :  { %v767_v52 = vsel %vm766_vm12, %v1119_v37, %v763_v48 }
 0x50a   :  { %v772_v54 = vsel %vm769_vm13, %v771_v49, %v767_v52 }
 0x50b   :  { %v775_v57 = vmul.f32 %v774_v51, %v772_v54  ;;  %v783_v62 = vrot.slane %v772_v54, 2 }
 0x50d   :  { %v779_v58 = vadd.f32 %v777_v53, %v775_v57 }
 0x50f   :  { %1120 = vtanh.f32 %v779_v58 }
 0x515   :  { %v1121_v60 = vpop.eup %1120 }
 0x516   :  { %v781_v61 = vsub.f32 %v700_v7, %v1121_v60  ;;  %v883_v7 = vld [vmem:[%s1702_s3] sm:$0xff] }
 0x517   :  { %918 = vmatpush.msra.mxu0 %v883_v7 }
 0x518   :  { %v785_v63 = vmul.f32 %v783_v62, %v781_v61 }
 0x51a   :  { %v1635_v2 = vadd.f32 %v1121_v60, %v785_v63 }
 0x51c   :  { %v795_v4 = vpack.c.bf16 %v1635_v2, %v1635_v2 }
 0x51e   :  { %804 = vmatmul.bf16.vlgmr.msrb.gmra.mxu1 %v795_v4  ;;  %817 = vmatmul.bf16.vlgmr.msrb.gmra.mxu2 %v795_v4 }
 0x51f   :  { %830 = vmatmul.bf16.vlgmr.msrb.gmra.mxu3 %v795_v4 }
 0x59b   :  { %v805_v5 = vpop.f32.mrf.mxu1 }
 0x5a1   :  { %v818_v0 = vpop.f32.mrf.mxu2 }
 0x5a2   :  { %v837_v14 = vrot.slane %v818_v0, 6  ;;  %v831_v13 = vpop.f32.mrf.mxu3 }
 0x5a3   :  { %v807_v15 = vpop.f32.mrf.mxu1  ;;  %v860_v50 = vadd.f32 %v1477_v39, %v831_v13 }
 0x5a4   :  { %v838_v18 = vsel %vm232_vm0, %v805_v5, %v837_v14 }
 0x5a5   :  { %v840_v20 = vadd.f32 %v1050_v9, %v838_v18 }
 0x5a7   :  { %v1051_v23 = vmul.f32 -1.442695, %v840_v20 }
 0x5a9   :  { %1122 = vpow2.f32 %v1051_v23  ;;  %v820_v25 = vpop.f32.mrf.mxu2 }
 0x5aa   :  { %v833_v29 = vpop.f32.mrf.mxu3 }
 0x5af   :  { %v1123_v33 = vpop.eup %1122 }
 0x5b0   :  { %v844_v35 = vadd.f32 1.0, %v1123_v33 }
 0x5b2   :  { %1124 = vrcp.f32 %v844_v35  ;;  %v856_v19 = vand.u32 2147483648, %v844_v35  ;;  %v854_v31 = vand.u32 2147483647, %v844_v35  ;;  %vm850_vm14 = vweird.f32 %v844_v35 }
 0x5b4   :  { %v857_v42 = vor.u32 1.1754944e-38, %v856_v19  ;;  %vm855_vm1 = vcmp.eq.f32.partialorder %v854_v31, 8.507059e+37 }
 0x5b8   :  { %v1125_v10 = vpop.eup %1124 }
 0x5b9   :  { %v846_v11 = vmul.f32 %v1125_v10, %v844_v35  ;;  %vm851_vm0 = vweird.f32 %v1125_v10 }
 0x5ba   :  { %vm852_vm15 = vmor %vm850_vm14, %vm851_vm0 }
 0x5bb   :  { %v847_v17 = vsub.f32 1.0, %v846_v11 }
 0x5bd   :  { %v848_v28 = vmul.f32 %v1125_v10, %v847_v17 }
 0x5bf   :  { %v849_v38 = vadd.f32 %v1125_v10, %v848_v28 }
 0x5c1   :  { %v853_v47 = vsel %vm852_vm15, %v1125_v10, %v849_v38 }
 0x5c2   :  { %v858_v59 = vsel %vm855_vm1, %v857_v42, %v853_v47 }
 0x5c3   :  { %v861_v1 = vmul.f32 %v860_v50, %v858_v59  ;;  %v869_v41 = vrot.slane %v858_v59, 2 }
 0x5c5   :  { %v865_v6 = vadd.f32 %v863_v56, %v861_v1 }
 0x5c7   :  { %1126 = vtanh.f32 %v865_v6 }
 0x5cd   :  { %v1127_v37 = vpop.eup %1126 }
 0x5ce   :  { %v867_v40 = vsub.f32 %v1635_v2, %v1127_v37 }
 0x5d0   :  { %v871_v43 = vmul.f32 %v869_v41, %v867_v40 }
 0x5d2   :  { %v872_v44 = vadd.f32 %v1127_v37, %v871_v43 }
 0x5d4   :  { %879 = vst [vmem:[#allocation2] sm:$0x3] %v872_v44  ;;  %919 = vmatmul.f32.vlgmr.msra.gmra.mxu0 %v872_v44 }
 0x651   :  { %v920_v39 = vpop.f32.mrf.mxu0 }
 0x652   :  { %v921_v48 = vadd.f32 %v1079_v45, %v920_v39 }
 0x654   :  { %924 = vst.msk [vmem:[#allocation3] sm:$0x3] %vm923_vm2, %v921_v48 }
 0x655   :  { %935 = dma.vmem_to_hbm [thread:$0]  %s931_s11, 32, %s933_s1, [#allocation4]  }
 0x656   :  { %1152 = dma.done.wait [#allocation4], 32  }
 0x657   :  { %1153 = vsyncadd [#allocation4], 4294967264 }
 0x658   :  { %940 = vsyncpa [#allocation4], 1 }

// kernel: gru_forward.4
= control target key start
LH: loop header
LB: loop body
LE: loop exit
PB: predicated region body
PF: predicated region fallthrough
CT: control target
= control target key end

     0   :  { %v1757_v36 = vmov 0.0   ;;  %vm264_vm0 = vcmask 1041408   ;;  %vm490_vm5 = vcmask 1043456   ;;  %s2723_s1 = inlined_call_operand.vmem [shape: bf16[128,384], index: 1, kind: input, shape index: {}]   ;;  %s2724_s2 = inlined_call_operand.vmem [shape: f32[1,128], index: 2, kind: input, shape index: {}]   ;;  %s2725_s3 = inlined_call_operand.vmem [shape: bf16[128,384], index: 3, kind: input, shape index: {}]   ;;  %s2726_s0 = inlined_call_operand.vmem [shape: f32[8,2,384], index: 0, kind: input, shape index: {}]   ;;  %s2727_s4 = inlined_call_operand.vmem [shape: f32[1,384], index: 4, kind: input, shape index: {}]   ;;  %s2728_s5 = inlined_call_operand.vmem [shape: f32[8,2,384], index: 5, kind: output, shape index: {}]  }
   0x1   :  { %v1530_v0 = vld [vmem:[%s2723_s1 + $0xa8] sm:$0xf]  ;;  %v1680_v1 = vld [vmem:[%s2723_s1 + $0xb0] sm:$0xf0]  ;;  %v1679_v2 = vld [vmem:[%s2723_s1 + $0xac] sm:$0xf] }
   0x2   :  { %v1797_v3 = vor.u32 %v1680_v1, %v1530_v0  ;;  %v1532_v4 = vld [vmem:[%s2723_s1 + $0xb4] sm:$0xf0]  ;;  %v1518_v5 = vld [vmem:[%s2723_s1 + $0x90] sm:$0xf]  ;;  %v1677_v6 = vld [vmem:[%s2723_s1 + $0x98] sm:$0xf0] }
   0x3   :  { %v1808_v7 = vor.u32 %v1679_v2, %v1532_v4  ;;  %v1676_v8 = vld [vmem:[%s2723_s1 + $0x94] sm:$0xf]  ;;  %v1520_v9 = vld [vmem:[%s2723_s1 + $0x9c] sm:$0xf0]  ;;  %v1817_v10 = vor.u32 %v1677_v6, %v1518_v5  ;;  %v1506_v12 = vld [vmem:[%s2723_s1 + $0x78] sm:$0xf] }
   0x4   :  { %222 = vmatpush.bf16.msra.mxu0 %v1797_v3  ;;  %v1820_v11 = vor.u32 %v1676_v8, %v1520_v9  ;;  %v1674_v13 = vld [vmem:[%s2723_s1 + $0x80] sm:$0xf0]  ;;  %v1673_v14 = vld [vmem:[%s2723_s1 + $0x7c] sm:$0xf]  ;;  %v1508_v15 = vld [vmem:[%s2723_s1 + $0x84] sm:$0xf0] }
   0x5   :  { %235 = vmatpush.bf16.msra.mxu1 %v1808_v7  ;;  %v1538_v16 = vld [vmem:[%s2723_s1 + $0xb0] sm:$0xf]  ;;  %v1838_v17 = vor.u32 %v1674_v13, %v1506_v12  ;;  %v1681_v18 = vld [vmem:[%s2723_s1 + $0xb8] sm:$0xf0]  ;;  %v1844_v19 = vor.u32 %v1673_v14, %v1508_v15  ;;  %v1494_v20 = vld [vmem:[%s2723_s1 + $0x60] sm:$0xf] }
   0x6   :  { %v1671_v21 = vld [vmem:[%s2723_s1 + $0x68] sm:$0xf0]  ;;  %v1852_v22 = vor.u32 %v1681_v18, %v1538_v16  ;;  %v1526_v23 = vld [vmem:[%s2723_s1 + $0x98] sm:$0xf]  ;;  %v1670_v24 = vld [vmem:[%s2723_s1 + $0x64] sm:$0xf] }
   0x7   :  { %v1496_v25 = vld [vmem:[%s2723_s1 + $0x6c] sm:$0xf0]  ;;  %v1678_v26 = vld [vmem:[%s2723_s1 + $0xa0] sm:$0xf0]  ;;  %v1870_v28 = vor.u32 %v1671_v21, %v1494_v20  ;;  %v1514_v29 = vld [vmem:[%s2723_s1 + $0x80] sm:$0xf] }
   0x8   :  { %223 = vmatpush.bf16.msra.mxu0 %v1817_v10  ;;  %248 = vmatpush.bf16.msra.mxu2 %v1852_v22  ;;  %v1867_v27 = vor.u32 %v1678_v26, %v1526_v23  ;;  %v1675_v30 = vld [vmem:[%s2723_s1 + $0x88] sm:$0xf0]  ;;  %v1879_v31 = vor.u32 %v1670_v24, %v1496_v25  ;;  %v1482_v32 = vld [vmem:[%s2723_s1 + $0x48] sm:$0xf]  ;;  %v1668_v33 = vld [vmem:[%s2723_s1 + $0x50] sm:$0xf0] }
   0x9   :  { %236 = vmatpush.bf16.msra.mxu1 %v1820_v11  ;;  %v1667_v34 = vld [vmem:[%s2723_s1 + $0x4c] sm:$0xf]  ;;  %v1484_v35 = vld [vmem:[%s2723_s1 + $0x54] sm:$0xf0]  ;;  %24 = vst [vmem:[#allocation2] sm:$0x3] %v1757_v36  ;;  %v1894_v37 = vor.u32 %v1675_v30, %v1514_v29  ;;  %v1897_v38 = vor.u32 %v1668_v33, %v1482_v32 }
   0xa   :  { %v1502_v39 = vld [vmem:[%s2723_s1 + $0x68] sm:$0xf]  ;;  %v1672_v40 = vld [vmem:[%s2723_s1 + $0x70] sm:$0xf0]  ;;  %v1906_v41 = vor.u32 %v1667_v34, %v1484_v35  ;;  %v1470_v42 = vld [vmem:[%s2723_s1 + $0x30] sm:$0xf] }
   0xb   :  { %v1665_v43 = vld [vmem:[%s2723_s1 + $0x38] sm:$0xf0]  ;;  %v1664_v44 = vld [vmem:[%s2723_s1 + $0x34] sm:$0xf]  ;;  %v1472_v45 = vld [vmem:[%s2723_s1 + $0x3c] sm:$0xf0]  ;;  %v1921_v46 = vor.u32 %v1672_v40, %v1502_v39 }
   0xc   :  { %224 = vmatpush.bf16.msra.mxu0 %v1838_v17  ;;  %249 = vmatpush.bf16.msra.mxu2 %v1867_v27  ;;  %v1924_v47 = vor.u32 %v1665_v43, %v1470_v42  ;;  %v1490_v48 = vld [vmem:[%s2723_s1 + $0x50] sm:$0xf]  ;;  %v1669_v49 = vld [vmem:[%s2723_s1 + $0x58] sm:$0xf0]  ;;  %v1933_v50 = vor.u32 %v1664_v44, %v1472_v45  ;;  %v1458_v51 = vld [vmem:[%s2723_s1 + $0x18] sm:$0xf] }
   0xd   :  { %237 = vmatpush.bf16.msra.mxu1 %v1844_v19  ;;  %v1662_v52 = vld [vmem:[%s2723_s1 + $0x20] sm:$0xf0]  ;;  %v1661_v53 = vld [vmem:[%s2723_s1 + $0x1c] sm:$0xf]  ;;  %v1460_v54 = vld [vmem:[%s2723_s1 + $0x24] sm:$0xf0]  ;;  %v1948_v55 = vor.u32 %v1669_v49, %v1490_v48 }
   0xe   :  { %v1951_v56 = vor.u32 %v1662_v52, %v1458_v51  ;;  %v1478_v57 = vld [vmem:[%s2723_s1 + $0x38] sm:$0xf]  ;;  %v1666_v58 = vld [vmem:[%s2723_s1 + $0x40] sm:$0xf0]  ;;  %v1960_v59 = vor.u32 %v1661_v53, %v1460_v54  ;;  %v1446_v60 = vld [vmem:[%s2723_s1] sm:$0xf] }
   0xf   :  { %v1659_v61 = vld [vmem:[%s2723_s1 + $0x8] sm:$0xf0]  ;;  %v1658_v62 = vld [vmem:[%s2723_s1 + $0x4] sm:$0xf]  ;;  %v1448_v63 = vld [vmem:[%s2723_s1 + $0xc] sm:$0xf0]  ;;  %v1975_v0 = vor.u32 %v1666_v58, %v1478_v57 }
  0x10   :  { %225 = vmatpush.bf16.msra.mxu0 %v1870_v28  ;;  %250 = vmatpush.bf16.msra.mxu2 %v1894_v37  ;;  %v1978_v1 = vor.u32 %v1659_v61, %v1446_v60  ;;  %v1980_v2 = vld [vmem:[#allocation2] sm:$0x3]  ;;  %v1663_v5 = vld [vmem:[%s2723_s1 + $0x28] sm:$0xf0]  ;;  %v1989_v6 = vor.u32 %v1658_v62, %v1448_v63  ;;  %v1454_v12 = vld [vmem:[%s2723_s1 + $0x8] sm:$0xf] }
  0x11   :  { %238 = vmatpush.bf16.msra.mxu1 %v1879_v31  ;;  %v1466_v4 = vld [vmem:[%s2723_s1 + $0x20] sm:$0xf]  ;;  %v93_v8 = vpack.c.bf16 %v1980_v2, %v1980_v2  ;;  %v1660_v13 = vld [vmem:[%s2723_s1 + $0x10] sm:$0xf0]  ;;  %v1627_v15 = vld [vmem:[%s2725_s3 + $0xa8] sm:$0xf] }
  0x12   :  { %v1994_v9 = vor.u32 %v1663_v5, %v1466_v4  ;;  %v2005_v14 = vor.u32 %v1660_v13, %v1454_v12  ;;  %v1704_v16 = vld [vmem:[%s2725_s3 + $0xb0] sm:$0xf0]  ;;  %v1703_v18 = vld [vmem:[%s2725_s3 + $0xac] sm:$0xf]  ;;  %v1629_v21 = vld [vmem:[%s2725_s3 + $0xb4] sm:$0xf0] }
  0x13   :  { %v2025_v20 = vor.u32 %v1704_v16, %v1627_v15  ;;  %v2030_v23 = vor.u32 %v1703_v18, %v1629_v21  ;;  %v1615_v24 = vld [vmem:[%s2725_s3 + $0x90] sm:$0xf]  ;;  %v1701_v25 = vld [vmem:[%s2725_s3 + $0x98] sm:$0xf0]  ;;  %v1700_v26 = vld [vmem:[%s2725_s3 + $0x94] sm:$0xf] }
  0x14   :  { %226 = vmatpush.bf16.msra.mxu0 %v1897_v38  ;;  %251 = vmatpush.bf16.msra.mxu2 %v1921_v46  ;;  %v2044_v29 = vor.u32 %v1701_v25, %v1615_v24  ;;  %v1617_v30 = vld [vmem:[%s2725_s3 + $0x9c] sm:$0xf0]  ;;  %v1603_v33 = vld [vmem:[%s2725_s3 + $0x78] sm:$0xf]  ;;  %v1698_v34 = vld [vmem:[%s2725_s3 + $0x80] sm:$0xf0] }
  0x15   :  { %239 = vmatpush.bf16.msra.mxu1 %v1906_v41  ;;  %445 = vmatpush.bf16.msra.mxu3 %v2025_v20  ;;  %v2049_v32 = vor.u32 %v1700_v26, %v1617_v30  ;;  %v1697_v35 = vld [vmem:[%s2725_s3 + $0x7c] sm:$0xf]  ;;  %v2063_v36 = vor.u32 %v1698_v34, %v1603_v33  ;;  %v1605_v39 = vld [vmem:[%s2725_s3 + $0x84] sm:$0xf0]  ;;  %v1591_v42 = vld [vmem:[%s2725_s3 + $0x60] sm:$0xf] }
  0x16   :  { %v2068_v40 = vor.u32 %v1697_v35, %v1605_v39  ;;  %v1695_v43 = vld [vmem:[%s2725_s3 + $0x68] sm:$0xf0]  ;;  %v1694_v44 = vld [vmem:[%s2725_s3 + $0x64] sm:$0xf]  ;;  %v1593_v48 = vld [vmem:[%s2725_s3 + $0x6c] sm:$0xf0] }
  0x17   :  { %v2081_v45 = vor.u32 %v1695_v43, %v1591_v42  ;;  %v1635_v49 = vld [vmem:[%s2725_s3 + $0xb0] sm:$0xf]  ;;  %v1705_v51 = vld [vmem:[%s2725_s3 + $0xb8] sm:$0xf0]  ;;  %v2093_v52 = vor.u32 %v1694_v44, %v1593_v48  ;;  %v1579_v54 = vld [vmem:[%s2725_s3 + $0x48] sm:$0xf] }
  0x18   :  { %227 = vmatpush.bf16.msra.mxu0 %v1924_v47  ;;  %252 = vmatpush.bf16.msra.mxu2 %v1948_v55  ;;  %v2095_v53 = vor.u32 %v1705_v51, %v1635_v49  ;;  %v1692_v57 = vld [vmem:[%s2725_s3 + $0x50] sm:$0xf0]  ;;  %v1691_v58 = vld [vmem:[%s2725_s3 + $0x4c] sm:$0xf]  ;;  %v1581_v61 = vld [vmem:[%s2725_s3 + $0x54] sm:$0xf0] }
  0x19   :  { %240 = vmatpush.bf16.msra.mxu1 %v1933_v50  ;;  %446 = vmatpush.bf16.msra.mxu3 %v2044_v29  ;;  %v2110_v60 = vor.u32 %v1692_v57, %v1579_v54  ;;  %v1623_v62 = vld [vmem:[%s2725_s3 + $0x98] sm:$0xf]  ;;  %v1702_v63 = vld [vmem:[%s2725_s3 + $0xa0] sm:$0xf0]  ;;  %v2121_v4 = vor.u32 %v1691_v58, %v1581_v61  ;;  %v1689_v12 = vld [vmem:[%s2725_s3 + $0x38] sm:$0xf0] }
  0x1a   :  { %v2123_v5 = vor.u32 %v1702_v63, %v1623_v62  ;;  %v1688_v13 = vld [vmem:[%s2725_s3 + $0x34] sm:$0xf]  ;;  %v1569_v16 = vld [vmem:[%s2725_s3 + $0x3c] sm:$0xf0]  ;;  %v1699_v21 = vld [vmem:[%s2725_s3 + $0x88] sm:$0xf0] }
  0x1b   :  { %v1611_v18 = vld [vmem:[%s2725_s3 + $0x80] sm:$0xf]  ;;  %v2149_v24 = vor.u32 %v1688_v13, %v1569_v16  ;;  %v1555_v26 = vld [vmem:[%s2725_s3 + $0x18] sm:$0xf]  ;;  %v1686_v30 = vld [vmem:[%s2725_s3 + $0x20] sm:$0xf0] }
  0x1c   :  { %228 = vmatpush.bf16.msra.mxu0 %v1951_v56  ;;  %253 = vmatpush.bf16.msra.mxu2 %v1975_v0  ;;  %v2151_v25 = vor.u32 %v1699_v21, %v1611_v18  ;;  %v2162_v34 = vor.u32 %v1686_v30, %v1555_v26  ;;  %v1685_v35 = vld [vmem:[%s2725_s3 + $0x1c] sm:$0xf]  ;;  %v1557_v39 = vld [vmem:[%s2725_s3 + $0x24] sm:$0xf0]  ;;  %v1696_v48 = vld [vmem:[%s2725_s3 + $0x70] sm:$0xf0] }
  0x1d   :  { %241 = vmatpush.bf16.msra.mxu1 %v1960_v59  ;;  %447 = vmatpush.bf16.msra.mxu3 %v2063_v36  ;;  %2748 = vst [vmem:[#allocation4_spill] sm:$0xff] %v2149_v24  ;;  %v1599_v42 = vld [vmem:[%s2725_s3 + $0x68] sm:$0xf]  ;;  %v2174_v44 = vor.u32 %v1685_v35, %v1557_v39  ;;  %v2182_v49 = vld [vmem:[%s2726_s0] sm:$0x3f] }
  0x1e   :  { %2749 = vst [vmem:[#allocation5_spill] sm:$0xff] %v2162_v34  ;;  %v2185_v54 = vor.u32 %v1696_v48, %v1599_v42  ;;  %v1543_v57 = vld [vmem:[%s2725_s3] sm:$0xf]  ;;  %v1683_v58 = vld [vmem:[%s2725_s3 + $0x8] sm:$0xf0] }
  0x1f   :  { %2750 = vst [vmem:[#allocation6_spill] sm:$0xff] %v2174_v44  ;;  %v2196_v62 = vor.u32 %v1683_v58, %v1543_v57  ;;  %v1682_v63 = vld [vmem:[%s2725_s3 + $0x4] sm:$0xf]  ;;  %v1693_v18 = vld [vmem:[%s2725_s3 + $0x58] sm:$0xf0] }
  0x20   :  { %229 = vmatpush.bf16.msra.mxu0 %v1978_v1  ;;  %254 = vmatpush.bf16.msra.mxu2 %v1994_v9  ;;  %v1690_v35 = vld [vmem:[%s2725_s3 + $0x40] sm:$0xf0]  ;;  %v1687_v48 = vld [vmem:[%s2725_s3 + $0x28] sm:$0xf0] }
  0x21   :  { %242 = vmatpush.bf16.msra.mxu1 %v1989_v6  ;;  %448 = vmatpush.bf16.msra.mxu3 %v2081_v45  ;;  %2751 = vst [vmem:[#allocation7_spill] sm:$0xff] %v2196_v62 }
  0x23   :  { %230 = vmatmul.bf16.vlgmr.msra.gmra.mxu0 %v93_v8 }
  0x24   :  { %243 = vmatmul.bf16.vlgmr.msra.gmra.mxu1 %v93_v8  ;;  %255 = vmatpush.bf16.msra.mxu2 %v2005_v14 }
  0x25   :  { %458 = vmatpush.bf16.msrb.mxu0 %v2030_v23  ;;  %471 = vmatpush.bf16.msrb.mxu1 %v2095_v53 }
  0x26   :  { %449 = vmatpush.bf16.msra.mxu3 %v2110_v60 }
  0x27   :  { %256 = vmatmul.bf16.vlgmr.msra.gmra.mxu2 %v93_v8  ;;  %v1567_v8 = vld [vmem:[%s2725_s3 + $0x30] sm:$0xf] }
  0x28   :  { %496 = vmatpush.bf16.msrb.mxu2 %v1797_v3  ;;  %v2137_v15 = vor.u32 %v1689_v12, %v1567_v8  ;;  %v1545_v8 = vld [vmem:[%s2725_s3 + $0xc] sm:$0xf0] }
  0x29   :  { %459 = vmatpush.bf16.msrb.mxu0 %v2049_v32  ;;  %472 = vmatpush.bf16.msrb.mxu1 %v2123_v5  ;;  %v1587_v12 = vld [vmem:[%s2725_s3 + $0x50] sm:$0xf]  ;;  %v2209_v16 = vor.u32 %v1682_v63, %v1545_v8  ;;  %v1551_v63 = vld [vmem:[%s2725_s3 + $0x8] sm:$0xf]  ;;  %v1684_v8 = vld [vmem:[%s2725_s3 + $0x10] sm:$0xf0] }
  0x2a   :  { %2747 = vst [vmem:[#allocation3_spill] sm:$0xff] %v2137_v15  ;;  %450 = vmatpush.bf16.msra.mxu3 %v2137_v15  ;;  %v2215_v21 = vor.u32 %v1693_v18, %v1587_v12  ;;  %v2250_v12 = vor.u32 %v1684_v8, %v1551_v63 }
  0x2b   :  { %2752 = vst [vmem:[#allocation8_spill] sm:$0xff] %v2209_v16 }
  0x2c   :  { %497 = vmatpush.bf16.msrb.mxu2 %v1817_v10 }
  0x2d   :  { %460 = vmatpush.bf16.msrb.mxu0 %v2068_v40  ;;  %473 = vmatpush.bf16.msrb.mxu1 %v2151_v25 }
  0x2e   :  { %451 = vmatpush.bf16.msra.mxu3 %v2162_v34 }
  0x30   :  { %498 = vmatpush.bf16.msrb.mxu2 %v1838_v17 }
  0x31   :  { %461 = vmatpush.bf16.msrb.mxu0 %v2093_v52  ;;  %474 = vmatpush.bf16.msrb.mxu1 %v2185_v54 }
  0x32   :  { %452 = vmatpush.bf16.msra.mxu3 %v2196_v62 }
  0x34   :  { %499 = vmatpush.bf16.msrb.mxu2 %v1870_v28 }
  0x35   :  { %462 = vmatpush.bf16.msrb.mxu0 %v2121_v4  ;;  %475 = vmatpush.bf16.msrb.mxu1 %v2215_v21 }
  0x36   :  { %509 = vmatpush.bf16.msrb.mxu3 %v1808_v7 }
  0x38   :  { %500 = vmatpush.bf16.msrb.mxu2 %v1897_v38 }
  0x39   :  { %463 = vmatpush.bf16.msrb.mxu0 %v2149_v24 }
  0x3a   :  { %510 = vmatpush.bf16.msrb.mxu3 %v1820_v11 }
  0x3c   :  { %501 = vmatpush.bf16.msrb.mxu2 %v1924_v47 }
  0x3d   :  { %464 = vmatpush.bf16.msrb.mxu0 %v2174_v44 }
  0x3e   :  { %511 = vmatpush.bf16.msrb.mxu3 %v1844_v19 }
  0x40   :  { %502 = vmatpush.bf16.msrb.mxu2 %v1951_v56 }
  0x41   :  { %465 = vmatpush.bf16.msrb.mxu0 %v2209_v16 }
  0x42   :  { %512 = vmatpush.bf16.msrb.mxu3 %v1879_v31 }
  0x44   :  { %503 = vmatpush.bf16.msrb.mxu2 %v1978_v1 }
  0x45   :  { %522 = vmatpush.bf16.msra.mxu0 %v1852_v22 }
  0x46   :  { %513 = vmatpush.bf16.msrb.mxu3 %v1906_v41 }
  0x48   :  { %593 = vmatpush.bf16.msra.mxu2 %v2030_v23 }
  0x49   :  { %523 = vmatpush.bf16.msra.mxu0 %v1867_v27 }
  0x4a   :  { %514 = vmatpush.bf16.msrb.mxu3 %v1933_v50 }
  0x4c   :  { %594 = vmatpush.bf16.msra.mxu2 %v2049_v32 }
  0x4d   :  { %524 = vmatpush.bf16.msra.mxu0 %v1894_v37 }
  0x4e   :  { %515 = vmatpush.bf16.msrb.mxu3 %v1960_v59 }
  0x50   :  { %595 = vmatpush.bf16.msra.mxu2 %v2068_v40 }
  0x51   :  { %525 = vmatpush.bf16.msra.mxu0 %v1921_v46 }
  0x52   :  { %516 = vmatpush.bf16.msrb.mxu3 %v1989_v6 }
  0x54   :  { %596 = vmatpush.bf16.msra.mxu2 %v2093_v52 }
  0x55   :  { %526 = vmatpush.bf16.msra.mxu0 %v1948_v55 }
  0x58   :  { %597 = vmatpush.bf16.msra.mxu2 %v2121_v4 }
  0x59   :  { %527 = vmatpush.bf16.msra.mxu0 %v1975_v0 }
  0x5c   :  { %598 = vmatpush.bf16.msra.mxu2 %v2149_v24 }
  0x5d   :  { %528 = vmatpush.bf16.msra.mxu0 %v1994_v9 }
  0x60   :  { %599 = vmatpush.bf16.msra.mxu2 %v2174_v44 }
  0x61   :  { %529 = vmatpush.bf16.msra.mxu0 %v2005_v14 }
  0x64   :  { %600 = vmatpush.bf16.msra.mxu2 %v2209_v16 }
  0xa0   :  { %v231_v33 = vpop.f32.mrf.mxu0 }
  0xa1   :  { %v244_v43 = vpop.f32.mrf.mxu1 }
  0xa2   :  { %v263_v51 = vrot.slane %v244_v43, 6  ;;  %v1563_v43 = vld [vmem:[%s2725_s3 + $0x20] sm:$0xf] }
  0xa3   :  { %v2239_v57 = vor.u32 %v1687_v48, %v1563_v43 }
  0xa4   :  { %v265_v61 = vsel %vm264_vm0, %v231_v33, %v263_v51  ;;  %v1575_v33 = vld [vmem:[%s2725_s3 + $0x38] sm:$0xf] }
  0xa5   :  { %v267_v13 = vadd.f32 %v265_v61, %v2182_v49  ;;  %v2227_v42 = vor.u32 %v1690_v35, %v1575_v33  ;;  %v2262_v33 = vld [vmem:[%s2724_s2] ss:$0 sm:$0xff] }
  0xa7   :  { %v1540_v26 = vmul.f32 -1.442695, %v267_v13  ;;  %476 = vmatpush.bf16.msrb.mxu1 %v2227_v42 }
  0xa8   :  { %v233_v30 = vpop.f32.mrf.mxu0 }
  0xa9   :  { %1708 = vpow2.f32 %v1540_v26  ;;  %v246_v39 = vpop.f32.mrf.mxu1 }
  0xaa   :  { %v257_v51 = vpop.f32.mrf.mxu2 }
  0xab   :  { %477 = vmatpush.bf16.msrb.mxu1 %v2239_v57 }
  0xaf   :  { %v1709_v58 = vpop.eup %1708  ;;  %478 = vmatpush.bf16.msrb.mxu1 %v2250_v12 }
  0xb0   :  { %v271_v61 = vadd.f32 1.0, %v1709_v58  ;;  %v290_v58 = vadd.f32 %v2262_v33, %v257_v51 }
  0xb2   :  { %1710 = vrcp.f32 %v271_v61  ;;  %v259_v13 = vpop.f32.mrf.mxu2  ;;  %v283_v35 = vand.u32 2147483648, %v271_v61  ;;  %v281_v43 = vand.u32 2147483647, %v271_v61  ;;  %vm277_vm2 = vweird.f32 %v271_v61 }
  0xb3   :  { %580 = vmatpush.bf16.msra.mxu1 %v2025_v20  ;;  %v293_v13 = vrot.slane %v2182_v49, 4 }
  0xb4   :  { %v284_v63 = vor.u32 1.1754944e-38, %v283_v35  ;;  %vm282_vm4 = vcmp.eq.f32.partialorder %v281_v43, 8.507059e+37 }
  0xb7   :  { %581 = vmatpush.bf16.msra.mxu1 %v2044_v29 }
  0xb8   :  { %v1711_v18 = vpop.eup %1710 }
  0xb9   :  { %v273_v26 = vmul.f32 %v1711_v18, %v271_v61  ;;  %vm278_vm1 = vweird.f32 %v1711_v18 }
  0xba   :  { %vm279_vm3 = vmor %vm277_vm2, %vm278_vm1 }
  0xbb   :  { %v274_v30 = vsub.f32 1.0, %v273_v26  ;;  %582 = vmatpush.bf16.msra.mxu1 %v2063_v36 }
  0xbd   :  { %v275_v39 = vmul.f32 %v1711_v18, %v274_v30 }
  0xbf   :  { %v276_v48 = vadd.f32 %v1711_v18, %v275_v39  ;;  %583 = vmatpush.bf16.msra.mxu1 %v2081_v45 }
  0xc1   :  { %v280_v8 = vsel %vm279_vm3, %v1711_v18, %v276_v48 }
  0xc2   :  { %v285_v26 = vsel %vm282_vm4, %v284_v63, %v280_v8 }
  0xc3   :  { %v291_v30 = vmul.f32 %v290_v58, %v285_v26  ;;  %584 = vmatpush.bf16.msra.mxu1 %v2110_v60  ;;  %v299_v49 = vrot.slane %v285_v26, 2 }
  0xc5   :  { %v295_v61 = vadd.f32 %v293_v13, %v291_v30 }
  0xc7   :  { %1712 = vtanh.f32 %v295_v61  ;;  %585 = vmatpush.bf16.msra.mxu1 %v2137_v15 }
  0xcb   :  { %586 = vmatpush.bf16.msra.mxu1 %v2162_v34 }
  0xcd   :  { %v1713_v51 = vpop.eup %1712 }
  0xce   :  { %v297_v18 = vsub.f32 %v1980_v2, %v1713_v51  ;;  %v91_v2 = vld [vmem:[%s2727_s4] sm:$0x7] }
  0xcf   :  { %587 = vmatpush.bf16.msra.mxu1 %v2196_v62  ;;  %v2334_v48 = vperm.slane %v91_v2, 1  ;;  %v2336_v63 = vperm.slane %v91_v2, 2  ;;  %v2339_v26 = vperm.slane %v91_v2, 0 }
  0xd0   :  { %v301_v35 = vmul.f32 %v299_v49, %v297_v18 }
  0xd1   :  { %2753 = vst [vmem:[#allocation9_spill] sm:$0xff] %v2334_v48 }
  0xd2   :  { %v2279_v39 = vadd.f32 %v1713_v51, %v301_v35  ;;  %2754 = vst [vmem:[#allocation10_spill] sm:$0xff] %v2336_v63 }
  0xd3   :  { %2755 = vst [vmem:[#allocation11_spill] sm:$0xff] %v2339_v26 }
  0xd4   :  { %v309_v43 = vpack.c.bf16 %v2279_v39, %v2279_v39 }
  0xd6   :  { %453 = vmatmul.bf16.vlgmr.msra.gmra.mxu3 %v309_v43  ;;  %466 = vmatmul.bf16.vlgmr.msrb.gmra.mxu0 %v309_v43 }
  0xd7   :  { %479 = vmatmul.bf16.vlgmr.msrb.gmra.mxu1 %v309_v43  ;;  %504 = vmatmul.bf16.vlgmr.msrb.gmra.mxu2 %v309_v43 }
  0xd8   :  { %606 = vmatpush.bf16.msra.mxu3 %v2095_v53  ;;  %631 = vmatpush.bf16.msrb.mxu0 %v1797_v3 }
  0xd9   :  { %644 = vmatpush.bf16.msrb.mxu1 %v1808_v7  ;;  %657 = vmatpush.bf16.msrb.mxu2 %v1852_v22 }
  0xdc   :  { %607 = vmatpush.bf16.msra.mxu3 %v2123_v5  ;;  %632 = vmatpush.bf16.msrb.mxu0 %v1817_v10 }
  0xdd   :  { %645 = vmatpush.bf16.msrb.mxu1 %v1820_v11  ;;  %658 = vmatpush.bf16.msrb.mxu2 %v1867_v27 }
  0xe0   :  { %608 = vmatpush.bf16.msra.mxu3 %v2151_v25  ;;  %633 = vmatpush.bf16.msrb.mxu0 %v1838_v17 }
  0xe1   :  { %646 = vmatpush.bf16.msrb.mxu1 %v1844_v19  ;;  %659 = vmatpush.bf16.msrb.mxu2 %v1894_v37 }
  0xe4   :  { %609 = vmatpush.bf16.msra.mxu3 %v2185_v54  ;;  %634 = vmatpush.bf16.msrb.mxu0 %v1870_v28 }
  0xe5   :  { %647 = vmatpush.bf16.msrb.mxu1 %v1879_v31  ;;  %660 = vmatpush.bf16.msrb.mxu2 %v1921_v46 }
  0xe6   :  { %517 = vmatmul.bf16.vlgmr.msrb.gmra.mxu3 %v309_v43  ;;  %530 = vmatmul.bf16.vlgmr.msra.gmra.mxu0 %v309_v43 }
  0xe8   :  { %610 = vmatpush.bf16.msra.mxu3 %v2215_v21  ;;  %635 = vmatpush.bf16.msrb.mxu0 %v1897_v38 }
  0xe9   :  { %648 = vmatpush.bf16.msrb.mxu1 %v1906_v41  ;;  %661 = vmatpush.bf16.msrb.mxu2 %v1948_v55 }
  0xec   :  { %611 = vmatpush.bf16.msra.mxu3 %v2227_v42  ;;  %636 = vmatpush.bf16.msrb.mxu0 %v1924_v47 }
  0xed   :  { %649 = vmatpush.bf16.msrb.mxu1 %v1933_v50  ;;  %662 = vmatpush.bf16.msrb.mxu2 %v1975_v0 }
  0xf0   :  { %612 = vmatpush.bf16.msra.mxu3 %v2239_v57  ;;  %637 = vmatpush.bf16.msrb.mxu0 %v1951_v56 }
  0xf1   :  { %650 = vmatpush.bf16.msrb.mxu1 %v1960_v59  ;;  %663 = vmatpush.bf16.msrb.mxu2 %v1994_v9 }
  0xf4   :  { %613 = vmatpush.bf16.msra.mxu3 %v2250_v12  ;;  %638 = vmatpush.bf16.msrb.mxu0 %v1978_v1 }
  0xf5   :  { %651 = vmatpush.bf16.msrb.mxu1 %v1989_v6  ;;  %664 = vmatpush.bf16.msrb.mxu2 %v2005_v14 }
  0xf8   :  { %715 = vmatpush.bf16.msrb.mxu3 %v2025_v20  ;;  %728 = vmatpush.bf16.msra.mxu0 %v2030_v23 }
  0xfc   :  { %716 = vmatpush.bf16.msrb.mxu3 %v2044_v29  ;;  %729 = vmatpush.bf16.msra.mxu0 %v2049_v32 }
 0x100   :  { %717 = vmatpush.bf16.msrb.mxu3 %v2063_v36  ;;  %730 = vmatpush.bf16.msra.mxu0 %v2068_v40 }
 0x104   :  { %718 = vmatpush.bf16.msrb.mxu3 %v2081_v45  ;;  %731 = vmatpush.bf16.msra.mxu0 %v2093_v52 }
 0x108   :  { %719 = vmatpush.bf16.msrb.mxu3 %v2110_v60  ;;  %732 = vmatpush.bf16.msra.mxu0 %v2121_v4 }
 0x10c   :  { %720 = vmatpush.bf16.msrb.mxu3 %v2137_v15  ;;  %733 = vmatpush.bf16.msra.mxu0 %v2149_v24 }
 0x110   :  { %721 = vmatpush.bf16.msrb.mxu3 %v2162_v34  ;;  %734 = vmatpush.bf16.msra.mxu0 %v2174_v44 }
 0x114   :  { %722 = vmatpush.bf16.msrb.mxu3 %v2196_v62  ;;  %735 = vmatpush.bf16.msra.mxu0 %v2209_v16 }
 0x153   :  { %v467_v58 = vpop.f32.mrf.mxu0 }
 0x154   :  { %v480_v8 = vpop.f32.mrf.mxu1  ;;  %v468_v13 = vadd.f32 %v467_v58, %v2334_v48 }
 0x155   :  { %v481_v30 = vadd.f32 %v480_v8, %v2336_v63 }
 0x156   :  { %v487_v51 = vrot.slane %v468_v13, 6  ;;  %v1637_v13 = vld [vmem:[%s2726_s0 + $0x6] sm:$0x3f] }
 0x157   :  { %v488_v35 = vrot.slane %v481_v30, 4 }
 0x159   :  { %v454_v61 = vpop.f32.mrf.mxu3 }
 0x15a   :  { %v455_v18 = vadd.f32 %v454_v61, %v2339_v26  ;;  %v505_v49 = vpop.f32.mrf.mxu2 }
 0x15b   :  { %v469_v43 = vpop.f32.mrf.mxu0 }
 0x15c   :  { %v489_v16 = vsel %vm264_vm0, %v455_v18, %v487_v51  ;;  %v482_v62 = vpop.f32.mrf.mxu1 }
 0x15d   :  { %v491_v44 = vsel %vm490_vm5, %v489_v16, %v488_v35 }
 0x15e   :  { %493 = vst [vmem:[%s2728_s5] sm:$0x3f] %v491_v44 }
 0x161   :  { %v456_v2 = vpop.f32.mrf.mxu3 }
 0x162   :  { %v507_v58 = vpop.f32.mrf.mxu2 }
 0x163   :  { %v531_v8 = vpop.f32.mrf.mxu0 }
 0x169   :  { %v518_v63 = vpop.f32.mrf.mxu3 }
 0x16a   :  { %v537_v61 = vrot.slane %v518_v63, 6 }
 0x16b   :  { %v533_v30 = vpop.f32.mrf.mxu0 }
 0x16c   :  { %v538_v43 = vsel %vm264_vm0, %v505_v49, %v537_v61  ;;  %v560_v49 = vadd.f32 %v2262_v33, %v531_v8  ;;  %v563_v30 = vrot.slane %v1637_v13, 4  ;;  %v2760_v8 = vld [vmem:[#allocation7_spill] sm:$0xff] }
 0x16d   :  { %v540_v51 = vadd.f32 %v1637_v13, %v538_v43  ;;  %v2761_v13 = vld [vmem:[#allocation8_spill] sm:$0xff] }
 0x16f   :  { %v1638_v62 = vmul.f32 -1.442695, %v540_v51 }
 0x171   :  { %1714 = vpow2.f32 %v1638_v62  ;;  %v520_v16 = vpop.f32.mrf.mxu3 }
 0x177   :  { %v1715_v18 = vpop.eup %1714 }
 0x178   :  { %v544_v35 = vadd.f32 1.0, %v1715_v18 }
 0x17a   :  { %1716 = vrcp.f32 %v544_v35  ;;  %v556_v26 = vand.u32 2147483648, %v544_v35  ;;  %v554_v34 = vand.u32 2147483647, %v544_v35  ;;  %vm550_vm7 = vweird.f32 %v544_v35 }
 0x17c   :  { %v557_v63 = vor.u32 1.1754944e-38, %v556_v26  ;;  %vm555_vm9 = vcmp.eq.f32.partialorder %v554_v34, 8.507059e+37  ;;  %v2757_v34 = vld [vmem:[#allocation4_spill] sm:$0xff]  ;;  %v2759_v26 = vld [vmem:[#allocation6_spill] sm:$0xff] }
 0x180   :  { %v1717_v44 = vpop.eup %1716 }
 0x181   :  { %v546_v2 = vmul.f32 %v1717_v44, %v544_v35  ;;  %vm551_vm6 = vweird.f32 %v1717_v44 }
 0x182   :  { %vm552_vm8 = vmor %vm550_vm7, %vm551_vm6 }
 0x183   :  { %v547_v58 = vsub.f32 1.0, %v546_v2 }
 0x185   :  { %v548_v48 = vmul.f32 %v1717_v44, %v547_v58 }
 0x187   :  { %v549_v24 = vadd.f32 %v1717_v44, %v548_v48 }
 0x189   :  { %v553_v61 = vsel %vm552_vm8, %v1717_v44, %v549_v24  ;;  %v2756_v24 = vld [vmem:[#allocation3_spill] sm:$0xff] }
 0x18a   :  { %v558_v43 = vsel %vm555_vm9, %v557_v63, %v553_v61 }
 0x18b   :  { %v561_v51 = vmul.f32 %v560_v49, %v558_v43  ;;  %v569_v2 = vrot.slane %v558_v43, 2  ;;  %v2762_v49 = vld [vmem:[#allocation9_spill] sm:$0xff]  ;;  %v2763_v43 = vld [vmem:[#allocation10_spill] sm:$0xff] }
 0x18d   :  { %v565_v62 = vadd.f32 %v563_v30, %v561_v51 }
 0x18f   :  { %1718 = vtanh.f32 %v565_v62 }
 0x195   :  { %v1719_v16 = vpop.eup %1718 }
 0x196   :  { %v567_v18 = vsub.f32 %v2279_v39, %v1719_v16  ;;  %v2758_v39 = vld [vmem:[#allocation5_spill] sm:$0xff] }
 0x198   :  { %v571_v58 = vmul.f32 %v569_v2, %v567_v18 }
 0x19a   :  { %v2354_v15 = vadd.f32 %v1719_v16, %v571_v58  ;;  %v2764_v16 = vld [vmem:[#allocation11_spill] sm:$0xff] }
 0x19c   :  { %v579_v48 = vpack.c.bf16 %v2354_v15, %v2354_v15 }
 0x19e   :  { %588 = vmatmul.bf16.vlgmr.msra.gmra.mxu1 %v579_v48  ;;  %601 = vmatmul.bf16.vlgmr.msra.gmra.mxu2 %v579_v48 }
 0x19f   :  { %614 = vmatmul.bf16.vlgmr.msra.gmra.mxu3 %v579_v48  ;;  %639 = vmatmul.bf16.vlgmr.msrb.gmra.mxu0 %v579_v48 }
 0x1a0   :  { %741 = vmatpush.bf16.msra.mxu1 %v2095_v53  ;;  %766 = vmatpush.bf16.msra.mxu2 %v1797_v3 }
 0x1a1   :  { %779 = vmatpush.bf16.msra.mxu3 %v1808_v7  ;;  %792 = vmatpush.bf16.msrb.mxu0 %v1852_v22 }
 0x1a4   :  { %742 = vmatpush.bf16.msra.mxu1 %v2123_v5  ;;  %767 = vmatpush.bf16.msra.mxu2 %v1817_v10 }
 0x1a5   :  { %780 = vmatpush.bf16.msra.mxu3 %v1820_v11  ;;  %793 = vmatpush.bf16.msrb.mxu0 %v1867_v27 }
 0x1a8   :  { %743 = vmatpush.bf16.msra.mxu1 %v2151_v25  ;;  %768 = vmatpush.bf16.msra.mxu2 %v1838_v17 }
 0x1a9   :  { %781 = vmatpush.bf16.msra.mxu3 %v1844_v19  ;;  %794 = vmatpush.bf16.msrb.mxu0 %v1894_v37 }
 0x1ac   :  { %744 = vmatpush.bf16.msra.mxu1 %v2185_v54  ;;  %769 = vmatpush.bf16.msra.mxu2 %v1870_v28 }
 0x1ad   :  { %782 = vmatpush.bf16.msra.mxu3 %v1879_v31  ;;  %795 = vmatpush.bf16.msrb.mxu0 %v1921_v46 }
 0x1ae   :  { %652 = vmatmul.bf16.vlgmr.msrb.gmra.mxu1 %v579_v48  ;;  %665 = vmatmul.bf16.vlgmr.msrb.gmra.mxu2 %v579_v48 }
 0x1b0   :  { %745 = vmatpush.bf16.msra.mxu1 %v2215_v21  ;;  %770 = vmatpush.bf16.msra.mxu2 %v1897_v38 }
 0x1b1   :  { %783 = vmatpush.bf16.msra.mxu3 %v1906_v41  ;;  %796 = vmatpush.bf16.msrb.mxu0 %v1948_v55 }
 0x1b4   :  { %746 = vmatpush.bf16.msra.mxu1 %v2227_v42  ;;  %771 = vmatpush.bf16.msra.mxu2 %v1924_v47 }
 0x1b5   :  { %784 = vmatpush.bf16.msra.mxu3 %v1933_v50  ;;  %797 = vmatpush.bf16.msrb.mxu0 %v1975_v0 }
 0x1b8   :  { %747 = vmatpush.bf16.msra.mxu1 %v2239_v57  ;;  %772 = vmatpush.bf16.msra.mxu2 %v1951_v56 }
 0x1b9   :  { %785 = vmatpush.bf16.msra.mxu3 %v1960_v59  ;;  %798 = vmatpush.bf16.msrb.mxu0 %v1994_v9 }
 0x1bc   :  { %748 = vmatpush.bf16.msra.mxu1 %v2250_v12  ;;  %773 = vmatpush.bf16.msra.mxu2 %v1978_v1 }
 0x1bd   :  { %786 = vmatpush.bf16.msra.mxu3 %v1989_v6  ;;  %799 = vmatpush.bf16.msrb.mxu0 %v2005_v14 }
 0x1c0   :  { %850 = vmatpush.bf16.msrb.mxu1 %v2025_v20  ;;  %863 = vmatpush.bf16.msrb.mxu2 %v2030_v23 }
 0x1c4   :  { %851 = vmatpush.bf16.msrb.mxu1 %v2044_v29  ;;  %864 = vmatpush.bf16.msrb.mxu2 %v2049_v32 }
 0x1c8   :  { %852 = vmatpush.bf16.msrb.mxu1 %v2063_v36  ;;  %865 = vmatpush.bf16.msrb.mxu2 %v2068_v40 }
 0x1cc   :  { %853 = vmatpush.bf16.msrb.mxu1 %v2081_v45  ;;  %866 = vmatpush.bf16.msrb.mxu2 %v2093_v52 }
 0x1d0   :  { %854 = vmatpush.bf16.msrb.mxu1 %v2110_v60  ;;  %867 = vmatpush.bf16.msrb.mxu2 %v2121_v4 }
 0x1d4   :  { %855 = vmatpush.bf16.msrb.mxu1 %v2756_v24  ;;  %868 = vmatpush.bf16.msrb.mxu2 %v2757_v34 }
 0x1d8   :  { %856 = vmatpush.bf16.msrb.mxu1 %v2758_v39  ;;  %869 = vmatpush.bf16.msrb.mxu2 %v2759_v26 }
 0x1dc   :  { %857 = vmatpush.bf16.msrb.mxu1 %v2760_v8  ;;  %870 = vmatpush.bf16.msrb.mxu2 %v2761_v13 }
 0x21b   :  { %v589_v35 = vpop.f32.mrf.mxu1 }
 0x21c   :  { %v640_v44 = vpop.f32.mrf.mxu0  ;;  %v590_v18 = vadd.f32 %v589_v35, %v2764_v16 }
 0x221   :  { %v602_v63 = vpop.f32.mrf.mxu2 }
 0x222   :  { %v603_v61 = vadd.f32 %v602_v63, %v2762_v49  ;;  %v615_v30 = vpop.f32.mrf.mxu3 }
 0x223   :  { %v616_v51 = vadd.f32 %v615_v30, %v2763_v43  ;;  %v591_v62 = vpop.f32.mrf.mxu1  ;;  %v1640_v30 = vld [vmem:[%s2726_s0 + $0xc] sm:$0x3f] }
 0x224   :  { %v622_v2 = vrot.slane %v603_v61, 6  ;;  %v642_v58 = vpop.f32.mrf.mxu0 }
 0x225   :  { %v623_v48 = vrot.slane %v616_v51, 4 }
 0x226   :  { %v624_v26 = vsel %vm264_vm0, %v590_v18, %v622_v2 }
 0x227   :  { %v625_v8 = vsel %vm490_vm5, %v624_v26, %v623_v48 }
 0x228   :  { %1639 = vst [vmem:[%s2728_s5 + $0x6] sm:$0x3f] %v625_v8 }
 0x229   :  { %v604_v13 = vpop.f32.mrf.mxu2 }
 0x22a   :  { %v617_v39 = vpop.f32.mrf.mxu3 }
 0x22b   :  { %v653_v63 = vpop.f32.mrf.mxu1 }
 0x22c   :  { %v672_v62 = vrot.slane %v653_v63, 6 }
 0x22e   :  { %v673_v35 = vsel %vm264_vm0, %v640_v44, %v672_v62 }
 0x22f   :  { %v675_v61 = vadd.f32 %v1640_v30, %v673_v35  ;;  %v698_v35 = vrot.slane %v1640_v30, 4  ;;  %v2769_v30 = vld [vmem:[#allocation7_spill] sm:$0xff] }
 0x231   :  { %v1641_v51 = vmul.f32 -1.442695, %v675_v61  ;;  %v666_v58 = vpop.f32.mrf.mxu2 }
 0x232   :  { %v695_v62 = vadd.f32 %v2262_v33, %v666_v58  ;;  %v2770_v58 = vld [vmem:[#allocation8_spill] sm:$0xff] }
 0x233   :  { %1720 = vpow2.f32 %v1641_v51  ;;  %v655_v18 = vpop.f32.mrf.mxu1 }
 0x239   :  { %v1721_v26 = vpop.eup %1720  ;;  %v668_v2 = vpop.f32.mrf.mxu2 }
 0x23a   :  { %v679_v48 = vadd.f32 1.0, %v1721_v26 }
 0x23c   :  { %1722 = vrcp.f32 %v679_v48  ;;  %v691_v16 = vand.u32 2147483648, %v679_v48  ;;  %v689_v49 = vand.u32 2147483647, %v679_v48  ;;  %vm685_vm11 = vweird.f32 %v679_v48 }
 0x23e   :  { %v692_v44 = vor.u32 1.1754944e-38, %v691_v16  ;;  %vm690_vm13 = vcmp.eq.f32.partialorder %v689_v49, 8.507059e+37  ;;  %v2767_v49 = vld [vmem:[#allocation5_spill] sm:$0xff]  ;;  %v2768_v16 = vld [vmem:[#allocation6_spill] sm:$0xff] }
 0x242   :  { %v1723_v8 = vpop.eup %1722 }
 0x243   :  { %v681_v13 = vmul.f32 %v1723_v8, %v679_v48  ;;  %vm686_vm10 = vweird.f32 %v1723_v8 }
 0x244   :  { %vm687_vm12 = vmor %vm685_vm11, %vm686_vm10 }
 0x245   :  { %v682_v39 = vsub.f32 1.0, %v681_v13 }
 0x247   :  { %v683_v43 = vmul.f32 %v1723_v8, %v682_v39 }
 0x249   :  { %v684_v34 = vadd.f32 %v1723_v8, %v683_v43 }
 0x24b   :  { %v688_v63 = vsel %vm687_vm12, %v1723_v8, %v684_v34  ;;  %v2766_v34 = vld [vmem:[#allocation4_spill] sm:$0xff] }
 0x24c   :  { %v693_v61 = vsel %vm690_vm13, %v692_v44, %v688_v63  ;;  %v2771_v44 = vld [vmem:[#allocation9_spill] sm:$0xff] }
 0x24d   :  { %v696_v51 = vmul.f32 %v695_v62, %v693_v61  ;;  %v704_v13 = vrot.slane %v693_v61, 2  ;;  %v2772_v62 = vld [vmem:[#allocation10_spill] sm:$0xff] }
 0x24f   :  { %v700_v18 = vadd.f32 %v698_v35, %v696_v51 }
 0x251   :  { %1724 = vtanh.f32 %v700_v18  ;;  %v2773_v18 = vld [vmem:[#allocation11_spill] sm:$0xff] }
 0x257   :  { %v1725_v26 = vpop.eup %1724 }
 0x258   :  { %v702_v2 = vsub.f32 %v2354_v15, %v1725_v26  ;;  %v2765_v15 = vld [vmem:[#allocation3_spill] sm:$0xff] }
 0x25a   :  { %v706_v39 = vmul.f32 %v704_v13, %v702_v2 }
 0x25c   :  { %v2420_v24 = vadd.f32 %v1725_v26, %v706_v39 }
 0x25e   :  { %v714_v43 = vpack.c.bf16 %v2420_v24, %v2420_v24 }
 0x260   :  { %723 = vmatmul.bf16.vlgmr.msrb.gmra.mxu3 %v714_v43  ;;  %736 = vmatmul.bf16.vlgmr.msra.gmra.mxu0 %v714_v43 }
 0x261   :  { %749 = vmatmul.bf16.vlgmr.msra.gmra.mxu1 %v714_v43  ;;  %774 = vmatmul.bf16.vlgmr.msra.gmra.mxu2 %v714_v43 }
 0x262   :  { %876 = vmatpush.bf16.msrb.mxu3 %v2095_v53  ;;  %901 = vmatpush.bf16.msra.mxu0 %v1797_v3 }
 0x263   :  { %914 = vmatpush.bf16.msra.mxu1 %v1808_v7  ;;  %927 = vmatpush.bf16.msra.mxu2 %v1852_v22 }
 0x266   :  { %877 = vmatpush.bf16.msrb.mxu3 %v2123_v5  ;;  %902 = vmatpush.bf16.msra.mxu0 %v1817_v10 }
 0x267   :  { %915 = vmatpush.bf16.msra.mxu1 %v1820_v11  ;;  %928 = vmatpush.bf16.msra.mxu2 %v1867_v27 }
 0x26a   :  { %878 = vmatpush.bf16.msrb.mxu3 %v2151_v25  ;;  %903 = vmatpush.bf16.msra.mxu0 %v1838_v17 }
 0x26b   :  { %916 = vmatpush.bf16.msra.mxu1 %v1844_v19  ;;  %929 = vmatpush.bf16.msra.mxu2 %v1894_v37 }
 0x26e   :  { %879 = vmatpush.bf16.msrb.mxu3 %v2185_v54  ;;  %904 = vmatpush.bf16.msra.mxu0 %v1870_v28 }
 0x26f   :  { %917 = vmatpush.bf16.msra.mxu1 %v1879_v31  ;;  %930 = vmatpush.bf16.msra.mxu2 %v1921_v46 }
 0x270   :  { %787 = vmatmul.bf16.vlgmr.msra.gmra.mxu3 %v714_v43  ;;  %800 = vmatmul.bf16.vlgmr.msrb.gmra.mxu0 %v714_v43 }
 0x272   :  { %880 = vmatpush.bf16.msrb.mxu3 %v2215_v21  ;;  %905 = vmatpush.bf16.msra.mxu0 %v1897_v38 }
 0x273   :  { %918 = vmatpush.bf16.msra.mxu1 %v1906_v41  ;;  %931 = vmatpush.bf16.msra.mxu2 %v1948_v55 }
 0x276   :  { %881 = vmatpush.bf16.msrb.mxu3 %v2227_v42  ;;  %906 = vmatpush.bf16.msra.mxu0 %v1924_v47 }
 0x277   :  { %919 = vmatpush.bf16.msra.mxu1 %v1933_v50  ;;  %932 = vmatpush.bf16.msra.mxu2 %v1975_v0 }
 0x27a   :  { %882 = vmatpush.bf16.msrb.mxu3 %v2239_v57  ;;  %907 = vmatpush.bf16.msra.mxu0 %v1951_v56 }
 0x27b   :  { %920 = vmatpush.bf16.msra.mxu1 %v1960_v59  ;;  %933 = vmatpush.bf16.msra.mxu2 %v1994_v9 }
 0x27e   :  { %883 = vmatpush.bf16.msrb.mxu3 %v2250_v12  ;;  %908 = vmatpush.bf16.msra.mxu0 %v1978_v1 }
 0x27f   :  { %921 = vmatpush.bf16.msra.mxu1 %v1989_v6  ;;  %934 = vmatpush.bf16.msra.mxu2 %v2005_v14 }
 0x282   :  { %985 = vmatpush.bf16.msra.mxu3 %v2025_v20  ;;  %998 = vmatpush.bf16.msrb.mxu0 %v2030_v23 }
 0x286   :  { %986 = vmatpush.bf16.msra.mxu3 %v2044_v29  ;;  %999 = vmatpush.bf16.msrb.mxu0 %v2049_v32 }
 0x28a   :  { %987 = vmatpush.bf16.msra.mxu3 %v2063_v36  ;;  %1000 = vmatpush.bf16.msrb.mxu0 %v2068_v40 }
 0x28e   :  { %988 = vmatpush.bf16.msra.mxu3 %v2081_v45  ;;  %1001 = vmatpush.bf16.msrb.mxu0 %v2093_v52 }
 0x292   :  { %989 = vmatpush.bf16.msra.mxu3 %v2110_v60  ;;  %1002 = vmatpush.bf16.msrb.mxu0 %v2121_v4 }
 0x296   :  { %990 = vmatpush.bf16.msra.mxu3 %v2765_v15  ;;  %1003 = vmatpush.bf16.msrb.mxu0 %v2766_v34 }
 0x29a   :  { %991 = vmatpush.bf16.msra.mxu3 %v2767_v49  ;;  %1004 = vmatpush.bf16.msrb.mxu0 %v2768_v16 }
 0x29e   :  { %992 = vmatpush.bf16.msra.mxu3 %v2769_v30  ;;  %1005 = vmatpush.bf16.msrb.mxu0 %v2770_v58 }
 0x2dd   :  { %v737_v48 = vpop.f32.mrf.mxu0 }
 0x2de   :  { %v750_v8 = vpop.f32.mrf.mxu1  ;;  %v738_v63 = vadd.f32 %v737_v48, %v2771_v44 }
 0x2df   :  { %v751_v35 = vadd.f32 %v750_v8, %v2772_v62 }
 0x2e0   :  { %v757_v51 = vrot.slane %v738_v63, 6  ;;  %v1643_v63 = vld [vmem:[%s2726_s0 + $0x12] sm:$0x3f] }
 0x2e1   :  { %v758_v13 = vrot.slane %v751_v35, 4 }
 0x2e3   :  { %v724_v61 = vpop.f32.mrf.mxu3 }
 0x2e4   :  { %v725_v26 = vadd.f32 %v724_v61, %v2773_v18  ;;  %v775_v2 = vpop.f32.mrf.mxu2 }
 0x2e5   :  { %v739_v39 = vpop.f32.mrf.mxu0 }
 0x2e6   :  { %v759_v43 = vsel %vm264_vm0, %v725_v26, %v757_v51  ;;  %v752_v16 = vpop.f32.mrf.mxu1 }
 0x2e7   :  { %v760_v30 = vsel %vm490_vm5, %v759_v43, %v758_v13 }
 0x2e8   :  { %1642 = vst [vmem:[%s2728_s5 + $0xc] sm:$0x3f] %v760_v30 }
 0x2eb   :  { %v726_v58 = vpop.f32.mrf.mxu3 }
 0x2ec   :  { %v777_v48 = vpop.f32.mrf.mxu2 }
 0x2ed   :  { %v801_v44 = vpop.f32.mrf.mxu0 }
 0x2f3   :  { %v788_v8 = vpop.f32.mrf.mxu3 }
 0x2f4   :  { %v807_v61 = vrot.slane %v788_v8, 6 }
 0x2f5   :  { %v803_v35 = vpop.f32.mrf.mxu0 }
 0x2f6   :  { %v808_v39 = vsel %vm264_vm0, %v775_v2, %v807_v61  ;;  %v830_v2 = vadd.f32 %v2262_v33, %v801_v44  ;;  %v833_v35 = vrot.slane %v1643_v63, 4  ;;  %v2777_v44 = vld [vmem:[#allocation6_spill] sm:$0xff] }
 0x2f7   :  { %v810_v51 = vadd.f32 %v1643_v63, %v808_v39  ;;  %v2779_v63 = vld [vmem:[#allocation8_spill] sm:$0xff] }
 0x2f9   :  { %v1644_v16 = vmul.f32 -1.442695, %v810_v51 }
 0x2fb   :  { %1726 = vpow2.f32 %v1644_v16  ;;  %v790_v26 = vpop.f32.mrf.mxu3 }
 0x301   :  { %v1727_v13 = vpop.eup %1726 }
 0x302   :  { %v814_v43 = vadd.f32 1.0, %v1727_v13 }
 0x304   :  { %1728 = vrcp.f32 %v814_v43  ;;  %v826_v18 = vand.u32 2147483648, %v814_v43  ;;  %v824_v49 = vand.u32 2147483647, %v814_v43  ;;  %vm820_vm15 = vweird.f32 %v814_v43 }
 0x306   :  { %v827_v8 = vor.u32 1.1754944e-38, %v826_v18  ;;  %vm825_vm2 = vcmp.eq.f32.partialorder %v824_v49, 8.507059e+37  ;;  %v2776_v49 = vld [vmem:[#allocation5_spill] sm:$0xff]  ;;  %v2778_v18 = vld [vmem:[#allocation7_spill] sm:$0xff] }
 0x30a   :  { %v1729_v30 = vpop.eup %1728 }
 0x30b   :  { %v816_v58 = vmul.f32 %v1729_v30, %v814_v43  ;;  %vm821_vm14 = vweird.f32 %v1729_v30 }
 0x30c   :  { %vm822_vm1 = vmor %vm820_vm15, %vm821_vm14 }
 0x30d   :  { %v817_v48 = vsub.f32 1.0, %v816_v58 }
 0x30f   :  { %v818_v62 = vmul.f32 %v1729_v30, %v817_v48 }
 0x311   :  { %v819_v34 = vadd.f32 %v1729_v30, %v818_v62 }
 0x313   :  { %v823_v61 = vsel %vm822_vm1, %v1729_v30, %v819_v34  ;;  %v2775_v34 = vld [vmem:[#allocation4_spill] sm:$0xff] }
 0x314   :  { %v828_v39 = vsel %vm825_vm2, %v827_v8, %v823_v61 }
 0x315   :  { %v831_v51 = vmul.f32 %v830_v2, %v828_v39  ;;  %v839_v58 = vrot.slane %v828_v39, 2  ;;  %v2780_v2 = vld [vmem:[#allocation9_spill] sm:$0xff]  ;;  %v2781_v39 = vld [vmem:[#allocation10_spill] sm:$0xff] }
 0x317   :  { %v835_v16 = vadd.f32 %v833_v35, %v831_v51 }
 0x319   :  { %1730 = vtanh.f32 %v835_v16 }
 0x31f   :  { %v1731_v26 = vpop.eup %1730 }
 0x320   :  { %v837_v13 = vsub.f32 %v2420_v24, %v1731_v26  ;;  %v2774_v24 = vld [vmem:[#allocation3_spill] sm:$0xff] }
 0x322   :  { %v841_v48 = vmul.f32 %v839_v58, %v837_v13 }
 0x324   :  { %v2486_v15 = vadd.f32 %v1731_v26, %v841_v48  ;;  %v2782_v26 = vld [vmem:[#allocation11_spill] sm:$0xff] }
 0x326   :  { %v849_v62 = vpack.c.bf16 %v2486_v15, %v2486_v15 }
 0x328   :  { %858 = vmatmul.bf16.vlgmr.msrb.gmra.mxu1 %v849_v62  ;;  %871 = vmatmul.bf16.vlgmr.msrb.gmra.mxu2 %v849_v62 }
 0x329   :  { %884 = vmatmul.bf16.vlgmr.msrb.gmra.mxu3 %v849_v62  ;;  %909 = vmatmul.bf16.vlgmr.msra.gmra.mxu0 %v849_v62 }
 0x32a   :  { %1011 = vmatpush.bf16.msrb.mxu1 %v2095_v53  ;;  %1036 = vmatpush.bf16.msrb.mxu2 %v1797_v3 }
 0x32b   :  { %1049 = vmatpush.bf16.msrb.mxu3 %v1808_v7  ;;  %1062 = vmatpush.bf16.msra.mxu0 %v1852_v22 }
 0x32e   :  { %1012 = vmatpush.bf16.msrb.mxu1 %v2123_v5  ;;  %1037 = vmatpush.bf16.msrb.mxu2 %v1817_v10 }
 0x32f   :  { %1050 = vmatpush.bf16.msrb.mxu3 %v1820_v11  ;;  %1063 = vmatpush.bf16.msra.mxu0 %v1867_v27 }
 0x332   :  { %1013 = vmatpush.bf16.msrb.mxu1 %v2151_v25  ;;  %1038 = vmatpush.bf16.msrb.mxu2 %v1838_v17 }
 0x333   :  { %1051 = vmatpush.bf16.msrb.mxu3 %v1844_v19  ;;  %1064 = vmatpush.bf16.msra.mxu0 %v1894_v37 }
 0x336   :  { %1014 = vmatpush.bf16.msrb.mxu1 %v2185_v54  ;;  %1039 = vmatpush.bf16.msrb.mxu2 %v1870_v28 }
 0x337   :  { %1052 = vmatpush.bf16.msrb.mxu3 %v1879_v31  ;;  %1065 = vmatpush.bf16.msra.mxu0 %v1921_v46 }
 0x338   :  { %922 = vmatmul.bf16.vlgmr.msra.gmra.mxu1 %v849_v62  ;;  %935 = vmatmul.bf16.vlgmr.msra.gmra.mxu2 %v849_v62 }
 0x33a   :  { %1015 = vmatpush.bf16.msrb.mxu1 %v2215_v21  ;;  %1040 = vmatpush.bf16.msrb.mxu2 %v1897_v38 }
 0x33b   :  { %1053 = vmatpush.bf16.msrb.mxu3 %v1906_v41  ;;  %1066 = vmatpush.bf16.msra.mxu0 %v1948_v55 }
 0x33e   :  { %1016 = vmatpush.bf16.msrb.mxu1 %v2227_v42  ;;  %1041 = vmatpush.bf16.msrb.mxu2 %v1924_v47 }
 0x33f   :  { %1054 = vmatpush.bf16.msrb.mxu3 %v1933_v50  ;;  %1067 = vmatpush.bf16.msra.mxu0 %v1975_v0 }
 0x342   :  { %1017 = vmatpush.bf16.msrb.mxu1 %v2239_v57  ;;  %1042 = vmatpush.bf16.msrb.mxu2 %v1951_v56 }
 0x343   :  { %1055 = vmatpush.bf16.msrb.mxu3 %v1960_v59  ;;  %1068 = vmatpush.bf16.msra.mxu0 %v1994_v9 }
 0x346   :  { %1018 = vmatpush.bf16.msrb.mxu1 %v2250_v12  ;;  %1043 = vmatpush.bf16.msrb.mxu2 %v1978_v1 }
 0x347   :  { %1056 = vmatpush.bf16.msrb.mxu3 %v1989_v6  ;;  %1069 = vmatpush.bf16.msra.mxu0 %v2005_v14 }
 0x34a   :  { %1120 = vmatpush.bf16.msra.mxu1 %v2025_v20  ;;  %1133 = vmatpush.bf16.msra.mxu2 %v2030_v23 }
 0x34e   :  { %1121 = vmatpush.bf16.msra.mxu1 %v2044_v29  ;;  %1134 = vmatpush.bf16.msra.mxu2 %v2049_v32 }
 0x352   :  { %1122 = vmatpush.bf16.msra.mxu1 %v2063_v36  ;;  %1135 = vmatpush.bf16.msra.mxu2 %v2068_v40 }
 0x356   :  { %1123 = vmatpush.bf16.msra.mxu1 %v2081_v45  ;;  %1136 = vmatpush.bf16.msra.mxu2 %v2093_v52 }
 0x35a   :  { %1124 = vmatpush.bf16.msra.mxu1 %v2110_v60  ;;  %1137 = vmatpush.bf16.msra.mxu2 %v2121_v4 }
 0x35e   :  { %1125 = vmatpush.bf16.msra.mxu1 %v2774_v24  ;;  %1138 = vmatpush.bf16.msra.mxu2 %v2775_v34 }
 0x362   :  { %1126 = vmatpush.bf16.msra.mxu1 %v2776_v49  ;;  %1139 = vmatpush.bf16.msra.mxu2 %v2777_v44 }
 0x366   :  { %1127 = vmatpush.bf16.msra.mxu1 %v2778_v18  ;;  %1140 = vmatpush.bf16.msra.mxu2 %v2779_v63 }
 0x3a5   :  { %v859_v43 = vpop.f32.mrf.mxu1 }
 0x3a6   :  { %v910_v30 = vpop.f32.mrf.mxu0  ;;  %v860_v13 = vadd.f32 %v859_v43, %v2782_v26 }
 0x3ab   :  { %v872_v8 = vpop.f32.mrf.mxu2 }
 0x3ac   :  { %v873_v61 = vadd.f32 %v872_v8, %v2780_v2  ;;  %v885_v35 = vpop.f32.mrf.mxu3 }
 0x3ad   :  { %v886_v51 = vadd.f32 %v885_v35, %v2781_v39  ;;  %v861_v16 = vpop.f32.mrf.mxu1  ;;  %v1646_v35 = vld [vmem:[%s2726_s0 + $0x18] sm:$0x3f] }
 0x3ae   :  { %v892_v58 = vrot.slane %v873_v61, 6  ;;  %v912_v48 = vpop.f32.mrf.mxu0 }
 0x3af   :  { %v893_v62 = vrot.slane %v886_v51, 4 }
 0x3b0   :  { %v894_v44 = vsel %vm264_vm0, %v860_v13, %v892_v58 }
 0x3b1   :  { %v895_v18 = vsel %vm490_vm5, %v894_v44, %v893_v62 }
 0x3b2   :  { %1645 = vst [vmem:[%s2728_s5 + $0x12] sm:$0x3f] %v895_v18 }
 0x3b3   :  { %v874_v63 = vpop.f32.mrf.mxu2 }
 0x3b4   :  { %v887_v49 = vpop.f32.mrf.mxu3 }
 0x3b5   :  { %v923_v8 = vpop.f32.mrf.mxu1 }
 0x3b6   :  { %v942_v16 = vrot.slane %v923_v8, 6 }
 0x3b8   :  { %v943_v43 = vsel %vm264_vm0, %v910_v30, %v942_v16 }
 0x3b9   :  { %v945_v61 = vadd.f32 %v1646_v35, %v943_v43  ;;  %v968_v43 = vrot.slane %v1646_v35, 4  ;;  %v2788_v35 = vld [vmem:[#allocation8_spill] sm:$0xff] }
 0x3bb   :  { %v1647_v51 = vmul.f32 -1.442695, %v945_v61  ;;  %v936_v48 = vpop.f32.mrf.mxu2 }
 0x3bc   :  { %v965_v16 = vadd.f32 %v2262_v33, %v936_v48  ;;  %v2783_v33 = vld [vmem:[#allocation3_spill] sm:$0xff] }
 0x3bd   :  { %1732 = vpow2.f32 %v1647_v51  ;;  %v925_v13 = vpop.f32.mrf.mxu1 }
 0x3c3   :  { %v1733_v44 = vpop.eup %1732  ;;  %v938_v58 = vpop.f32.mrf.mxu2 }
 0x3c4   :  { %v949_v62 = vadd.f32 1.0, %v1733_v44 }
 0x3c6   :  { %1734 = vrcp.f32 %v949_v62  ;;  %v961_v26 = vand.u32 2147483648, %v949_v62  ;;  %v959_v2 = vand.u32 2147483647, %v949_v62  ;;  %vm955_vm4 = vweird.f32 %v949_v62 }
 0x3c8   :  { %v962_v30 = vor.u32 1.1754944e-38, %v961_v26  ;;  %vm960_vm7 = vcmp.eq.f32.partialorder %v959_v2, 8.507059e+37  ;;  %v2786_v2 = vld [vmem:[#allocation6_spill] sm:$0xff]  ;;  %v2787_v26 = vld [vmem:[#allocation7_spill] sm:$0xff] }
 0x3cc   :  { %v1735_v18 = vpop.eup %1734 }
 0x3cd   :  { %v951_v63 = vmul.f32 %v1735_v18, %v949_v62  ;;  %vm956_vm3 = vweird.f32 %v1735_v18 }
 0x3ce   :  { %vm957_vm6 = vmor %vm955_vm4, %vm956_vm3 }
 0x3cf   :  { %v952_v49 = vsub.f32 1.0, %v951_v63 }
 0x3d1   :  { %v953_v39 = vmul.f32 %v1735_v18, %v952_v49 }
 0x3d3   :  { %v954_v34 = vadd.f32 %v1735_v18, %v953_v39 }
 0x3d5   :  { %v958_v8 = vsel %vm957_vm6, %v1735_v18, %v954_v34  ;;  %v2785_v34 = vld [vmem:[#allocation5_spill] sm:$0xff] }
 0x3d6   :  { %v963_v61 = vsel %vm960_vm7, %v962_v30, %v958_v8  ;;  %v2789_v18 = vld [vmem:[#allocation9_spill] sm:$0xff]  ;;  %v2790_v8 = vld [vmem:[#allocation10_spill] sm:$0xff] }
 0x3d7   :  { %v966_v51 = vmul.f32 %v965_v16, %v963_v61  ;;  %v974_v63 = vrot.slane %v963_v61, 2 }
 0x3d9   :  { %v970_v13 = vadd.f32 %v968_v43, %v966_v51  ;;  %v2791_v51 = vld [vmem:[#allocation11_spill] sm:$0xff] }
 0x3db   :  { %1736 = vtanh.f32 %v970_v13 }
 0x3e1   :  { %v1737_v44 = vpop.eup %1736 }
 0x3e2   :  { %v972_v58 = vsub.f32 %v2486_v15, %v1737_v44  ;;  %v2784_v15 = vld [vmem:[#allocation4_spill] sm:$0xff] }
 0x3e4   :  { %v976_v49 = vmul.f32 %v974_v63, %v972_v58 }
 0x3e6   :  { %v2552_v24 = vadd.f32 %v1737_v44, %v976_v49 }
 0x3e8   :  { %v984_v39 = vpack.c.bf16 %v2552_v24, %v2552_v24 }
 0x3ea   :  { %993 = vmatmul.bf16.vlgmr.msra.gmra.mxu3 %v984_v39  ;;  %1006 = vmatmul.bf16.vlgmr.msrb.gmra.mxu0 %v984_v39 }
 0x3eb   :  { %1019 = vmatmul.bf16.vlgmr.msrb.gmra.mxu1 %v984_v39  ;;  %1044 = vmatmul.bf16.vlgmr.msrb.gmra.mxu2 %v984_v39 }
 0x3ec   :  { %1146 = vmatpush.bf16.msra.mxu3 %v2095_v53  ;;  %1171 = vmatpush.bf16.msrb.mxu0 %v1797_v3 }
 0x3ed   :  { %1184 = vmatpush.bf16.msrb.mxu1 %v1808_v7  ;;  %1197 = vmatpush.bf16.msrb.mxu2 %v1852_v22 }
 0x3f0   :  { %1147 = vmatpush.bf16.msra.mxu3 %v2123_v5  ;;  %1172 = vmatpush.bf16.msrb.mxu0 %v1817_v10 }
 0x3f1   :  { %1185 = vmatpush.bf16.msrb.mxu1 %v1820_v11  ;;  %1198 = vmatpush.bf16.msrb.mxu2 %v1867_v27 }
 0x3f4   :  { %1148 = vmatpush.bf16.msra.mxu3 %v2151_v25  ;;  %1173 = vmatpush.bf16.msrb.mxu0 %v1838_v17 }
 0x3f5   :  { %1186 = vmatpush.bf16.msrb.mxu1 %v1844_v19  ;;  %1199 = vmatpush.bf16.msrb.mxu2 %v1894_v37 }
 0x3f8   :  { %1149 = vmatpush.bf16.msra.mxu3 %v2185_v54  ;;  %1174 = vmatpush.bf16.msrb.mxu0 %v1870_v28 }
 0x3f9   :  { %1187 = vmatpush.bf16.msrb.mxu1 %v1879_v31  ;;  %1200 = vmatpush.bf16.msrb.mxu2 %v1921_v46 }
 0x3fa   :  { %1057 = vmatmul.bf16.vlgmr.msrb.gmra.mxu3 %v984_v39  ;;  %1070 = vmatmul.bf16.vlgmr.msra.gmra.mxu0 %v984_v39 }
 0x3fc   :  { %1150 = vmatpush.bf16.msra.mxu3 %v2215_v21  ;;  %1175 = vmatpush.bf16.msrb.mxu0 %v1897_v38 }
 0x3fd   :  { %1188 = vmatpush.bf16.msrb.mxu1 %v1906_v41  ;;  %1201 = vmatpush.bf16.msrb.mxu2 %v1948_v55 }
 0x400   :  { %1151 = vmatpush.bf16.msra.mxu3 %v2227_v42  ;;  %1176 = vmatpush.bf16.msrb.mxu0 %v1924_v47 }
 0x401   :  { %1189 = vmatpush.bf16.msrb.mxu1 %v1933_v50  ;;  %1202 = vmatpush.bf16.msrb.mxu2 %v1975_v0 }
 0x404   :  { %1152 = vmatpush.bf16.msra.mxu3 %v2239_v57  ;;  %1177 = vmatpush.bf16.msrb.mxu0 %v1951_v56 }
 0x405   :  { %1190 = vmatpush.bf16.msrb.mxu1 %v1960_v59  ;;  %1203 = vmatpush.bf16.msrb.mxu2 %v1994_v9 }
 0x408   :  { %1153 = vmatpush.bf16.msra.mxu3 %v2250_v12  ;;  %1178 = vmatpush.bf16.msrb.mxu0 %v1978_v1 }
 0x409   :  { %1191 = vmatpush.bf16.msrb.mxu1 %v1989_v6  ;;  %1204 = vmatpush.bf16.msrb.mxu2 %v2005_v14 }
 0x40c   :  { %1255 = vmatpush.bf16.msrb.mxu3 %v2025_v20  ;;  %1268 = vmatpush.bf16.msra.mxu0 %v2030_v23 }
 0x410   :  { %1256 = vmatpush.bf16.msrb.mxu3 %v2044_v29  ;;  %1269 = vmatpush.bf16.msra.mxu0 %v2049_v32 }
 0x414   :  { %1257 = vmatpush.bf16.msrb.mxu3 %v2063_v36  ;;  %1270 = vmatpush.bf16.msra.mxu0 %v2068_v40 }
 0x418   :  { %1258 = vmatpush.bf16.msrb.mxu3 %v2081_v45  ;;  %1271 = vmatpush.bf16.msra.mxu0 %v2093_v52 }
 0x41c   :  { %1259 = vmatpush.bf16.msrb.mxu3 %v2110_v60  ;;  %1272 = vmatpush.bf16.msra.mxu0 %v2121_v4 }
 0x420   :  { %1260 = vmatpush.bf16.msrb.mxu3 %v2783_v33  ;;  %1273 = vmatpush.bf16.msra.mxu0 %v2784_v15 }
 0x424   :  { %1261 = vmatpush.bf16.msrb.mxu3 %v2785_v34  ;;  %1274 = vmatpush.bf16.msra.mxu0 %v2786_v2 }
 0x428   :  { %1262 = vmatpush.bf16.msrb.mxu3 %v2787_v26  ;;  %1275 = vmatpush.bf16.msra.mxu0 %v2788_v35 }
 0x467   :  { %v1007_v48 = vpop.f32.mrf.mxu0 }
 0x468   :  { %v1020_v62 = vpop.f32.mrf.mxu1  ;;  %v1008_v30 = vadd.f32 %v1007_v48, %v2789_v18 }
 0x469   :  { %v1021_v16 = vadd.f32 %v1020_v62, %v2790_v8 }
 0x46a   :  { %v1027_v61 = vrot.slane %v1008_v30, 6  ;;  %v1649_v30 = vld [vmem:[%s2726_s0 + $0x1e] sm:$0x3f] }
 0x46b   :  { %v1028_v58 = vrot.slane %v1021_v16, 4 }
 0x46d   :  { %v994_v43 = vpop.f32.mrf.mxu3 }
 0x46e   :  { %v995_v13 = vadd.f32 %v994_v43, %v2791_v51  ;;  %v1045_v44 = vpop.f32.mrf.mxu2 }
 0x46f   :  { %v1009_v63 = vpop.f32.mrf.mxu0 }
 0x470   :  { %v1029_v49 = vsel %vm264_vm0, %v995_v13, %v1027_v61  ;;  %v1022_v39 = vpop.f32.mrf.mxu1 }
 0x471   :  { %v1030_v26 = vsel %vm490_vm5, %v1029_v49, %v1028_v58 }
 0x472   :  { %1648 = vst [vmem:[%s2728_s5 + $0x18] sm:$0x3f] %v1030_v26 }
 0x475   :  { %v996_v35 = vpop.f32.mrf.mxu3 }
 0x476   :  { %v1047_v48 = vpop.f32.mrf.mxu2 }
 0x477   :  { %v1071_v18 = vpop.f32.mrf.mxu0 }
 0x47d   :  { %v1058_v62 = vpop.f32.mrf.mxu3 }
 0x47e   :  { %v1077_v43 = vrot.slane %v1058_v62, 6 }
 0x47f   :  { %v1073_v16 = vpop.f32.mrf.mxu0 }
 0x480   :  { %v1078_v63 = vsel %vm264_vm0, %v1045_v44, %v1077_v43  ;;  %v2619_v44 = vld [vmem:[%s2724_s2] ss:$0 sm:$0xff] }
 0x481   :  { %v1080_v61 = vadd.f32 %v1649_v30, %v1078_v63  ;;  %v1100_v43 = vadd.f32 %v2619_v44, %v1071_v18  ;;  %v1103_v63 = vrot.slane %v1649_v30, 4 }
 0x483   :  { %v1650_v13 = vmul.f32 -1.442695, %v1080_v61 }
 0x485   :  { %1738 = vpow2.f32 %v1650_v13  ;;  %v1060_v58 = vpop.f32.mrf.mxu3 }
 0x48b   :  { %v1739_v49 = vpop.eup %1738 }
 0x48c   :  { %v1084_v39 = vadd.f32 1.0, %v1739_v49 }
 0x48e   :  { %1740 = vrcp.f32 %v1084_v39  ;;  %v1096_v51 = vand.u32 2147483648, %v1084_v39  ;;  %v1094_v2 = vand.u32 2147483647, %v1084_v39  ;;  %vm1090_vm9 = vweird.f32 %v1084_v39 }
 0x490   :  { %v1097_v62 = vor.u32 1.1754944e-38, %v1096_v51  ;;  %vm1095_vm11 = vcmp.eq.f32.partialorder %v1094_v2, 8.507059e+37 }
 0x494   :  { %v1741_v26 = vpop.eup %1740 }
 0x495   :  { %v1086_v35 = vmul.f32 %v1741_v26, %v1084_v39  ;;  %vm1091_vm8 = vweird.f32 %v1741_v26 }
 0x496   :  { %vm1092_vm10 = vmor %vm1090_vm9, %vm1091_vm8 }
 0x497   :  { %v1087_v48 = vsub.f32 1.0, %v1086_v35 }
 0x499   :  { %v1088_v8 = vmul.f32 %v1741_v26, %v1087_v48 }
 0x49b   :  { %v1089_v34 = vadd.f32 %v1741_v26, %v1088_v8 }
 0x49d   :  { %v1093_v16 = vsel %vm1092_vm10, %v1741_v26, %v1089_v34 }
 0x49e   :  { %v1098_v61 = vsel %vm1095_vm11, %v1097_v62, %v1093_v16 }
 0x49f   :  { %v1101_v13 = vmul.f32 %v1100_v43, %v1098_v61  ;;  %v1109_v39 = vrot.slane %v1098_v61, 2 }
 0x4a1   :  { %v1105_v58 = vadd.f32 %v1103_v63, %v1101_v13 }
 0x4a3   :  { %1742 = vtanh.f32 %v1105_v58 }
 0x4a9   :  { %v1743_v49 = vpop.eup %1742 }
 0x4aa   :  { %v1107_v8 = vsub.f32 %v2552_v24, %v1743_v49 }
 0x4ac   :  { %v1111_v35 = vmul.f32 %v1109_v39, %v1107_v8 }
 0x4ae   :  { %v2623_v51 = vadd.f32 %v1743_v49, %v1111_v35 }
 0x4b0   :  { %v1119_v48 = vpack.c.bf16 %v2623_v51, %v2623_v51 }
 0x4b2   :  { %1128 = vmatmul.bf16.vlgmr.msra.gmra.mxu1 %v1119_v48  ;;  %1141 = vmatmul.bf16.vlgmr.msra.gmra.mxu2 %v1119_v48 }
 0x4b3   :  { %1154 = vmatmul.bf16.vlgmr.msra.gmra.mxu3 %v1119_v48  ;;  %1179 = vmatmul.bf16.vlgmr.msrb.gmra.mxu0 %v1119_v48 }
 0x4b4   :  { %1281 = vmatpush.bf16.msra.mxu1 %v2095_v53  ;;  %1306 = vmatpush.bf16.msra.mxu2 %v1797_v3  ;;  %v2792_v3 = vld [vmem:[#allocation5_spill] sm:$0xff] }
 0x4b5   :  { %1319 = vmatpush.bf16.msra.mxu3 %v1808_v7  ;;  %1332 = vmatpush.bf16.msrb.mxu0 %v1852_v22  ;;  %v2793_v7 = vld [vmem:[#allocation6_spill] sm:$0xff] }
 0x4b8   :  { %1282 = vmatpush.bf16.msra.mxu1 %v2123_v5  ;;  %1307 = vmatpush.bf16.msra.mxu2 %v1817_v10  ;;  %v2794_v10 = vld [vmem:[#allocation7_spill] sm:$0xff] }
 0x4b9   :  { %1320 = vmatpush.bf16.msra.mxu3 %v1820_v11  ;;  %1333 = vmatpush.bf16.msrb.mxu0 %v1867_v27  ;;  %v2795_v11 = vld [vmem:[#allocation8_spill] sm:$0xff]  ;;  %v2796_v27 = vld [vmem:[#allocation9_spill] sm:$0xff] }
 0x4bc   :  { %1283 = vmatpush.bf16.msra.mxu1 %v2151_v25  ;;  %1308 = vmatpush.bf16.msra.mxu2 %v1838_v17 }
 0x4bd   :  { %1321 = vmatpush.bf16.msra.mxu3 %v1844_v19  ;;  %1334 = vmatpush.bf16.msrb.mxu0 %v1894_v37  ;;  %v2797_v37 = vld [vmem:[#allocation10_spill] sm:$0xff] }
 0x4c0   :  { %1284 = vmatpush.bf16.msra.mxu1 %v2185_v54  ;;  %1309 = vmatpush.bf16.msra.mxu2 %v1870_v28 }
 0x4c1   :  { %1322 = vmatpush.bf16.msra.mxu3 %v1879_v31  ;;  %1335 = vmatpush.bf16.msrb.mxu0 %v1921_v46  ;;  %v2798_v46 = vld [vmem:[#allocation11_spill] sm:$0xff] }
 0x4c2   :  { %1192 = vmatmul.bf16.vlgmr.msrb.gmra.mxu1 %v1119_v48  ;;  %1205 = vmatmul.bf16.vlgmr.msrb.gmra.mxu2 %v1119_v48 }
 0x4c4   :  { %1285 = vmatpush.bf16.msra.mxu1 %v2215_v21  ;;  %1310 = vmatpush.bf16.msra.mxu2 %v1897_v38 }
 0x4c5   :  { %1323 = vmatpush.bf16.msra.mxu3 %v1906_v41  ;;  %1336 = vmatpush.bf16.msrb.mxu0 %v1948_v55 }
 0x4c8   :  { %1286 = vmatpush.bf16.msra.mxu1 %v2227_v42  ;;  %1311 = vmatpush.bf16.msra.mxu2 %v1924_v47 }
 0x4c9   :  { %1324 = vmatpush.bf16.msra.mxu3 %v1933_v50  ;;  %1337 = vmatpush.bf16.msrb.mxu0 %v1975_v0 }
 0x4cc   :  { %1287 = vmatpush.bf16.msra.mxu1 %v2239_v57  ;;  %1312 = vmatpush.bf16.msra.mxu2 %v1951_v56 }
 0x4cd   :  { %1325 = vmatpush.bf16.msra.mxu3 %v1960_v59  ;;  %1338 = vmatpush.bf16.msrb.mxu0 %v1994_v9 }
 0x4d0   :  { %1288 = vmatpush.bf16.msra.mxu1 %v2250_v12  ;;  %1313 = vmatpush.bf16.msra.mxu2 %v1978_v1 }
 0x4d1   :  { %1326 = vmatpush.bf16.msra.mxu3 %v1989_v6  ;;  %1339 = vmatpush.bf16.msrb.mxu0 %v2005_v14  ;;  %v1652_v14 = vld [vmem:[%s2726_s0 + $0x24] sm:$0x3f] }
 0x4d2   :  { %v1238_v43 = vrot.slane %v1652_v14, 4 }
 0x4d4   :  { %1390 = vmatpush.bf16.msrb.mxu1 %v2025_v20  ;;  %1403 = vmatpush.bf16.msrb.mxu2 %v2030_v23 }
 0x4d8   :  { %1391 = vmatpush.bf16.msrb.mxu1 %v2044_v29  ;;  %1404 = vmatpush.bf16.msrb.mxu2 %v2049_v32 }
 0x4dc   :  { %1392 = vmatpush.bf16.msrb.mxu1 %v2063_v36  ;;  %1405 = vmatpush.bf16.msrb.mxu2 %v2068_v40 }
 0x4e0   :  { %1393 = vmatpush.bf16.msrb.mxu1 %v2081_v45  ;;  %1406 = vmatpush.bf16.msrb.mxu2 %v2093_v52 }
 0x4e4   :  { %1394 = vmatpush.bf16.msrb.mxu1 %v2110_v60  ;;  %1407 = vmatpush.bf16.msrb.mxu2 %v2121_v4 }
 0x4e8   :  { %1395 = vmatpush.bf16.msrb.mxu1 %v2783_v33  ;;  %1408 = vmatpush.bf16.msrb.mxu2 %v2784_v15 }
 0x4ec   :  { %1396 = vmatpush.bf16.msrb.mxu1 %v2792_v3  ;;  %1409 = vmatpush.bf16.msrb.mxu2 %v2793_v7 }
 0x4f0   :  { %1397 = vmatpush.bf16.msrb.mxu1 %v2794_v10  ;;  %1410 = vmatpush.bf16.msrb.mxu2 %v2795_v11 }
 0x52f   :  { %v1129_v17 = vpop.f32.mrf.mxu1 }
 0x530   :  { %v1180_v19 = vpop.f32.mrf.mxu0  ;;  %v1130_v47 = vadd.f32 %v1129_v17, %v2798_v46 }
 0x535   :  { %v1142_v22 = vpop.f32.mrf.mxu2 }
 0x536   :  { %v1143_v28 = vadd.f32 %v1142_v22, %v2796_v27  ;;  %v1155_v31 = vpop.f32.mrf.mxu3 }
 0x537   :  { %v1156_v38 = vadd.f32 %v1155_v31, %v2797_v37  ;;  %v1131_v41 = vpop.f32.mrf.mxu1 }
 0x538   :  { %v1162_v50 = vrot.slane %v1143_v28, 6  ;;  %v1182_v55 = vpop.f32.mrf.mxu0  ;;  %v1655_v28 = vld [vmem:[%s2726_s0 + $0x2a] sm:$0x3f] }
 0x539   :  { %v1163_v56 = vrot.slane %v1156_v38, 4 }
 0x53a   :  { %v1164_v59 = vsel %vm264_vm0, %v1130_v47, %v1162_v50 }
 0x53b   :  { %v1165_v0 = vsel %vm490_vm5, %v1164_v59, %v1163_v56 }
 0x53c   :  { %1651 = vst [vmem:[%s2728_s5 + $0x1e] sm:$0x3f] %v1165_v0 }
 0x53d   :  { %v1144_v1 = vpop.f32.mrf.mxu2 }
 0x53e   :  { %v1157_v6 = vpop.f32.mrf.mxu3 }
 0x53f   :  { %v1193_v9 = vpop.f32.mrf.mxu1 }
 0x540   :  { %v1212_v20 = vrot.slane %v1193_v9, 6 }
 0x542   :  { %v1213_v23 = vsel %vm264_vm0, %v1180_v19, %v1212_v20 }
 0x543   :  { %v1215_v29 = vadd.f32 %v1652_v14, %v1213_v23 }
 0x545   :  { %v1653_v32 = vmul.f32 -1.442695, %v1215_v29  ;;  %v1206_v36 = vpop.f32.mrf.mxu2 }
 0x546   :  { %v1235_v62 = vadd.f32 %v2619_v44, %v1206_v36 }
 0x547   :  { %1744 = vpow2.f32 %v1653_v32  ;;  %v1195_v40 = vpop.f32.mrf.mxu1 }
 0x548   :  { %v1373_v40 = vrot.slane %v1655_v28, 4 }
 0x54d   :  { %v1745_v45 = vpop.eup %1744  ;;  %v1208_v52 = vpop.f32.mrf.mxu2 }
 0x54e   :  { %v1219_v60 = vadd.f32 1.0, %v1745_v45 }
 0x550   :  { %1746 = vrcp.f32 %v1219_v60  ;;  %v1231_v15 = vand.u32 2147483648, %v1219_v60  ;;  %v1229_v2 = vand.u32 2147483647, %v1219_v60  ;;  %vm1225_vm13 = vweird.f32 %v1219_v60 }
 0x552   :  { %v1232_v30 = vor.u32 1.1754944e-38, %v1231_v15  ;;  %vm1230_vm15 = vcmp.eq.f32.partialorder %v1229_v2, 8.507059e+37 }
 0x556   :  { %v1747_v4 = vpop.eup %1746 }
 0x557   :  { %v1221_v24 = vmul.f32 %v1747_v4, %v1219_v60  ;;  %vm1226_vm12 = vweird.f32 %v1747_v4 }
 0x558   :  { %vm1227_vm14 = vmor %vm1225_vm13, %vm1226_vm12 }
 0x559   :  { %v1222_v33 = vsub.f32 1.0, %v1221_v24 }
 0x55b   :  { %v1223_v34 = vmul.f32 %v1747_v4, %v1222_v33 }
 0x55d   :  { %v1224_v18 = vadd.f32 %v1747_v4, %v1223_v34 }
 0x55f   :  { %v1228_v26 = vsel %vm1227_vm14, %v1747_v4, %v1224_v18 }
 0x560   :  { %v1233_v16 = vsel %vm1230_vm15, %v1232_v30, %v1228_v26 }
 0x561   :  { %v1236_v63 = vmul.f32 %v1235_v62, %v1233_v16  ;;  %v1244_v49 = vrot.slane %v1233_v16, 2 }
 0x563   :  { %v1240_v61 = vadd.f32 %v1238_v43, %v1236_v63 }
 0x565   :  { %1748 = vtanh.f32 %v1240_v61 }
 0x56b   :  { %v1749_v13 = vpop.eup %1748 }
 0x56c   :  { %v1242_v58 = vsub.f32 %v2623_v51, %v1749_v13 }
 0x56e   :  { %v1246_v8 = vmul.f32 %v1244_v49, %v1242_v58 }
 0x570   :  { %v2689_v39 = vadd.f32 %v1749_v13, %v1246_v8 }
 0x572   :  { %v1254_v35 = vpack.c.bf16 %v2689_v39, %v2689_v39 }
 0x574   :  { %1263 = vmatmul.bf16.vlgmr.msrb.gmra.mxu3 %v1254_v35  ;;  %1276 = vmatmul.bf16.vlgmr.msra.gmra.mxu0 %v1254_v35 }
 0x575   :  { %1289 = vmatmul.bf16.vlgmr.msra.gmra.mxu1 %v1254_v35  ;;  %1314 = vmatmul.bf16.vlgmr.msra.gmra.mxu2 %v1254_v35 }
 0x576   :  { %1416 = vmatpush.bf16.msrb.mxu3 %v2095_v53 }
 0x57a   :  { %1417 = vmatpush.bf16.msrb.mxu3 %v2123_v5 }
 0x57e   :  { %1418 = vmatpush.bf16.msrb.mxu3 %v2151_v25 }
 0x582   :  { %1419 = vmatpush.bf16.msrb.mxu3 %v2185_v54 }
 0x584   :  { %1327 = vmatmul.bf16.vlgmr.msra.gmra.mxu3 %v1254_v35  ;;  %1340 = vmatmul.bf16.vlgmr.msrb.gmra.mxu0 %v1254_v35 }
 0x586   :  { %1420 = vmatpush.bf16.msrb.mxu3 %v2215_v21 }
 0x58a   :  { %1421 = vmatpush.bf16.msrb.mxu3 %v2227_v42 }
 0x58e   :  { %1422 = vmatpush.bf16.msrb.mxu3 %v2239_v57 }
 0x592   :  { %1423 = vmatpush.bf16.msrb.mxu3 %v2250_v12 }
 0x5f1   :  { %v1277_v51 = vpop.f32.mrf.mxu0 }
 0x5f2   :  { %v1290_v48 = vpop.f32.mrf.mxu1  ;;  %v1278_v53 = vadd.f32 %v1277_v51, %v2796_v27 }
 0x5f3   :  { %v1291_v5 = vadd.f32 %v1290_v48, %v2797_v37 }
 0x5f4   :  { %v1297_v25 = vrot.slane %v1278_v53, 6 }
 0x5f5   :  { %v1298_v10 = vrot.slane %v1291_v5, 4 }
 0x5f7   :  { %v1264_v3 = vpop.f32.mrf.mxu3 }
 0x5f8   :  { %v1265_v54 = vadd.f32 %v1264_v3, %v2798_v46  ;;  %v1315_v7 = vpop.f32.mrf.mxu2 }
 0x5f9   :  { %v1279_v11 = vpop.f32.mrf.mxu0 }
 0x5fa   :  { %v1299_v21 = vsel %vm264_vm0, %v1265_v54, %v1297_v25  ;;  %v1292_v42 = vpop.f32.mrf.mxu1 }
 0x5fb   :  { %v1300_v57 = vsel %vm490_vm5, %v1299_v21, %v1298_v10 }
 0x5fc   :  { %1654 = vst [vmem:[%s2728_s5 + $0x24] sm:$0x3f] %v1300_v57 }
 0x5ff   :  { %v1266_v12 = vpop.f32.mrf.mxu3 }
 0x600   :  { %v1317_v17 = vpop.f32.mrf.mxu2 }
 0x601   :  { %v1341_v19 = vpop.f32.mrf.mxu0 }
 0x602   :  { %v1370_v32 = vadd.f32 %v2619_v44, %v1341_v19 }
 0x607   :  { %v1328_v22 = vpop.f32.mrf.mxu3 }
 0x608   :  { %v1347_v31 = vrot.slane %v1328_v22, 6 }
 0x609   :  { %v1343_v38 = vpop.f32.mrf.mxu0 }
 0x60a   :  { %v1348_v41 = vsel %vm264_vm0, %v1315_v7, %v1347_v31 }
 0x60b   :  { %v1350_v47 = vadd.f32 %v1655_v28, %v1348_v41 }
 0x60d   :  { %v1656_v50 = vmul.f32 -1.442695, %v1350_v47 }
 0x60f   :  { %1750 = vpow2.f32 %v1656_v50  ;;  %v1330_v55 = vpop.f32.mrf.mxu3 }
 0x615   :  { %v1751_v56 = vpop.eup %1750 }
 0x616   :  { %v1354_v59 = vadd.f32 1.0, %v1751_v56 }
 0x618   :  { %1752 = vrcp.f32 %v1354_v59  ;;  %v1366_v9 = vand.u32 2147483648, %v1354_v59  ;;  %v1364_v20 = vand.u32 2147483647, %v1354_v59  ;;  %vm1360_vm2 = vweird.f32 %v1354_v59 }
 0x61a   :  { %v1367_v29 = vor.u32 1.1754944e-38, %v1366_v9  ;;  %vm1365_vm4 = vcmp.eq.f32.partialorder %v1364_v20, 8.507059e+37 }
 0x61e   :  { %v1753_v0 = vpop.eup %1752 }
 0x61f   :  { %v1356_v1 = vmul.f32 %v1753_v0, %v1354_v59  ;;  %vm1361_vm1 = vweird.f32 %v1753_v0 }
 0x620   :  { %vm1362_vm3 = vmor %vm1360_vm2, %vm1361_vm1 }
 0x621   :  { %v1357_v6 = vsub.f32 1.0, %v1356_v1 }
 0x623   :  { %v1358_v14 = vmul.f32 %v1753_v0, %v1357_v6 }
 0x625   :  { %v1359_v23 = vadd.f32 %v1753_v0, %v1358_v14 }
 0x627   :  { %v1363_v36 = vsel %vm1362_vm3, %v1753_v0, %v1359_v23 }
 0x628   :  { %v1368_v45 = vsel %vm1365_vm4, %v1367_v29, %v1363_v36 }
 0x629   :  { %v1371_v52 = vmul.f32 %v1370_v32, %v1368_v45  ;;  %v1379_v33 = vrot.slane %v1368_v45, 2 }
 0x62b   :  { %v1375_v60 = vadd.f32 %v1373_v40, %v1371_v52 }
 0x62d   :  { %1754 = vtanh.f32 %v1375_v60 }
 0x633   :  { %v1755_v4 = vpop.eup %1754 }
 0x634   :  { %v1377_v24 = vsub.f32 %v2689_v39, %v1755_v4 }
 0x636   :  { %v1381_v15 = vmul.f32 %v1379_v33, %v1377_v24 }
 0x638   :  { %v1382_v34 = vadd.f32 %v1755_v4, %v1381_v15 }
 0x63a   :  { %v1389_v2 = vpack.c.bf16 %v1382_v34, %v1382_v34  ;;  %1439 = vst [vmem:[#allocation2] sm:$0x3] %v1382_v34 }
 0x63c   :  { %1398 = vmatmul.bf16.vlgmr.msrb.gmra.mxu1 %v1389_v2  ;;  %1411 = vmatmul.bf16.vlgmr.msrb.gmra.mxu2 %v1389_v2 }
 0x63d   :  { %1424 = vmatmul.bf16.vlgmr.msrb.gmra.mxu3 %v1389_v2 }
 0x6b9   :  { %v1399_v18 = vpop.f32.mrf.mxu1 }
 0x6ba   :  { %v1400_v16 = vadd.f32 %v1399_v18, %v2798_v46 }
 0x6bf   :  { %v1412_v44 = vpop.f32.mrf.mxu2 }
 0x6c0   :  { %v1413_v30 = vadd.f32 %v1412_v44, %v2796_v27  ;;  %v1425_v26 = vpop.f32.mrf.mxu3 }
 0x6c1   :  { %v1426_v62 = vadd.f32 %v1425_v26, %v2797_v37  ;;  %v1401_v43 = vpop.f32.mrf.mxu1 }
 0x6c2   :  { %v1432_v63 = vrot.slane %v1413_v30, 6 }
 0x6c3   :  { %v1433_v61 = vrot.slane %v1426_v62, 4 }
 0x6c4   :  { %v1434_v13 = vsel %vm264_vm0, %v1400_v16, %v1432_v63 }
 0x6c5   :  { %v1435_v58 = vsel %vm490_vm5, %v1434_v13, %v1433_v61 }
 0x6c6   :  { %1657 = vst [vmem:[%s2728_s5 + $0x2a] sm:$0x3f] %v1435_v58 }
 0x6c7   :  { %v1414_v49 = vpop.f32.mrf.mxu2 }
 0x6c8   :  { %v1427_v8 = vpop.f32.mrf.mxu3 }

</bundles_post_ra>
